<compile_context>
chip_gen: v5e
topology: v5e:2x2
jax: 0.10.0
libtpu: 0.0.40
codegen_flags: <defaults>
</compile_context>

<pallas_src>
import functools

import jax
import jax.numpy as jnp
from jax.experimental import pallas as pl
from jax.experimental.pallas import tpu as pltpu

BN_EPS = 1e-5
LANE = 128


def _round_up(v, m):
    return (v + m - 1) // m * m


def _cout_tile(coutp):
    return 256 if coutp % 256 == 0 else 128


# ----------------------------- Pallas kernels ------------------------------

def _matmul_bn_kernel(x_ref, w_ref, b_ref, o_ref, *, relu):
    """out = maybe_relu(x @ w_scaled + shift); bf16 inputs, f32 MXU accumulate."""
    acc = jnp.dot(x_ref[...], w_ref[...], preferred_element_type=jnp.float32)
    acc = acc + b_ref[...]
    if relu:
        acc = jnp.maximum(acc, 0.0)
    o_ref[...] = acc.astype(o_ref.dtype)


def _conv3x3_s1_kernel(*refs, relu, has_residual, ho, wo):
    """stride-1 3x3 conv as an in-VMEM 9-tap reduction + BN shift [+ residual] [+ ReLU]."""
    if has_residual:
        x_ref, w_ref, b_ref, r_ref, o_ref = refs
    else:
        x_ref, w_ref, b_ref, o_ref = refs
        r_ref = None
    cin = x_ref.shape[-1]
    ct = o_ref.shape[-1]
    acc = jnp.zeros((ho * wo, ct), jnp.float32)
    for dy in range(3):
        for dx in range(3):
            xs = x_ref[:, dy:dy + ho, dx:dx + wo, :].reshape(ho * wo, cin)
            acc = acc + jnp.dot(xs, w_ref[dy * 3 + dx],
                                preferred_element_type=jnp.float32)
    acc = acc + b_ref[...]
    if r_ref is not None:
        acc = acc + r_ref[...].reshape(ho * wo, ct).astype(jnp.float32)
    if relu:
        acc = jnp.maximum(acc, 0.0)
    o_ref[...] = acc.reshape(1, ho, wo, ct).astype(o_ref.dtype)


# ------------------------- conv wrappers (JAX glue) -------------------------

def matmul_bn(x2d, w2d, shift, relu=False):
    """maybe_relu(x2d @ w2d + shift). x2d/w2d bf16, shift f32 (1, Coutp)."""
    m, k = x2d.shape
    coutp = w2d.shape[1]
    m_pad = _round_up(m, 8)
    tm = min(256, m_pad)
    m_pad = _round_up(m_pad, tm)
    if m_pad != m:
        x2d = jnp.pad(x2d, ((0, m_pad - m), (0, 0)))
    ct = _cout_tile(coutp)
    grid = (m_pad // tm, coutp // ct)
    out = pl.pallas_call(
        functools.partial(_matmul_bn_kernel, relu=relu),
        out_shape=jax.ShapeDtypeStruct((m_pad, coutp), jnp.bfloat16),
        grid=grid,
        in_specs=[
            pl.BlockSpec((tm, k), lambda i, j: (i, 0)),
            pl.BlockSpec((k, ct), lambda i, j: (0, j)),
            pl.BlockSpec((1, ct), lambda i, j: (0, j)),
        ],
        out_specs=pl.BlockSpec((tm, ct), lambda i, j: (i, j)),
        compiler_params=pltpu.CompilerParams(
            dimension_semantics=("parallel", "parallel")),
    )(x2d, w2d, shift)
    return out if m_pad == m else out[:m]


def conv3x3_bn(x_nhwc, w9, shift, stride, residual=None, relu=False):
    """3x3 conv (pad=1) + folded BN [+ residual] [+ ReLU] on channel-padded bf16 NHWC."""
    n, h, w, cinp = x_nhwc.shape
    coutp = w9.shape[-1]

    if stride == 1:
        ho, wo = h, w
        xp = jnp.pad(x_nhwc, ((0, 0), (1, 1), (1, 1), (0, 0)))
        ct = _cout_tile(coutp)
        grid = (n, coutp // ct)
        in_specs = [
            pl.BlockSpec((1, h + 2, w + 2, cinp), lambda b, j: (b, 0, 0, 0)),
            pl.BlockSpec((9, cinp, ct), lambda b, j: (0, 0, j)),
            pl.BlockSpec((1, ct), lambda b, j: (0, j)),
        ]
        args = [xp, w9, shift]
        if residual is not None:
            in_specs.append(pl.BlockSpec((1, ho, wo, ct), lambda b, j: (b, 0, 0, j)))
            args.append(residual)
        kernel = functools.partial(_conv3x3_s1_kernel, relu=relu,
                                   has_residual=residual is not None, ho=ho, wo=wo)
        return pl.pallas_call(
            kernel,
            out_shape=jax.ShapeDtypeStruct((n, ho, wo, coutp), jnp.bfloat16),
            grid=grid,
            in_specs=in_specs,
            out_specs=pl.BlockSpec((1, ho, wo, ct), lambda b, j: (b, 0, 0, j)),
            compiler_params=pltpu.CompilerParams(
                dimension_semantics=("parallel", "parallel")),
        )(*args)

    # Strided 3x3 (only the first conv of the stage): im2col (~9/stride^2 x input) + matmul.
    assert residual is None
    ho = (h + 2 - 3) // stride + 1
    wo = (w + 2 - 3) // stride + 1
    xp = jnp.pad(x_nhwc, ((0, 0), (1, 1), (1, 1), (0, 0)))
    cols = []
    for dy in range(3):
        for dx in range(3):
            cols.append(xp[:, dy:dy + stride * (ho - 1) + 1:stride,
                           dx:dx + stride * (wo - 1) + 1:stride, :])
    patches = jnp.concatenate(cols, axis=-1).reshape(n * ho * wo, 9 * cinp)
    out2 = matmul_bn(patches, w9.reshape(9 * cinp, coutp), shift, relu=relu)
    return out2.reshape(n, ho, wo, coutp)


def conv1x1_bn(x_nhwc, wmat, shift, stride, relu=False):
    """1x1 conv (stride=s, pad=0) + folded BN [+ ReLU] (projection path)."""
    xs = x_nhwc[:, ::stride, ::stride, :]
    n, ho, wo, cinp = xs.shape
    out2 = matmul_bn(xs.reshape(n * ho * wo, cinp), wmat, shift, relu=relu)
    return out2.reshape(n, ho, wo, wmat.shape[1])


# -------------------------- parameter construction --------------------------

def init_bn_params(key, c):
    k1, k2, k3, k4 = jax.random.split(key, 4)
    gamma = 1.0 + 0.1 * jax.random.normal(k1, (c,), jnp.float32)
    beta = 0.1 * jax.random.normal(k2, (c,), jnp.float32)
    mean = 0.1 * jax.random.normal(k3, (c,), jnp.float32)
    var = jnp.abs(1.0 + 0.1 * jax.random.normal(k4, (c,), jnp.float32))
    scale = gamma / jnp.sqrt(var + BN_EPS)
    shift = beta - mean * scale
    return scale, shift


def init_conv_weight(key, cout, cin, k):
    fan_in = cin * k * k
    return jax.random.normal(key, (cout, cin, k, k), jnp.float32) * (2.0 / fan_in) ** 0.5


def _prep_w3x3(w_oihw, scale, cinp, coutp):
    cout, cin = w_oihw.shape[:2]
    w = w_oihw * scale[:, None, None, None]            # fold BN scale into weights
    w = jnp.transpose(w, (2, 3, 1, 0))                 # (kh, kw, cin, cout)
    w = jnp.pad(w, ((0, 0), (0, 0), (0, cinp - cin), (0, coutp - cout)))
    return w.reshape(9, cinp, coutp).astype(jnp.bfloat16)


def _prep_w1x1(w_oihw, scale, cinp, coutp):
    cout, cin = w_oihw.shape[:2]
    w = (w_oihw * scale[:, None, None, None])[:, :, 0, 0].T   # (cin, cout)
    w = jnp.pad(w, ((0, cinp - cin), (0, coutp - cout)))
    return w.astype(jnp.bfloat16)


def _prep_shift(shift, coutp):
    return jnp.pad(shift, (0, coutp - shift.shape[0])).reshape(1, coutp).astype(jnp.float32)


def init_res_stage_params(key, w_in, w_out, stride, d):
    coutp = _round_up(w_out, LANE)
    blocks = []
    for i in range(d):
        b_stride = stride if i == 0 else 1
        b_w_in = w_in if i == 0 else w_out
        cinp = _round_up(b_w_in, LANE)
        proj = (b_w_in != w_out) or (b_stride != 1)
        key, ka, kabn, kb, kbbn, kp, kpbn = jax.random.split(key, 7)
        a_w = init_conv_weight(ka, w_out, b_w_in, 3)
        a_s, a_b = init_bn_params(kabn, w_out)
        b_w = init_conv_weight(kb, w_out, w_out, 3)
        b_s, b_b = init_bn_params(kbbn, w_out)
        blk = {
            "stride": b_stride,
            "proj": proj,
            "a_w9": _prep_w3x3(a_w, a_s, cinp, coutp),
            "a_shift": _prep_shift(a_b, coutp),
            "b_w9": _prep_w3x3(b_w, b_s, coutp, coutp),
            "b_shift": _prep_shift(b_b, coutp),
            "raw": {"a_w": a_w, "a_s": a_s, "a_b": a_b,
                    "b_w": b_w, "b_s": b_s, "b_b": b_b},
        }
        if proj:
            p_w = init_conv_weight(kp, w_out, b_w_in, 1)
            p_s, p_b = init_bn_params(kpbn, w_out)
            blk["p_w"] = _prep_w1x1(p_w, p_s, cinp, coutp)
            blk["p_shift"] = _prep_shift(p_b, coutp)
            blk["raw"].update({"p_w": p_w, "p_s": p_s, "p_b": p_b})
        blocks.append(blk)
    return blocks


# ------------------------------ forward pass --------------------------------

def res_block_forward(x, blk):
    s = blk["stride"]
    # F(x): 3x3(stride) -> BN -> ReLU, then 3x3(1) -> BN fused with residual add + block ReLU.
    a = conv3x3_bn(x, blk["a_w9"], blk["a_shift"], stride=s, residual=None, relu=True)
    if blk["proj"]:
        residual = conv1x1_bn(x, blk["p_w"], blk["p_shift"], stride=s, relu=False)
    else:
        residual = x
    return conv3x3_bn(a, blk["b_w9"], blk["b_shift"], stride=1,
                      residual=residual, relu=True)


def res_stage_forward(x_nchw, params, w_out):
    x = jnp.transpose(x_nchw, (0, 2, 3, 1)).astype(jnp.float32)   # NCHW -> NHWC
    cin = x.shape[-1]
    cinp = _round_up(cin, LANE)
    x = jnp.pad(x, ((0, 0), (0, 0), (0, 0), (0, cinp - cin))).astype(jnp.bfloat16)
    for blk in params:
        x = res_block_forward(x, blk)
    x = x[..., :w_out].astype(jnp.float32)                        # strip channel padding
    return jnp.transpose(x, (0, 3, 1, 2))                         # NHWC -> NCHW


# --------------------------- pure-JAX reference ------------------------------

def _ref_conv_bn(x, w_oihw, scale, shift, stride, relu, residual=None, pad=1):
    out = jax.lax.conv_general_dilated(
        x, jnp.transpose(w_oihw, (2, 3, 1, 0)),
        window_strides=(stride, stride),
        padding=((pad, pad), (pad, pad)),
        dimension_numbers=("NHWC", "HWIO", "NHWC"))
    out = out * scale + shift
    if residual is not None:
        out = out + residual
    if relu:
        out = jnp.maximum(out, 0.0)
    return out


def res_stage_reference(x_nchw, params):
    x = jnp.transpose(x_nchw, (0, 2, 3, 1)).astype(jnp.float32)
    for blk in params:
        r, s = blk["raw"], blk["stride"]
        a = _ref_conv_bn(x, r["a_w"], r["a_s"], r["a_b"], s, relu=True)
        res = (_ref_conv_bn(x, r["p_w"], r["p_s"], r["p_b"], s, relu=False, pad=0)
               if blk["proj"] else x)
        x = _ref_conv_bn(a, r["b_w"], r["b_s"], r["b_b"], 1, relu=True, residual=res)
    return jnp.transpose(x, (0, 3, 1, 2))


# ---------------------------------- main -------------------------------------

if __name__ == "__main__":
    key = jax.random.PRNGKey(0)
    k_x, k_p = jax.random.split(key)

    # Small shapes consistent with ResStage(w_in=4, w_out=8, stride=2, d=2), basic_transform.
    N, w_in, H, W = 2, 4, 16, 16
    w_out, stride, depth = 8, 2, 2

    x = jax.random.normal(k_x, (N, w_in, H, W), jnp.float32)   # NCHW like PyTorch
    params = init_res_stage_params(k_p, w_in, w_out, stride, depth)

    fwd = jax.jit(lambda v: res_stage_forward(v, params, w_out))
    out = jax.block_until_ready(fwd(x))

    assert out.shape == (N, w_out, H // stride, W // stride), out.shape
    assert bool(jnp.all(jnp.isfinite(out)))

    # bf16-tolerant check against a pure-JAX (XLA conv) reference with the same parameters.
    ref = res_stage_reference(x, params)
    max_ref = float(jnp.max(jnp.abs(ref)))
    max_err = float(jnp.max(jnp.abs(out - ref)))
    assert max_err <= 0.08 * max_ref + 0.2, (max_err, max_ref)

    print("KERNEL_OK")
</pallas_src>

<mosaic_0001>
module attributes {stable_mosaic.version = 11 : i64} {
  func.func @_matmul_bn_kernel(%arg0: i32, %arg1: i32, %arg2: memref<128x128xbf16, #tpu.memory_space<vmem>>, %arg3: memref<128x128xbf16, #tpu.memory_space<vmem>>, %arg4: memref<1x128xf32, #tpu.memory_space<vmem>>, %arg5: memref<128x128xbf16, #tpu.memory_space<vmem>>) attributes {dimension_semantics = [#tpu.dimension_semantics<parallel>, #tpu.dimension_semantics<parallel>], iteration_bounds = array<i64: 1, 1>, scalar_prefetch = 0 : i64, scratch_operands = 0 : i64, tpu.core_type = #tpu.core_type<tc>, window_params = [{transform_indices = @transform_0, window_bounds = array<i64: 128, 128>}, {transform_indices = @transform_1, window_bounds = array<i64: 128, 128>}, {transform_indices = @transform_2, window_bounds = array<i64: 1, 128>}, {transform_indices = @transform_3, window_bounds = array<i64: 128, 128>}]} {
    %c0 = arith.constant 0 : index
    %c0_0 = arith.constant 0 : index
    %0 = vector.load %arg2[%c0, %c0_0] : memref<128x128xbf16, #tpu.memory_space<vmem>>, vector<128x128xbf16>
    %c0_1 = arith.constant 0 : index
    %c0_2 = arith.constant 0 : index
    %1 = vector.load %arg3[%c0_1, %c0_2] : memref<128x128xbf16, #tpu.memory_space<vmem>>, vector<128x128xbf16>
    %cst = arith.constant dense<0.000000e+00> : vector<128x128xf32>
    %2 = tpu.matmul %0, %1, %cst {dimension_numbers = #tpu.dot_dimension_numbers<[1], [0], [0], [1], [0, 0, 1, 1], [], []>} : vector<128x128xbf16>, vector<128x128xbf16>, vector<128x128xf32> -> vector<128x128xf32>
    %c0_3 = arith.constant 0 : index
    %c0_4 = arith.constant 0 : index
    %3 = vector.load %arg4[%c0_3, %c0_4] : memref<1x128xf32, #tpu.memory_space<vmem>>, vector<1x128xf32>
    %4 = vector.broadcast %3 : vector<1x128xf32> to vector<128x128xf32>
    %5 = arith.addf %2, %4 : vector<128x128xf32>
    %6 = arith.truncf %5 : vector<128x128xf32> to vector<128x128xbf16>
    %c0_5 = arith.constant 0 : index
    %c0_6 = arith.constant 0 : index
    %7 = vector.load %arg5[%c0_5, %c0_6] : memref<128x128xbf16, #tpu.memory_space<vmem>>, vector<128x128xbf16>
    tpu.vector_store %arg5[%c0_5, %c0_6], %6 {strides = array<i32>} : memref<128x128xbf16, #tpu.memory_space<vmem>>, vector<128x128xbf16>,
    return
  }
  func.func @transform_0(%arg0: i32, %arg1: i32) -> (i32, i32) {
    %c0_i32 = arith.constant 0 : i32
    %c0_i32_0 = arith.constant 0 : i32
    return %arg0, %c0_i32 : i32, i32
  }
  func.func @transform_1(%arg0: i32, %arg1: i32) -> (i32, i32) {
    %c0_i32 = arith.constant 0 : i32
    %c0_i32_0 = arith.constant 0 : i32
    return %c0_i32, %arg1 : i32, i32
  }
  func.func @transform_2(%arg0: i32, %arg1: i32) -> (i32, i32) {
    %c0_i32 = arith.constant 0 : i32
    %c0_i32_0 = arith.constant 0 : i32
    return %c0_i32, %arg1 : i32, i32
  }
  func.func @transform_3(%arg0: i32, %arg1: i32) -> (i32, i32) {
    %c0_i32 = arith.constant 0 : i32
    return %arg0, %arg1 : i32, i32
  }
}

module attributes {stable_mosaic.version = 11 : i64} {
  func.func @_matmul_bn_kernel(%arg0: i32, %arg1: i32, %arg2: memref<128x1152xbf16, #tpu.memory_space<vmem>>, %arg3: memref<1152x128xbf16, #tpu.memory_space<vmem>>, %arg4: memref<1x128xf32, #tpu.memory_space<vmem>>, %arg5: memref<128x128xbf16, #tpu.memory_space<vmem>>) attributes {dimension_semantics = [#tpu.dimension_semantics<parallel>, #tpu.dimension_semantics<parallel>], iteration_bounds = array<i64: 1, 1>, scalar_prefetch = 0 : i64, scratch_operands = 0 : i64, tpu.core_type = #tpu.core_type<tc>, window_params = [{transform_indices = @transform_0, window_bounds = array<i64: 128, 1152>}, {transform_indices = @transform_1, window_bounds = array<i64: 1152, 128>}, {transform_indices = @transform_2, window_bounds = array<i64: 1, 128>}, {transform_indices = @transform_3, window_bounds = array<i64: 128, 128>}]} {
    %c0 = arith.constant 0 : index
    %c0_0 = arith.constant 0 : index
    %0 = vector.load %arg2[%c0, %c0_0] : memref<128x1152xbf16, #tpu.memory_space<vmem>>, vector<128x1152xbf16>
    %c0_1 = arith.constant 0 : index
    %c0_2 = arith.constant 0 : index
    %1 = vector.load %arg3[%c0_1, %c0_2] : memref<1152x128xbf16, #tpu.memory_space<vmem>>, vector<1152x128xbf16>
    %cst = arith.constant dense<0.000000e+00> : vector<128x128xf32>
    %2 = tpu.matmul %0, %1, %cst {dimension_numbers = #tpu.dot_dimension_numbers<[1], [0], [0], [1], [0, 0, 1, 1], [], []>} : vector<128x1152xbf16>, vector<1152x128xbf16>, vector<128x128xf32> -> vector<128x128xf32>
    %c0_3 = arith.constant 0 : index
    %c0_4 = arith.constant 0 : index
    %3 = vector.load %arg4[%c0_3, %c0_4] : memref<1x128xf32, #tpu.memory_space<vmem>>, vector<1x128xf32>
    %4 = vector.broadcast %3 : vector<1x128xf32> to vector<128x128xf32>
    %5 = arith.addf %2, %4 : vector<128x128xf32>
    %cst_5 = arith.constant 0.000000e+00 : f32
    %6 = vector.broadcast %cst_5 : f32 to vector<128x128xf32>
    %7 = arith.maximumf %5, %6 : vector<128x128xf32>
    %8 = arith.truncf %7 : vector<128x128xf32> to vector<128x128xbf16>
    %c0_6 = arith.constant 0 : index
    %c0_7 = arith.constant 0 : index
    %9 = vector.load %arg5[%c0_6, %c0_7] : memref<128x128xbf16, #tpu.memory_space<vmem>>, vector<128x128xbf16>
    tpu.vector_store %arg5[%c0_6, %c0_7], %8 {strides = array<i32>} : memref<128x128xbf16, #tpu.memory_space<vmem>>, vector<128x128xbf16>,
    return
  }
  func.func @transform_0(%arg0: i32, %arg1: i32) -> (i32, i32) {
    %c0_i32 = arith.constant 0 : i32
    %c0_i32_0 = arith.constant 0 : i32
    return %arg0, %c0_i32 : i32, i32
  }
  func.func @transform_1(%arg0: i32, %arg1: i32) -> (i32, i32) {
    %c0_i32 = arith.constant 0 : i32
    %c0_i32_0 = arith.constant 0 : i32
    return %c0_i32, %arg1 : i32, i32
  }
  func.func @transform_2(%arg0: i32, %arg1: i32) -> (i32, i32) {
    %c0_i32 = arith.constant 0 : i32
    %c0_i32_0 = arith.constant 0 : i32
    return %c0_i32, %arg1 : i32, i32
  }
  func.func @transform_3(%arg0: i32, %arg1: i32) -> (i32, i32) {
    %c0_i32 = arith.constant 0 : i32
    return %arg0, %arg1 : i32, i32
  }
}

module attributes {stable_mosaic.version = 11 : i64} {
  func.func @_conv3x3_s1_kernel(%arg0: i32, %arg1: i32, %arg2: memref<1x10x10x128xbf16, #tpu.memory_space<vmem>>, %arg3: memref<9x128x128xbf16, #tpu.memory_space<vmem>>, %arg4: memref<1x128xf32, #tpu.memory_space<vmem>>, %arg5: memref<1x8x8x128xbf16, #tpu.memory_space<vmem>>) attributes {dimension_semantics = [#tpu.dimension_semantics<parallel>, #tpu.dimension_semantics<parallel>], iteration_bounds = array<i64: 2, 1>, scalar_prefetch = 0 : i64, scratch_operands = 0 : i64, tpu.core_type = #tpu.core_type<tc>, window_params = [{transform_indices = @transform_0, window_bounds = array<i64: 1, 10, 10, 128>}, {transform_indices = @transform_1, window_bounds = array<i64: 9, 128, 128>}, {transform_indices = @transform_2, window_bounds = array<i64: 1, 128>}, {transform_indices = @transform_3, window_bounds = array<i64: 1, 8, 8, 128>}]} {
    %cst = arith.constant 0.000000e+00 : f32
    %0 = vector.broadcast %cst : f32 to vector<64x128xf32>
    %c0 = arith.constant 0 : index
    %c0_0 = arith.constant 0 : index
    %c0_1 = arith.constant 0 : index
    %c0_2 = arith.constant 0 : index
    %1 = vector.load %arg2[%c0, %c0_0, %c0_1, %c0_2] : memref<1x10x10x128xbf16, #tpu.memory_space<vmem>>, vector<1x8x8x128xbf16>
    %2 = vector.shape_cast %1 : vector<1x8x8x128xbf16> to vector<64x128xbf16>
    %c0_3 = arith.constant 0 : index
    %c0_4 = arith.constant 0 : index
    %c0_5 = arith.constant 0 : index
    %3 = vector.load %arg3[%c0_3, %c0_4, %c0_5] : memref<9x128x128xbf16, #tpu.memory_space<vmem>>, vector<1x128x128xbf16>
    %4 = vector.shape_cast %3 : vector<1x128x128xbf16> to vector<128x128xbf16>
    %cst_6 = arith.constant dense<0.000000e+00> : vector<64x128xf32>
    %5 = tpu.matmul %2, %4, %cst_6 {dimension_numbers = #tpu.dot_dimension_numbers<[1], [0], [0], [1], [0, 0, 1, 1], [], []>} : vector<64x128xbf16>, vector<128x128xbf16>, vector<64x128xf32> -> vector<64x128xf32>
    %6 = arith.addf %0, %5 : vector<64x128xf32>
    %c0_7 = arith.constant 0 : index
    %c0_8 = arith.constant 0 : index
    %c1 = arith.constant 1 : index
    %c0_9 = arith.constant 0 : index
    %7 = vector.load %arg2[%c0_7, %c0_8, %c1, %c0_9] : memref<1x10x10x128xbf16, #tpu.memory_space<vmem>>, vector<1x8x8x128xbf16>
    %8 = vector.shape_cast %7 : vector<1x8x8x128xbf16> to vector<64x128xbf16>
    %c1_10 = arith.constant 1 : index
    %c0_11 = arith.constant 0 : index
    %c0_12 = arith.constant 0 : index
    %9 = vector.load %arg3[%c1_10, %c0_11, %c0_12] : memref<9x128x128xbf16, #tpu.memory_space<vmem>>, vector<1x128x128xbf16>
    %10 = vector.shape_cast %9 : vector<1x128x128xbf16> to vector<128x128xbf16>
    %cst_13 = arith.constant dense<0.000000e+00> : vector<64x128xf32>
    %11 = tpu.matmul %8, %10, %cst_13 {dimension_numbers = #tpu.dot_dimension_numbers<[1], [0], [0], [1], [0, 0, 1, 1], [], []>} : vector<64x128xbf16>, vector<128x128xbf16>, vector<64x128xf32> -> vector<64x128xf32>
    %12 = arith.addf %6, %11 : vector<64x128xf32>
    %c0_14 = arith.constant 0 : index
    %c0_15 = arith.constant 0 : index
    %c2 = arith.constant 2 : index
    %c0_16 = arith.constant 0 : index
    %13 = vector.load %arg2[%c0_14, %c0_15, %c2, %c0_16] : memref<1x10x10x128xbf16, #tpu.memory_space<vmem>>, vector<1x8x8x128xbf16>
    %14 = vector.shape_cast %13 : vector<1x8x8x128xbf16> to vector<64x128xbf16>
    %c2_17 = arith.constant 2 : index
    %c0_18 = arith.constant 0 : index
    %c0_19 = arith.constant 0 : index
    %15 = vector.load %arg3[%c2_17, %c0_18, %c0_19] : memref<9x128x128xbf16, #tpu.memory_space<vmem>>, vector<1x128x128xbf16>
    %16 = vector.shape_cast %15 : vector<1x128x128xbf16> to vector<128x128xbf16>
    %cst_20 = arith.constant dense<0.000000e+00> : vector<64x128xf32>
    %17 = tpu.matmul %14, %16, %cst_20 {dimension_numbers = #tpu.dot_dimension_numbers<[1], [0], [0], [1], [0, 0, 1, 1], [], []>} : vector<64x128xbf16>, vector<128x128xbf16>, vector<64x128xf32> -> vector<64x128xf32>
    %18 = arith.addf %12, %17 : vector<64x128xf32>
    %c0_21 = arith.constant 0 : index
    %c1_22 = arith.constant 1 : index
    %c0_23 = arith.constant 0 : index
    %c0_24 = arith.constant 0 : index
    %19 = vector.load %arg2[%c0_21, %c1_22, %c0_23, %c0_24] : memref<1x10x10x128xbf16, #tpu.memory_space<vmem>>, vector<1x8x8x128xbf16>
    %20 = vector.shape_cast %19 : vector<1x8x8x128xbf16> to vector<64x128xbf16>
    %c3 = arith.constant 3 : index
    %c0_25 = arith.constant 0 : index
    %c0_26 = arith.constant 0 : index
    %21 = vector.load %arg3[%c3, %c0_25, %c0_26] : memref<9x128x128xbf16, #tpu.memory_space<vmem>>, vector<1x128x128xbf16>
    %22 = vector.shape_cast %21 : vector<1x128x128xbf16> to vector<128x128xbf16>
    %cst_27 = arith.constant dense<0.000000e+00> : vector<64x128xf32>
    %23 = tpu.matmul %20, %22, %cst_27 {dimension_numbers = #tpu.dot_dimension_numbers<[1], [0], [0], [1], [0, 0, 1, 1], [], []>} : vector<64x128xbf16>, vector<128x128xbf16>, vector<64x128xf32> -> vector<64x128xf32>
    %24 = arith.addf %18, %23 : vector<64x128xf32>
    %c0_28 = arith.constant 0 : index
    %c1_29 = arith.constant 1 : index
    %c1_30 = arith.constant 1 : index
    %c0_31 = arith.constant 0 : index
    %25 = vector.load %arg2[%c0_28, %c1_29, %c1_30, %c0_31] : memref<1x10x10x128xbf16, #tpu.memory_space<vmem>>, vector<1x8x8x128xbf16>
    %26 = vector.shape_cast %25 : vector<1x8x8x128xbf16> to vector<64x128xbf16>
    %c4 = arith.constant 4 : index
    %c0_32 = arith.constant 0 : index
    %c0_33 = arith.constant 0 : index
    %27 = vector.load %arg3[%c4, %c0_32, %c0_33] : memref<9x128x128xbf16, #tpu.memory_space<vmem>>, vector<1x128x128xbf16>
    %28 = vector.shape_cast %27 : vector<1x128x128xbf16> to vector<128x128xbf16>
    %cst_34 = arith.constant dense<0.000000e+00> : vector<64x128xf32>
    %29 = tpu.matmul %26, %28, %cst_34 {dimension_numbers = #tpu.dot_dimension_numbers<[1], [0], [0], [1], [0, 0, 1, 1], [], []>} : vector<64x128xbf16>, vector<128x128xbf16>, vector<64x128xf32> -> vector<64x128xf32>
    %30 = arith.addf %24, %29 : vector<64x128xf32>
    %c0_35 = arith.constant 0 : index
    %c1_36 = arith.constant 1 : index
    %c2_37 = arith.constant 2 : index
    %c0_38 = arith.constant 0 : index
    %31 = vector.load %arg2[%c0_35, %c1_36, %c2_37, %c0_38] : memref<1x10x10x128xbf16, #tpu.memory_space<vmem>>, vector<1x8x8x128xbf16>
    %32 = vector.shape_cast %31 : vector<1x8x8x128xbf16> to vector<64x128xbf16>
    %c5 = arith.constant 5 : index
    %c0_39 = arith.constant 0 : index
    %c0_40 = arith.constant 0 : index
    %33 = vector.load %arg3[%c5, %c0_39, %c0_40] : memref<9x128x128xbf16, #tpu.memory_space<vmem>>, vector<1x128x128xbf16>
    %34 = vector.shape_cast %33 : vector<1x128x128xbf16> to vector<128x128xbf16>
    %cst_41 = arith.constant dense<0.000000e+00> : vector<64x128xf32>
    %35 = tpu.matmul %32, %34, %cst_41 {dimension_numbers = #tpu.dot_dimension_numbers<[1], [0], [0], [1], [0, 0, 1, 1], [], []>} : vector<64x128xbf16>, vector<128x128xbf16>, vector<64x128xf32> -> vector<64x128xf32>
    %36 = arith.addf %30, %35 : vector<64x128xf32>
    %c0_42 = arith.constant 0 : index
    %c2_43 = arith.constant 2 : index
    %c0_44 = arith.constant 0 : index
    %c0_45 = arith.constant 0 : index
    %37 = vector.load %arg2[%c0_42, %c2_43, %c0_44, %c0_45] : memref<1x10x10x128xbf16, #tpu.memory_space<vmem>>, vector<1x8x8x128xbf16>
    %38 = vector.shape_cast %37 : vector<1x8x8x128xbf16> to vector<64x128xbf16>
    %c6 = arith.constant 6 : index
    %c0_46 = arith.constant 0 : index
    %c0_47 = arith.constant 0 : index
    %39 = vector.load %arg3[%c6, %c0_46, %c0_47] : memref<9x128x128xbf16, #tpu.memory_space<vmem>>, vector<1x128x128xbf16>
    %40 = vector.shape_cast %39 : vector<1x128x128xbf16> to vector<128x128xbf16>
    %cst_48 = arith.constant dense<0.000000e+00> : vector<64x128xf32>
    %41 = tpu.matmul %38, %40, %cst_48 {dimension_numbers = #tpu.dot_dimension_numbers<[1], [0], [0], [1], [0, 0, 1, 1], [], []>} : vector<64x128xbf16>, vector<128x128xbf16>, vector<64x128xf32> -> vector<64x128xf32>
    %42 = arith.addf %36, %41 : vector<64x128xf32>
    %c0_49 = arith.constant 0 : index
    %c2_50 = arith.constant 2 : index
    %c1_51 = arith.constant 1 : index
    %c0_52 = arith.constant 0 : index
    %43 = vector.load %arg2[%c0_49, %c2_50, %c1_51, %c0_52] : memref<1x10x10x128xbf16, #tpu.memory_space<vmem>>, vector<1x8x8x128xbf16>
    %44 = vector.shape_cast %43 : vector<1x8x8x128xbf16> to vector<64x128xbf16>
    %c7 = arith.constant 7 : index
    %c0_53 = arith.constant 0 : index
    %c0_54 = arith.constant 0 : index
    %45 = vector.load %arg3[%c7, %c0_53, %c0_54] : memref<9x128x128xbf16, #tpu.memory_space<vmem>>, vector<1x128x128xbf16>
    %46 = vector.shape_cast %45 : vector<1x128x128xbf16> to vector<128x128xbf16>
    %cst_55 = arith.constant dense<0.000000e+00> : vector<64x128xf32>
    %47 = tpu.matmul %44, %46, %cst_55 {dimension_numbers = #tpu.dot_dimension_numbers<[1], [0], [0], [1], [0, 0, 1, 1], [], []>} : vector<64x128xbf16>, vector<128x128xbf16>, vector<64x128xf32> -> vector<64x128xf32>
    %48 = arith.addf %42, %47 : vector<64x128xf32>
    %c0_56 = arith.constant 0 : index
    %c2_57 = arith.constant 2 : index
    %c2_58 = arith.constant 2 : index
    %c0_59 = arith.constant 0 : index
    %49 = vector.load %arg2[%c0_56, %c2_57, %c2_58, %c0_59] : memref<1x10x10x128xbf16, #tpu.memory_space<vmem>>, vector<1x8x8x128xbf16>
    %50 = vector.shape_cast %49 : vector<1x8x8x128xbf16> to vector<64x128xbf16>
    %c8 = arith.constant 8 : index
    %c0_60 = arith.constant 0 : index
    %c0_61 = arith.constant 0 : index
    %51 = vector.load %arg3[%c8, %c0_60, %c0_61] : memref<9x128x128xbf16, #tpu.memory_space<vmem>>, vector<1x128x128xbf16>
    %52 = vector.shape_cast %51 : vector<1x128x128xbf16> to vector<128x128xbf16>
    %cst_62 = arith.constant dense<0.000000e+00> : vector<64x128xf32>
    %53 = tpu.matmul %50, %52, %cst_62 {dimension_numbers = #tpu.dot_dimension_numbers<[1], [0], [0], [1], [0, 0, 1, 1], [], []>} : vector<64x128xbf16>, vector<128x128xbf16>, vector<64x128xf32> -> vector<64x128xf32>
    %54 = arith.addf %48, %53 : vector<64x128xf32>
    %c0_63 = arith.constant 0 : index
    %c0_64 = arith.constant 0 : index
    %55 = vector.load %arg4[%c0_63, %c0_64] : memref<1x128xf32, #tpu.memory_space<vmem>>, vector<1x128xf32>
    %56 = vector.broadcast %55 : vector<1x128xf32> to vector<64x128xf32>
    %57 = arith.addf %54, %56 : vector<64x128xf32>
    %cst_65 = arith.constant 0.000000e+00 : f32
    %58 = vector.broadcast %cst_65 : f32 to vector<64x128xf32>
    %59 = arith.maximumf %57, %58 : vector<64x128xf32>
    %60 = vector.shape_cast %59 : vector<64x128xf32> to vector<1x8x8x128xf32>
    %61 = arith.truncf %60 : vector<1x8x8x128xf32> to vector<1x8x8x128xbf16>
    %c0_66 = arith.constant 0 : index
    %c0_67 = arith.constant 0 : index
    %c0_68 = arith.constant 0 : index
    %c0_69 = arith.constant 0 : index
    %62 = vector.load %arg5[%c0_66, %c0_67, %c0_68, %c0_69] : memref<1x8x8x128xbf16, #tpu.memory_space<vmem>>, vector<1x8x8x128xbf16>
    tpu.vector_store %arg5[%c0_66, %c0_67, %c0_68, %c0_69], %61 {strides = array<i32>} : memref<1x8x8x128xbf16, #tpu.memory_space<vmem>>, vector<1x8x8x128xbf16>,
    return
  }
  func.func @transform_0(%arg0: i32, %arg1: i32) -> (i32, i32, i32, i32) {
    %c0_i32 = arith.constant 0 : i32
    %c0_i32_0 = arith.constant 0 : i32
    %c0_i32_1 = arith.constant 0 : i32
    %c0_i32_2 = arith.constant 0 : i32
    return %arg0, %c0_i32, %c0_i32_0, %c0_i32_1 : i32, i32, i32, i32
  }
  func.func @transform_1(%arg0: i32, %arg1: i32) -> (i32, i32, i32) {
    %c0_i32 = arith.constant 0 : i32
    %c0_i32_0 = arith.constant 0 : i32
    %c0_i32_1 = arith.constant 0 : i32
    return %c0_i32, %c0_i32_0, %arg1 : i32, i32, i32
  }
  func.func @transform_2(%arg0: i32, %arg1: i32) -> (i32, i32) {
    %c0_i32 = arith.constant 0 : i32
    %c0_i32_0 = arith.constant 0 : i32
    return %c0_i32, %arg1 : i32, i32
  }
  func.func @transform_3(%arg0: i32, %arg1: i32) -> (i32, i32, i32, i32) {
    %c0_i32 = arith.constant 0 : i32
    %c0_i32_0 = arith.constant 0 : i32
    %c0_i32_1 = arith.constant 0 : i32
    return %arg0, %c0_i32, %c0_i32_0, %arg1 : i32, i32, i32, i32
  }
}

module attributes {stable_mosaic.version = 11 : i64} {
  func.func @_conv3x3_s1_kernel(%arg0: i32, %arg1: i32, %arg2: memref<1x10x10x128xbf16, #tpu.memory_space<vmem>>, %arg3: memref<9x128x128xbf16, #tpu.memory_space<vmem>>, %arg4: memref<1x128xf32, #tpu.memory_space<vmem>>, %arg5: memref<1x8x8x128xbf16, #tpu.memory_space<vmem>>, %arg6: memref<1x8x8x128xbf16, #tpu.memory_space<vmem>>) attributes {dimension_semantics = [#tpu.dimension_semantics<parallel>, #tpu.dimension_semantics<parallel>], iteration_bounds = array<i64: 2, 1>, scalar_prefetch = 0 : i64, scratch_operands = 0 : i64, tpu.core_type = #tpu.core_type<tc>, window_params = [{transform_indices = @transform_0, window_bounds = array<i64: 1, 10, 10, 128>}, {transform_indices = @transform_1, window_bounds = array<i64: 9, 128, 128>}, {transform_indices = @transform_2, window_bounds = array<i64: 1, 128>}, {transform_indices = @transform_3, window_bounds = array<i64: 1, 8, 8, 128>}, {transform_indices = @transform_4, window_bounds = array<i64: 1, 8, 8, 128>}]} {
    %cst = arith.constant 0.000000e+00 : f32
    %0 = vector.broadcast %cst : f32 to vector<64x128xf32>
    %c0 = arith.constant 0 : index
    %c0_0 = arith.constant 0 : index
    %c0_1 = arith.constant 0 : index
    %c0_2 = arith.constant 0 : index
    %1 = vector.load %arg2[%c0, %c0_0, %c0_1, %c0_2] : memref<1x10x10x128xbf16, #tpu.memory_space<vmem>>, vector<1x8x8x128xbf16>
    %2 = vector.shape_cast %1 : vector<1x8x8x128xbf16> to vector<64x128xbf16>
    %c0_3 = arith.constant 0 : index
    %c0_4 = arith.constant 0 : index
    %c0_5 = arith.constant 0 : index
    %3 = vector.load %arg3[%c0_3, %c0_4, %c0_5] : memref<9x128x128xbf16, #tpu.memory_space<vmem>>, vector<1x128x128xbf16>
    %4 = vector.shape_cast %3 : vector<1x128x128xbf16> to vector<128x128xbf16>
    %cst_6 = arith.constant dense<0.000000e+00> : vector<64x128xf32>
    %5 = tpu.matmul %2, %4, %cst_6 {dimension_numbers = #tpu.dot_dimension_numbers<[1], [0], [0], [1], [0, 0, 1, 1], [], []>} : vector<64x128xbf16>, vector<128x128xbf16>, vector<64x128xf32> -> vector<64x128xf32>
    %6 = arith.addf %0, %5 : vector<64x128xf32>
    %c0_7 = arith.constant 0 : index
    %c0_8 = arith.constant 0 : index
    %c1 = arith.constant 1 : index
    %c0_9 = arith.constant 0 : index
    %7 = vector.load %arg2[%c0_7, %c0_8, %c1, %c0_9] : memref<1x10x10x128xbf16, #tpu.memory_space<vmem>>, vector<1x8x8x128xbf16>
    %8 = vector.shape_cast %7 : vector<1x8x8x128xbf16> to vector<64x128xbf16>
    %c1_10 = arith.constant 1 : index
    %c0_11 = arith.constant 0 : index
    %c0_12 = arith.constant 0 : index
    %9 = vector.load %arg3[%c1_10, %c0_11, %c0_12] : memref<9x128x128xbf16, #tpu.memory_space<vmem>>, vector<1x128x128xbf16>
    %10 = vector.shape_cast %9 : vector<1x128x128xbf16> to vector<128x128xbf16>
    %cst_13 = arith.constant dense<0.000000e+00> : vector<64x128xf32>
    %11 = tpu.matmul %8, %10, %cst_13 {dimension_numbers = #tpu.dot_dimension_numbers<[1], [0], [0], [1], [0, 0, 1, 1], [], []>} : vector<64x128xbf16>, vector<128x128xbf16>, vector<64x128xf32> -> vector<64x128xf32>
    %12 = arith.addf %6, %11 : vector<64x128xf32>
    %c0_14 = arith.constant 0 : index
    %c0_15 = arith.constant 0 : index
    %c2 = arith.constant 2 : index
    %c0_16 = arith.constant 0 : index
    %13 = vector.load %arg2[%c0_14, %c0_15, %c2, %c0_16] : memref<1x10x10x128xbf16, #tpu.memory_space<vmem>>, vector<1x8x8x128xbf16>
    %14 = vector.shape_cast %13 : vector<1x8x8x128xbf16> to vector<64x128xbf16>
    %c2_17 = arith.constant 2 : index
    %c0_18 = arith.constant 0 : index
    %c0_19 = arith.constant 0 : index
    %15 = vector.load %arg3[%c2_17, %c0_18, %c0_19] : memref<9x128x128xbf16, #tpu.memory_space<vmem>>, vector<1x128x128xbf16>
    %16 = vector.shape_cast %15 : vector<1x128x128xbf16> to vector<128x128xbf16>
    %cst_20 = arith.constant dense<0.000000e+00> : vector<64x128xf32>
    %17 = tpu.matmul %14, %16, %cst_20 {dimension_numbers = #tpu.dot_dimension_numbers<[1], [0], [0], [1], [0, 0, 1, 1], [], []>} : vector<64x128xbf16>, vector<128x128xbf16>, vector<64x128xf32> -> vector<64x128xf32>
    %18 = arith.addf %12, %17 : vector<64x128xf32>
    %c0_21 = arith.constant 0 : index
    %c1_22 = arith.constant 1 : index
    %c0_23 = arith.constant 0 : index
    %c0_24 = arith.constant 0 : index
    %19 = vector.load %arg2[%c0_21, %c1_22, %c0_23, %c0_24] : memref<1x10x10x128xbf16, #tpu.memory_space<vmem>>, vector<1x8x8x128xbf16>
    %20 = vector.shape_cast %19 : vector<1x8x8x128xbf16> to vector<64x128xbf16>
    %c3 = arith.constant 3 : index
    %c0_25 = arith.constant 0 : index
    %c0_26 = arith.constant 0 : index
    %21 = vector.load %arg3[%c3, %c0_25, %c0_26] : memref<9x128x128xbf16, #tpu.memory_space<vmem>>, vector<1x128x128xbf16>
    %22 = vector.shape_cast %21 : vector<1x128x128xbf16> to vector<128x128xbf16>
    %cst_27 = arith.constant dense<0.000000e+00> : vector<64x128xf32>
    %23 = tpu.matmul %20, %22, %cst_27 {dimension_numbers = #tpu.dot_dimension_numbers<[1], [0], [0], [1], [0, 0, 1, 1], [], []>} : vector<64x128xbf16>, vector<128x128xbf16>, vector<64x128xf32> -> vector<64x128xf32>
    %24 = arith.addf %18, %23 : vector<64x128xf32>
    %c0_28 = arith.constant 0 : index
    %c1_29 = arith.constant 1 : index
    %c1_30 = arith.constant 1 : index
    %c0_31 = arith.constant 0 : index
    %25 = vector.load %arg2[%c0_28, %c1_29, %c1_30, %c0_31] : memref<1x10x10x128xbf16, #tpu.memory_space<vmem>>, vector<1x8x8x128xbf16>
    %26 = vector.shape_cast %25 : vector<1x8x8x128xbf16> to vector<64x128xbf16>
    %c4 = arith.constant 4 : index
    %c0_32 = arith.constant 0 : index
    %c0_33 = arith.constant 0 : index
    %27 = vector.load %arg3[%c4, %c0_32, %c0_33] : memref<9x128x128xbf16, #tpu.memory_space<vmem>>, vector<1x128x128xbf16>
    %28 = vector.shape_cast %27 : vector<1x128x128xbf16> to vector<128x128xbf16>
    %cst_34 = arith.constant dense<0.000000e+00> : vector<64x128xf32>
    %29 = tpu.matmul %26, %28, %cst_34 {dimension_numbers = #tpu.dot_dimension_numbers<[1], [0], [0], [1], [0, 0, 1, 1], [], []>} : vector<64x128xbf16>, vector<128x128xbf16>, vector<64x128xf32> -> vector<64x128xf32>
    %30 = arith.addf %24, %29 : vector<64x128xf32>
    %c0_35 = arith.constant 0 : index
    %c1_36 = arith.constant 1 : index
    %c2_37 = arith.constant 2 : index
    %c0_38 = arith.constant 0 : index
    %31 = vector.load %arg2[%c0_35, %c1_36, %c2_37, %c0_38] : memref<1x10x10x128xbf16, #tpu.memory_space<vmem>>, vector<1x8x8x128xbf16>
    %32 = vector.shape_cast %31 : vector<1x8x8x128xbf16> to vector<64x128xbf16>
    %c5 = arith.constant 5 : index
    %c0_39 = arith.constant 0 : index
    %c0_40 = arith.constant 0 : index
    %33 = vector.load %arg3[%c5, %c0_39, %c0_40] : memref<9x128x128xbf16, #tpu.memory_space<vmem>>, vector<1x128x128xbf16>
    %34 = vector.shape_cast %33 : vector<1x128x128xbf16> to vector<128x128xbf16>
    %cst_41 = arith.constant dense<0.000000e+00> : vector<64x128xf32>
    %35 = tpu.matmul %32, %34, %cst_41 {dimension_numbers = #tpu.dot_dimension_numbers<[1], [0], [0], [1], [0, 0, 1, 1], [], []>} : vector<64x128xbf16>, vector<128x128xbf16>, vector<64x128xf32> -> vector<64x128xf32>
    %36 = arith.addf %30, %35 : vector<64x128xf32>
    %c0_42 = arith.constant 0 : index
    %c2_43 = arith.constant 2 : index
    %c0_44 = arith.constant 0 : index
    %c0_45 = arith.constant 0 : index
    %37 = vector.load %arg2[%c0_42, %c2_43, %c0_44, %c0_45] : memref<1x10x10x128xbf16, #tpu.memory_space<vmem>>, vector<1x8x8x128xbf16>
    %38 = vector.shape_cast %37 : vector<1x8x8x128xbf16> to vector<64x128xbf16>
    %c6 = arith.constant 6 : index
    %c0_46 = arith.constant 0 : index
    %c0_47 = arith.constant 0 : index
    %39 = vector.load %arg3[%c6, %c0_46, %c0_47] : memref<9x128x128xbf16, #tpu.memory_space<vmem>>, vector<1x128x128xbf16>
    %40 = vector.shape_cast %39 : vector<1x128x128xbf16> to vector<128x128xbf16>
    %cst_48 = arith.constant dense<0.000000e+00> : vector<64x128xf32>
    %41 = tpu.matmul %38, %40, %cst_48 {dimension_numbers = #tpu.dot_dimension_numbers<[1], [0], [0], [1], [0, 0, 1, 1], [], []>} : vector<64x128xbf16>, vector<128x128xbf16>, vector<64x128xf32> -> vector<64x128xf32>
    %42 = arith.addf %36, %41 : vector<64x128xf32>
    %c0_49 = arith.constant 0 : index
    %c2_50 = arith.constant 2 : index
    %c1_51 = arith.constant 1 : index
    %c0_52 = arith.constant 0 : index
    %43 = vector.load %arg2[%c0_49, %c2_50, %c1_51, %c0_52] : memref<1x10x10x128xbf16, #tpu.memory_space<vmem>>, vector<1x8x8x128xbf16>
    %44 = vector.shape_cast %43 : vector<1x8x8x128xbf16> to vector<64x128xbf16>
    %c7 = arith.constant 7 : index
    %c0_53 = arith.constant 0 : index
    %c0_54 = arith.constant 0 : index
    %45 = vector.load %arg3[%c7, %c0_53, %c0_54] : memref<9x128x128xbf16, #tpu.memory_space<vmem>>, vector<1x128x128xbf16>
    %46 = vector.shape_cast %45 : vector<1x128x128xbf16> to vector<128x128xbf16>
    %cst_55 = arith.constant dense<0.000000e+00> : vector<64x128xf32>
    %47 = tpu.matmul %44, %46, %cst_55 {dimension_numbers = #tpu.dot_dimension_numbers<[1], [0], [0], [1], [0, 0, 1, 1], [], []>} : vector<64x128xbf16>, vector<128x128xbf16>, vector<64x128xf32> -> vector<64x128xf32>
    %48 = arith.addf %42, %47 : vector<64x128xf32>
    %c0_56 = arith.constant 0 : index
    %c2_57 = arith.constant 2 : index
    %c2_58 = arith.constant 2 : index
    %c0_59 = arith.constant 0 : index
    %49 = vector.load %arg2[%c0_56, %c2_57, %c2_58, %c0_59] : memref<1x10x10x128xbf16, #tpu.memory_space<vmem>>, vector<1x8x8x128xbf16>
    %50 = vector.shape_cast %49 : vector<1x8x8x128xbf16> to vector<64x128xbf16>
    %c8 = arith.constant 8 : index
    %c0_60 = arith.constant 0 : index
    %c0_61 = arith.constant 0 : index
    %51 = vector.load %arg3[%c8, %c0_60, %c0_61] : memref<9x128x128xbf16, #tpu.memory_space<vmem>>, vector<1x128x128xbf16>
    %52 = vector.shape_cast %51 : vector<1x128x128xbf16> to vector<128x128xbf16>
    %cst_62 = arith.constant dense<0.000000e+00> : vector<64x128xf32>
    %53 = tpu.matmul %50, %52, %cst_62 {dimension_numbers = #tpu.dot_dimension_numbers<[1], [0], [0], [1], [0, 0, 1, 1], [], []>} : vector<64x128xbf16>, vector<128x128xbf16>, vector<64x128xf32> -> vector<64x128xf32>
    %54 = arith.addf %48, %53 : vector<64x128xf32>
    %c0_63 = arith.constant 0 : index
    %c0_64 = arith.constant 0 : index
    %55 = vector.load %arg4[%c0_63, %c0_64] : memref<1x128xf32, #tpu.memory_space<vmem>>, vector<1x128xf32>
    %56 = vector.broadcast %55 : vector<1x128xf32> to vector<64x128xf32>
    %57 = arith.addf %54, %56 : vector<64x128xf32>
    %c0_65 = arith.constant 0 : index
    %c0_66 = arith.constant 0 : index
    %c0_67 = arith.constant 0 : index
    %c0_68 = arith.constant 0 : index
    %58 = vector.load %arg5[%c0_65, %c0_66, %c0_67, %c0_68] : memref<1x8x8x128xbf16, #tpu.memory_space<vmem>>, vector<1x8x8x128xbf16>
    %59 = vector.shape_cast %58 : vector<1x8x8x128xbf16> to vector<64x128xbf16>
    %60 = arith.extf %59 : vector<64x128xbf16> to vector<64x128xf32>
    %61 = arith.addf %57, %60 : vector<64x128xf32>
    %cst_69 = arith.constant 0.000000e+00 : f32
    %62 = vector.broadcast %cst_69 : f32 to vector<64x128xf32>
    %63 = arith.maximumf %61, %62 : vector<64x128xf32>
    %64 = vector.shape_cast %63 : vector<64x128xf32> to vector<1x8x8x128xf32>
    %65 = arith.truncf %64 : vector<1x8x8x128xf32> to vector<1x8x8x128xbf16>
    %c0_70 = arith.constant 0 : index
    %c0_71 = arith.constant 0 : index
    %c0_72 = arith.constant 0 : index
    %c0_73 = arith.constant 0 : index
    %66 = vector.load %arg6[%c0_70, %c0_71, %c0_72, %c0_73] : memref<1x8x8x128xbf16, #tpu.memory_space<vmem>>, vector<1x8x8x128xbf16>
    tpu.vector_store %arg6[%c0_70, %c0_71, %c0_72, %c0_73], %65 {strides = array<i32>} : memref<1x8x8x128xbf16, #tpu.memory_space<vmem>>, vector<1x8x8x128xbf16>,
    return
  }
  func.func @transform_0(%arg0: i32, %arg1: i32) -> (i32, i32, i32, i32) {
    %c0_i32 = arith.constant 0 : i32
    %c0_i32_0 = arith.constant 0 : i32
    %c0_i32_1 = arith.constant 0 : i32
    %c0_i32_2 = arith.constant 0 : i32
    return %arg0, %c0_i32, %c0_i32_0, %c0_i32_1 : i32, i32, i32, i32
  }
  func.func @transform_1(%arg0: i32, %arg1: i32) -> (i32, i32, i32) {
    %c0_i32 = arith.constant 0 : i32
    %c0_i32_0 = arith.constant 0 : i32
    %c0_i32_1 = arith.constant 0 : i32
    return %c0_i32, %c0_i32_0, %arg1 : i32, i32, i32
  }
  func.func @transform_2(%arg0: i32, %arg1: i32) -> (i32, i32) {
    %c0_i32 = arith.constant 0 : i32
    %c0_i32_0 = arith.constant 0 : i32
    return %c0_i32, %arg1 : i32, i32
  }
  func.func @transform_3(%arg0: i32, %arg1: i32) -> (i32, i32, i32, i32) {
    %c0_i32 = arith.constant 0 : i32
    %c0_i32_0 = arith.constant 0 : i32
    %c0_i32_1 = arith.constant 0 : i32
    return %arg0, %c0_i32, %c0_i32_0, %arg1 : i32, i32, i32, i32
  }
  func.func @transform_4(%arg0: i32, %arg1: i32) -> (i32, i32, i32, i32) {
    %c0_i32 = arith.constant 0 : i32
    %c0_i32_0 = arith.constant 0 : i32
    %c0_i32_1 = arith.constant 0 : i32
    return %arg0, %c0_i32, %c0_i32_0, %arg1 : i32, i32, i32, i32
  }
}

</mosaic_0001>

<bundles_post_ra>
// kernel: _lambda_.6
= control target key start
LH: loop header
LB: loop body
LE: loop exit
PB: predicated region body
PF: predicated region fallthrough
CT: control target
= control target key end

     0   :  { %s478_s1 = inlined_call_operand.vmem [shape: bf16[128,128], index: 1, kind: input, shape index: {}]   ;;  %s479_s2 = inlined_call_operand.vmem [shape: f32[1,128], index: 2, kind: input, shape index: {}]   ;;  %s480_s0 = inlined_call_operand.vmem [shape: bf16[128,128], index: 0, kind: input, shape index: {}]   ;;  %s481_s3 = inlined_call_operand.vmem [shape: bf16[128,128], index: 3, kind: output, shape index: {}]  }
   0x1   :  { %v310_v0 = vld [vmem:[%s478_s1 + $0x38] sm:$0xff]  ;;  %v309_v1 = vld [vmem:[%s478_s1 + $0x30] sm:$0xff]  ;;  %v308_v2 = vld [vmem:[%s478_s1 + $0x28] sm:$0xff] }
   0x2   :  { %146 = vmatpush.bf16.msra.mxu0 %v310_v0  ;;  %358 = vmatpush.bf16.msra.mxu1 %v310_v0  ;;  %v307_v3 = vld [vmem:[%s478_s1 + $0x20] sm:$0xff]  ;;  %v306_v4 = vld [vmem:[%s478_s1 + $0x18] sm:$0xff]  ;;  %v305_v5 = vld [vmem:[%s478_s1 + $0x10] sm:$0xff] }
   0x3   :  { %359 = vmatpush.bf16.msra.mxu2 %v310_v0  ;;  %360 = vmatpush.bf16.msra.mxu3 %v310_v0  ;;  %v304_v6 = vld [vmem:[%s478_s1 + $0x8] sm:$0xff]  ;;  %v303_v7 = vld [vmem:[%s478_s1] sm:$0xff]  ;;  %v297_v9 = vld [vmem:[%s480_s0 + $0x10] sm:$0xff] }
   0x4   :  { %v295_v8 = vld [vmem:[%s480_s0] sm:$0xff]  ;;  %v301_v11 = vld [vmem:[%s480_s0 + $0x30] sm:$0xff]  ;;  %v296_v12 = vld [vmem:[%s480_s0 + $0x8] sm:$0xff] }
   0x5   :  { %v299_v10 = vld [vmem:[%s480_s0 + $0x20] sm:$0xff]  ;;  %v298_v13 = vld [vmem:[%s480_s0 + $0x18] sm:$0xff]  ;;  %v300_v14 = vld [vmem:[%s480_s0 + $0x28] sm:$0xff] }
   0x6   :  { %147 = vmatpush.bf16.msra.mxu0 %v309_v1  ;;  %361 = vmatpush.bf16.msra.mxu1 %v309_v1  ;;  %v302_v15 = vld [vmem:[%s480_s0 + $0x38] sm:$0xff]  ;;  %v382_v18 = vld [vmem:[%s479_s2] ss:$0 sm:$0xff] }
   0x7   :  { %362 = vmatpush.bf16.msra.mxu2 %v309_v1  ;;  %363 = vmatpush.bf16.msra.mxu3 %v309_v1 }
   0xa   :  { %148 = vmatpush.bf16.msra.mxu0 %v308_v2  ;;  %364 = vmatpush.bf16.msra.mxu1 %v308_v2 }
   0xb   :  { %365 = vmatpush.bf16.msra.mxu2 %v308_v2  ;;  %366 = vmatpush.bf16.msra.mxu3 %v308_v2 }
   0xe   :  { %149 = vmatpush.bf16.msra.mxu0 %v307_v3  ;;  %367 = vmatpush.bf16.msra.mxu1 %v307_v3 }
   0xf   :  { %368 = vmatpush.bf16.msra.mxu2 %v307_v3  ;;  %369 = vmatpush.bf16.msra.mxu3 %v307_v3 }
  0x12   :  { %150 = vmatpush.bf16.msra.mxu0 %v306_v4  ;;  %370 = vmatpush.bf16.msra.mxu1 %v306_v4 }
  0x13   :  { %371 = vmatpush.bf16.msra.mxu2 %v306_v4  ;;  %372 = vmatpush.bf16.msra.mxu3 %v306_v4 }
  0x16   :  { %151 = vmatpush.bf16.msra.mxu0 %v305_v5  ;;  %373 = vmatpush.bf16.msra.mxu1 %v305_v5 }
  0x17   :  { %374 = vmatpush.bf16.msra.mxu2 %v305_v5  ;;  %375 = vmatpush.bf16.msra.mxu3 %v305_v5 }
  0x1a   :  { %152 = vmatpush.bf16.msra.mxu0 %v304_v6  ;;  %376 = vmatpush.bf16.msra.mxu1 %v304_v6 }
  0x1b   :  { %377 = vmatpush.bf16.msra.mxu2 %v304_v6  ;;  %378 = vmatpush.bf16.msra.mxu3 %v304_v6 }
  0x1e   :  { %153 = vmatpush.bf16.msra.mxu0 %v303_v7  ;;  %379 = vmatpush.bf16.msra.mxu1 %v303_v7 }
  0x1f   :  { %380 = vmatpush.bf16.msra.mxu2 %v303_v7  ;;  %381 = vmatpush.bf16.msra.mxu3 %v303_v7 }
  0x21   :  { %154 = vmatmul.bf16.vlgmr.msra.gmra.mxu0 %v295_v8  ;;  %164 = vmatmul.bf16.vlgmr.msra.gmra.mxu1 %v297_v9 }
  0x22   :  { %174 = vmatmul.bf16.vlgmr.msra.gmra.mxu2 %v299_v10  ;;  %184 = vmatmul.bf16.vlgmr.msra.gmra.mxu3 %v301_v11 }
  0x31   :  { %159 = vmatmul.bf16.gmra.mxu0 %v296_v12  ;;  %169 = vmatmul.bf16.gmra.mxu1 %v298_v13 }
  0x32   :  { %179 = vmatmul.bf16.gmra.mxu2 %v300_v14  ;;  %189 = vmatmul.bf16.gmra.mxu3 %v302_v15 }
  0x9e   :  { %v155_v16 = vpop.f32.mrf.mxu0  ;;  %v165_v17 = vpop.f32.mrf.mxu1 }
  0x9f   :  { %v156_v23 = vadd.f32 %v382_v18, %v155_v16  ;;  %v166_v24 = vadd.f32 %v382_v18, %v165_v17 }
  0xa5   :  { %v175_v19 = vpop.f32.mrf.mxu2  ;;  %v185_v20 = vpop.f32.mrf.mxu3 }
  0xa6   :  { %v157_v21 = vpop.f32.mrf.mxu0  ;;  %v167_v22 = vpop.f32.mrf.mxu1  ;;  %v176_v31 = vadd.f32 %v382_v18, %v175_v19  ;;  %v186_v32 = vadd.f32 %v382_v18, %v185_v20 }
  0xa7   :  { %v158_v25 = vadd.f32 %v382_v18, %v157_v21  ;;  %v168_v26 = vadd.f32 %v382_v18, %v167_v22 }
  0xa9   :  { %v314_v27 = vpack.c.bf16 %v158_v25, %v156_v23  ;;  %v324_v28 = vpack.c.bf16 %v168_v26, %v166_v24 }
  0xab   :  { %315 = vst [vmem:[%s481_s3] sm:$0xff] %v314_v27  }
  0xac   :  { %352 = vst [vmem:[%s481_s3 + $0x10] sm:$0xff] %v324_v28  }
  0xad   :  { %v177_v29 = vpop.f32.mrf.mxu2  ;;  %v187_v30 = vpop.f32.mrf.mxu3 }
  0xae   :  { %v178_v33 = vadd.f32 %v382_v18, %v177_v29  ;;  %v188_v34 = vadd.f32 %v382_v18, %v187_v30  ;;  %v160_v35 = vpop.f32.mrf.mxu0  ;;  %v170_v36 = vpop.f32.mrf.mxu1 }
  0xaf   :  { %v161_v43 = vadd.f32 %v382_v18, %v160_v35  ;;  %v171_v44 = vadd.f32 %v382_v18, %v170_v36 }
  0xb0   :  { %v334_v37 = vpack.c.bf16 %v178_v33, %v176_v31  ;;  %v344_v38 = vpack.c.bf16 %v188_v34, %v186_v32 }
  0xb2   :  { %354 = vst [vmem:[%s481_s3 + $0x20] sm:$0xff] %v334_v37  }
  0xb3   :  { %356 = vst [vmem:[%s481_s3 + $0x30] sm:$0xff] %v344_v38  }
  0xb5   :  { %v180_v39 = vpop.f32.mrf.mxu2  ;;  %v190_v40 = vpop.f32.mrf.mxu3 }
  0xb6   :  { %v162_v41 = vpop.f32.mrf.mxu0  ;;  %v172_v42 = vpop.f32.mrf.mxu1  ;;  %v181_v51 = vadd.f32 %v382_v18, %v180_v39  ;;  %v191_v52 = vadd.f32 %v382_v18, %v190_v40 }
  0xb7   :  { %v163_v45 = vadd.f32 %v382_v18, %v162_v41  ;;  %v173_v46 = vadd.f32 %v382_v18, %v172_v42 }
  0xb9   :  { %v319_v47 = vpack.c.bf16 %v163_v45, %v161_v43  ;;  %v329_v48 = vpack.c.bf16 %v173_v46, %v171_v44 }
  0xbb   :  { %351 = vst [vmem:[%s481_s3 + $0x8] sm:$0xff] %v319_v47  }
  0xbc   :  { %353 = vst [vmem:[%s481_s3 + $0x18] sm:$0xff] %v329_v48  }
  0xbd   :  { %v182_v49 = vpop.f32.mrf.mxu2  ;;  %v192_v50 = vpop.f32.mrf.mxu3 }
  0xbe   :  { %v183_v53 = vadd.f32 %v382_v18, %v182_v49  ;;  %v193_v54 = vadd.f32 %v382_v18, %v192_v50 }
  0xc0   :  { %v339_v55 = vpack.c.bf16 %v183_v53, %v181_v51  ;;  %v349_v56 = vpack.c.bf16 %v193_v54, %v191_v52 }
  0xc2   :  { %355 = vst [vmem:[%s481_s3 + $0x28] sm:$0xff] %v339_v55  }
  0xc3   :  { %357 = vst [vmem:[%s481_s3 + $0x38] sm:$0xff] %v349_v56  }

// kernel: _lambda_.5
= control target key start
LH: loop header
LB: loop body
LE: loop exit
PB: predicated region body
PF: predicated region fallthrough
CT: control target
= control target key end

     0   :  { %s3124_s1 = inlined_call_operand.vmem [shape: bf16[1152,128], index: 1, kind: input, shape index: {}]   ;;  %s3125_s2 = inlined_call_operand.vmem [shape: f32[1,128], index: 2, kind: input, shape index: {}]   ;;  %s3126_s0 = inlined_call_operand.vmem [shape: bf16[128,1152], index: 0, kind: input, shape index: {}]   ;;  %s3127_s3 = inlined_call_operand.vmem [shape: bf16[128,128], index: 3, kind: output, shape index: {}]  }
   0x1   :  { %v2190_v0 = vld [vmem:[%s3124_s1 + $0x38] sm:$0xff]  ;;  %v2189_v1 = vld [vmem:[%s3124_s1 + $0x30] sm:$0xff]  ;;  %v2188_v2 = vld [vmem:[%s3124_s1 + $0x28] sm:$0xff] }
   0x2   :  { %2302 = vmatpush.bf16.msra.mxu1 %v2190_v0  ;;  %2303 = vmatpush.bf16.msra.mxu2 %v2190_v0  ;;  %v2187_v3 = vld [vmem:[%s3124_s1 + $0x20] sm:$0xff]  ;;  %v2186_v4 = vld [vmem:[%s3124_s1 + $0x18] sm:$0xff]  ;;  %v2185_v5 = vld [vmem:[%s3124_s1 + $0x10] sm:$0xff] }
   0x3   :  { %2304 = vmatpush.bf16.msra.mxu3 %v2190_v0  ;;  %1042 = vmatpush.bf16.msra.mxu0 %v2190_v0  ;;  %v2184_v6 = vld [vmem:[%s3124_s1 + $0x8] sm:$0xff]  ;;  %v2183_v7 = vld [vmem:[%s3124_s1] sm:$0xff]  ;;  %v1609_v8 = vld [vmem:[%s3126_s0 + $0x90] sm:$0xf] }
   0x4   :  { %v2133_v9 = vld [vmem:[%s3126_s0 + $0xb0] sm:$0xf0]  ;;  %v1681_v10 = vld [vmem:[%s3126_s0 + $0x120] sm:$0xf]  ;;  %v2151_v11 = vld [vmem:[%s3126_s0 + $0x140] sm:$0xf0] }
   0x5   :  { %v1753_v12 = vld [vmem:[%s3126_s0 + $0x1b0] sm:$0xf]  ;;  %v2169_v13 = vld [vmem:[%s3126_s0 + $0x1d0] sm:$0xf0]  ;;  %v1537_v14 = vld [vmem:[%s3126_s0] sm:$0xf]  ;;  %v1610_v18 = vor.u32 %v2133_v9, %v1609_v8  ;;  %v1682_v19 = vor.u32 %v2151_v11, %v1681_v10 }
   0x6   :  { %2305 = vmatpush.bf16.msra.mxu1 %v2189_v1  ;;  %2306 = vmatpush.bf16.msra.mxu2 %v2189_v1  ;;  %v2115_v15 = vld [vmem:[%s3126_s0 + $0x20] sm:$0xf0]  ;;  %v2206_v16 = vld [vmem:[%s3124_s1 + $0xb8] sm:$0xff]  ;;  %v1754_v20 = vor.u32 %v2169_v13, %v1753_v12  ;;  %v2205_v24 = vld [vmem:[%s3124_s1 + $0xb0] sm:$0xff] }
   0x7   :  { %2307 = vmatpush.bf16.msra.mxu3 %v2189_v1  ;;  %1043 = vmatpush.bf16.msra.mxu0 %v2189_v1  ;;  %v2198_v17 = vld [vmem:[%s3124_s1 + $0x78] sm:$0xff]  ;;  %v1538_v21 = vor.u32 %v2115_v15, %v1537_v14  ;;  %v2197_v25 = vld [vmem:[%s3124_s1 + $0x70] sm:$0xff]  ;;  %v2204_v28 = vld [vmem:[%s3124_s1 + $0xa8] sm:$0xff] }
   0x8   :  { %v2214_v22 = vld [vmem:[%s3124_s1 + $0xf8] sm:$0xff]  ;;  %v2213_v26 = vld [vmem:[%s3124_s1 + $0xf0] sm:$0xff]  ;;  %v2196_v29 = vld [vmem:[%s3124_s1 + $0x68] sm:$0xff] }
   0x9   :  { %v2222_v23 = vld [vmem:[%s3124_s1 + $0x138] sm:$0xff]  ;;  %v2221_v27 = vld [vmem:[%s3124_s1 + $0x130] sm:$0xff]  ;;  %v2212_v30 = vld [vmem:[%s3124_s1 + $0xe8] sm:$0xff] }
   0xa   :  { %2308 = vmatpush.bf16.msra.mxu1 %v2188_v2  ;;  %2309 = vmatpush.bf16.msra.mxu2 %v2188_v2  ;;  %v2220_v31 = vld [vmem:[%s3124_s1 + $0x128] sm:$0xff]  ;;  %v2203_v32 = vld [vmem:[%s3124_s1 + $0xa0] sm:$0xff]  ;;  %v1645_v36 = vld [vmem:[%s3126_s0 + $0xd8] sm:$0xf] }
   0xb   :  { %2310 = vmatpush.bf16.msra.mxu3 %v2188_v2  ;;  %1044 = vmatpush.bf16.msra.mxu0 %v2188_v2  ;;  %v2195_v33 = vld [vmem:[%s3124_s1 + $0x60] sm:$0xff]  ;;  %v2142_v37 = vld [vmem:[%s3126_s0 + $0xf8] sm:$0xf0]  ;;  %v1717_v38 = vld [vmem:[%s3126_s0 + $0x168] sm:$0xf] }
   0xc   :  { %v2211_v34 = vld [vmem:[%s3124_s1 + $0xe0] sm:$0xff]  ;;  %v2160_v39 = vld [vmem:[%s3126_s0 + $0x188] sm:$0xf0]  ;;  %v1789_v40 = vld [vmem:[%s3126_s0 + $0x1f8] sm:$0xf]  ;;  %v1646_v46 = vor.u32 %v2142_v37, %v1645_v36 }
   0xd   :  { %v2219_v35 = vld [vmem:[%s3124_s1 + $0x120] sm:$0xff]  ;;  %v2178_v41 = vld [vmem:[%s3126_s0 + $0x218] sm:$0xf0]  ;;  %v1573_v42 = vld [vmem:[%s3126_s0 + $0x48] sm:$0xf]  ;;  %v1718_v47 = vor.u32 %v2160_v39, %v1717_v38 }
   0xe   :  { %2311 = vmatpush.bf16.msra.mxu1 %v2187_v3  ;;  %2312 = vmatpush.bf16.msra.mxu2 %v2187_v3  ;;  %v2124_v43 = vld [vmem:[%s3126_s0 + $0x68] sm:$0xf0]  ;;  %v2202_v44 = vld [vmem:[%s3124_s1 + $0x98] sm:$0xff]  ;;  %v1790_v48 = vor.u32 %v2178_v41, %v1789_v40  ;;  %v2201_v52 = vld [vmem:[%s3124_s1 + $0x90] sm:$0xff] }
   0xf   :  { %2313 = vmatpush.bf16.msra.mxu3 %v2187_v3  ;;  %1045 = vmatpush.bf16.msra.mxu0 %v2187_v3  ;;  %v2194_v45 = vld [vmem:[%s3124_s1 + $0x58] sm:$0xff]  ;;  %v1574_v49 = vor.u32 %v2124_v43, %v1573_v42  ;;  %v2193_v53 = vld [vmem:[%s3124_s1 + $0x50] sm:$0xff]  ;;  %v2200_v56 = vld [vmem:[%s3124_s1 + $0x88] sm:$0xff] }
  0x10   :  { %v2210_v50 = vld [vmem:[%s3124_s1 + $0xd8] sm:$0xff]  ;;  %v2209_v54 = vld [vmem:[%s3124_s1 + $0xd0] sm:$0xff]  ;;  %v2192_v57 = vld [vmem:[%s3124_s1 + $0x48] sm:$0xff] }
  0x11   :  { %v2218_v51 = vld [vmem:[%s3124_s1 + $0x118] sm:$0xff]  ;;  %v2217_v55 = vld [vmem:[%s3124_s1 + $0x110] sm:$0xff]  ;;  %v2208_v58 = vld [vmem:[%s3124_s1 + $0xc8] sm:$0xff] }
  0x12   :  { %2314 = vmatpush.bf16.msra.mxu1 %v2186_v4  ;;  %2315 = vmatpush.bf16.msra.mxu2 %v2186_v4  ;;  %v2216_v59 = vld [vmem:[%s3124_s1 + $0x108] sm:$0xff]  ;;  %v2199_v60 = vld [vmem:[%s3124_s1 + $0x80] sm:$0xff]  ;;  %v2238_v2 = vld [vmem:[%s3124_s1 + $0x1b8] sm:$0xff] }
  0x13   :  { %2316 = vmatpush.bf16.msra.mxu3 %v2186_v4  ;;  %1046 = vmatpush.bf16.msra.mxu0 %v2186_v4  ;;  %v2191_v61 = vld [vmem:[%s3124_s1 + $0x40] sm:$0xff]  ;;  %v1539_v1 = vld [vmem:[%s3126_s0 + $0x24] sm:$0xf0]  ;;  %v2230_v3 = vld [vmem:[%s3124_s1 + $0x178] sm:$0xff] }
  0x14   :  { %v2111_v62 = vld [vmem:[%s3126_s0 + $0x4] sm:$0xf]  ;;  %v1545_v4 = vld [vmem:[%s3126_s0 + $0x8] sm:$0xf]  ;;  %v1553_v8 = vld [vmem:[%s3126_s0 + $0x10] sm:$0xf] }
  0x15   :  { %v2207_v63 = vld [vmem:[%s3124_s1 + $0xc0] sm:$0xff]  ;;  %v2117_v9 = vld [vmem:[%s3126_s0 + $0x30] sm:$0xf0]  ;;  %v2246_v10 = vld [vmem:[%s3124_s1 + $0x1f8] sm:$0xff]  ;;  %v1542_v12 = vor.u32 %v2111_v62, %v1539_v1 }
  0x16   :  { %2317 = vmatpush.bf16.msra.mxu1 %v2185_v5  ;;  %2318 = vmatpush.bf16.msra.mxu2 %v2185_v5  ;;  %v2215_v0 = vld [vmem:[%s3124_s1 + $0x100] sm:$0xff]  ;;  %v2254_v11 = vld [vmem:[%s3124_s1 + $0x238] sm:$0xff]  ;;  %v1554_v15 = vor.u32 %v2117_v9, %v1553_v8  ;;  %v2129_v40 = vld [vmem:[%s3126_s0 + $0x94] sm:$0xf] }
  0x17   :  { %2319 = vmatpush.bf16.msra.mxu3 %v2185_v5  ;;  %1047 = vmatpush.bf16.msra.mxu0 %v2185_v5  ;;  %v2116_v5 = vld [vmem:[%s3126_s0 + $0x28] sm:$0xf0]  ;;  %v2235_v36 = vld [vmem:[%s3124_s1 + $0x1a0] sm:$0xff]  ;;  %v1611_v41 = vld [vmem:[%s3126_s0 + $0xb4] sm:$0xf0] }
  0x18   :  { %v1546_v13 = vor.u32 %v2116_v5, %v1545_v4  ;;  %v2243_v37 = vld [vmem:[%s3124_s1 + $0x1e0] sm:$0xff]  ;;  %v1617_v42 = vld [vmem:[%s3126_s0 + $0x98] sm:$0xf]  ;;  %v2134_v43 = vld [vmem:[%s3126_s0 + $0xb8] sm:$0xf0] }
  0x19   :  { %v2227_v38 = vld [vmem:[%s3124_s1 + $0x160] sm:$0xff]  ;;  %v1661_v62 = vld [vmem:[%s3126_s0 + $0xe8] sm:$0xf]  ;;  %v2233_v4 = vld [vmem:[%s3124_s1 + $0x190] sm:$0xff] }
  0x1a   :  { %2320 = vmatpush.bf16.msra.mxu1 %v2184_v6  ;;  %2321 = vmatpush.bf16.msra.mxu2 %v2184_v6  ;;  %v2251_v39 = vld [vmem:[%s3124_s1 + $0x220] sm:$0xff]  ;;  %v2241_v5 = vld [vmem:[%s3124_s1 + $0x1d0] sm:$0xff]  ;;  %v1683_v9 = vld [vmem:[%s3126_s0 + $0x144] sm:$0xf0] }
  0x1b   :  { %2322 = vmatpush.bf16.msra.mxu3 %v2184_v6  ;;  %1048 = vmatpush.bf16.msra.mxu0 %v2184_v6  ;;  %v2112_v6 = vld [vmem:[%s3126_s0 + $0xc] sm:$0xf]  ;;  %v2147_v8 = vld [vmem:[%s3126_s0 + $0x124] sm:$0xf] }
  0x1e   :  { %2323 = vmatpush.bf16.msra.mxu1 %v2183_v7  ;;  %2324 = vmatpush.bf16.msra.mxu2 %v2183_v7 }
  0x1f   :  { %2325 = vmatpush.bf16.msra.mxu3 %v2183_v7  ;;  %1049 = vmatpush.bf16.msra.mxu0 %v2183_v7  ;;  %v1547_v7 = vld [vmem:[%s3126_s0 + $0x2c] sm:$0xf0] }
  0x20   :  { %v1550_v14 = vor.u32 %v2112_v6, %v1547_v7  ;;  %v2225_v6 = vld [vmem:[%s3124_s1 + $0x150] sm:$0xff] }
  0x21   :  { %1060 = vmatmul.bf16.vlgmr.msra.gmra.mxu1 %v1610_v18  ;;  %1070 = vmatmul.bf16.vlgmr.msra.gmra.mxu2 %v1682_v19  ;;  %v2245_v18 = vld [vmem:[%s3124_s1 + $0x1f0] sm:$0xff] }
  0x22   :  { %1140 = vmatpush.bf16.msrb.mxu2 %v2206_v16  ;;  %1091 = vmatpush.bf16.msrb.mxu1 %v2198_v17  ;;  %v2237_v16 = vld [vmem:[%s3124_s1 + $0x1b0] sm:$0xff] }
  0x23   :  { %1080 = vmatmul.bf16.vlgmr.msra.gmra.mxu3 %v1754_v20  ;;  %1050 = vmatmul.bf16.vlgmr.msra.gmra.mxu0 %v1538_v21  ;;  %v2229_v17 = vld [vmem:[%s3124_s1 + $0x170] sm:$0xff]  ;;  %v2236_v20 = vld [vmem:[%s3124_s1 + $0x1a8] sm:$0xff] }
  0x24   :  { %1189 = vmatpush.bf16.msrb.mxu3 %v2214_v22  ;;  %1238 = vmatpush.bf16.msrb.mxu0 %v2222_v23  ;;  %v2253_v19 = vld [vmem:[%s3124_s1 + $0x230] sm:$0xff]  ;;  %v2228_v21 = vld [vmem:[%s3124_s1 + $0x168] sm:$0xff] }
  0x25   :  { %v2244_v22 = vld [vmem:[%s3124_s1 + $0x1e8] sm:$0xff]  ;;  %v2249_v7 = vld [vmem:[%s3124_s1 + $0x210] sm:$0xff] }
  0x26   :  { %1141 = vmatpush.bf16.msrb.mxu2 %v2205_v24  ;;  %1092 = vmatpush.bf16.msrb.mxu1 %v2197_v25  ;;  %v2252_v23 = vld [vmem:[%s3124_s1 + $0x228] sm:$0xff]  ;;  %v1575_v25 = vld [vmem:[%s3126_s0 + $0x6c] sm:$0xf0] }
  0x27   :  { %v2120_v24 = vld [vmem:[%s3126_s0 + $0x4c] sm:$0xf] }
  0x28   :  { %1190 = vmatpush.bf16.msrb.mxu3 %v2213_v26  ;;  %1239 = vmatpush.bf16.msrb.mxu0 %v2221_v27  ;;  %v1581_v26 = vld [vmem:[%s3126_s0 + $0x50] sm:$0xf]  ;;  %v2125_v27 = vld [vmem:[%s3126_s0 + $0x70] sm:$0xf0] }
  0x2a   :  { %1142 = vmatpush.bf16.msrb.mxu2 %v2204_v28  ;;  %1093 = vmatpush.bf16.msrb.mxu1 %v2196_v29  ;;  %v2121_v28 = vld [vmem:[%s3126_s0 + $0x54] sm:$0xf]  ;;  %v1583_v29 = vld [vmem:[%s3126_s0 + $0x74] sm:$0xf0] }
  0x2c   :  { %1191 = vmatpush.bf16.msrb.mxu3 %v2212_v30  ;;  %1240 = vmatpush.bf16.msrb.mxu0 %v2220_v31  ;;  %v1589_v30 = vld [vmem:[%s3126_s0 + $0x58] sm:$0xf]  ;;  %v2126_v31 = vld [vmem:[%s3126_s0 + $0x78] sm:$0xf0] }
  0x2e   :  { %1143 = vmatpush.bf16.msrb.mxu2 %v2203_v32  ;;  %1094 = vmatpush.bf16.msrb.mxu1 %v2195_v33  ;;  %v1578_v32 = vor.u32 %v2120_v24, %v1575_v25  ;;  %v1582_v33 = vor.u32 %v2125_v27, %v1581_v26  ;;  %v2156_v24 = vld [vmem:[%s3126_s0 + $0x16c] sm:$0xf]  ;;  %v1719_v25 = vld [vmem:[%s3126_s0 + $0x18c] sm:$0xf0]  ;;  %v2161_v27 = vld [vmem:[%s3126_s0 + $0x190] sm:$0xf0] }
  0x2f   :  { %v1725_v26 = vld [vmem:[%s3126_s0 + $0x170] sm:$0xf] }
  0x30   :  { %1192 = vmatpush.bf16.msrb.mxu3 %v2211_v34  ;;  %1241 = vmatpush.bf16.msrb.mxu0 %v2219_v35  ;;  %v1586_v34 = vor.u32 %v2121_v28, %v1583_v29  ;;  %v1590_v35 = vor.u32 %v2126_v31, %v1589_v30  ;;  %v2157_v28 = vld [vmem:[%s3126_s0 + $0x174] sm:$0xf]  ;;  %v1727_v29 = vld [vmem:[%s3126_s0 + $0x194] sm:$0xf0]  ;;  %v2162_v31 = vld [vmem:[%s3126_s0 + $0x198] sm:$0xf0] }
  0x31   :  { %1065 = vmatmul.bf16.gmra.mxu1 %v1646_v46  ;;  %1075 = vmatmul.bf16.gmra.mxu2 %v1718_v47  ;;  %v1625_v46 = vld [vmem:[%s3126_s0 + $0xa0] sm:$0xf]  ;;  %v2135_v47 = vld [vmem:[%s3126_s0 + $0xc0] sm:$0xf0]  ;;  %v1733_v30 = vld [vmem:[%s3126_s0 + $0x178] sm:$0xf] }
  0x32   :  { %1144 = vmatpush.bf16.msrb.mxu2 %v2202_v44  ;;  %1095 = vmatpush.bf16.msrb.mxu1 %v2194_v45  ;;  %v2130_v44 = vld [vmem:[%s3126_s0 + $0x9c] sm:$0xf]  ;;  %v1619_v45 = vld [vmem:[%s3126_s0 + $0xbc] sm:$0xf0] }
  0x33   :  { %1085 = vmatmul.bf16.gmra.mxu3 %v1790_v48  ;;  %1055 = vmatmul.bf16.gmra.mxu0 %v1574_v49  ;;  %v1614_v48 = vor.u32 %v2129_v40, %v1611_v41  ;;  %v1618_v49 = vor.u32 %v2134_v43, %v1617_v42  ;;  %v2165_v40 = vld [vmem:[%s3126_s0 + $0x1b4] sm:$0xf]  ;;  %v1755_v41 = vld [vmem:[%s3126_s0 + $0x1d4] sm:$0xf0]  ;;  %v2170_v43 = vld [vmem:[%s3126_s0 + $0x1d8] sm:$0xf0] }
  0x34   :  { %1193 = vmatpush.bf16.msrb.mxu3 %v2210_v50  ;;  %1242 = vmatpush.bf16.msrb.mxu0 %v2218_v51  ;;  %v1622_v50 = vor.u32 %v2130_v44, %v1619_v45  ;;  %v1626_v51 = vor.u32 %v2135_v47, %v1625_v46  ;;  %v1761_v42 = vld [vmem:[%s3126_s0 + $0x1b8] sm:$0xf]  ;;  %v2166_v44 = vld [vmem:[%s3126_s0 + $0x1bc] sm:$0xf]  ;;  %v1763_v45 = vld [vmem:[%s3126_s0 + $0x1dc] sm:$0xf0] }
  0x35   :  { %v1769_v46 = vld [vmem:[%s3126_s0 + $0x1c0] sm:$0xf]  ;;  %v2171_v47 = vld [vmem:[%s3126_s0 + $0x1e0] sm:$0xf0] }
  0x36   :  { %1145 = vmatpush.bf16.msrb.mxu2 %v2201_v52  ;;  %1096 = vmatpush.bf16.msrb.mxu1 %v2193_v53  ;;  %v2234_v52 = vld [vmem:[%s3124_s1 + $0x198] sm:$0xff] }
  0x37   :  { %v2242_v53 = vld [vmem:[%s3124_s1 + $0x1d8] sm:$0xff] }
  0x38   :  { %1194 = vmatpush.bf16.msrb.mxu3 %v2209_v54  ;;  %1243 = vmatpush.bf16.msrb.mxu0 %v2217_v55  ;;  %v2226_v54 = vld [vmem:[%s3124_s1 + $0x158] sm:$0xff] }
  0x39   :  { %v2250_v55 = vld [vmem:[%s3124_s1 + $0x218] sm:$0xff] }
  0x3a   :  { %1146 = vmatpush.bf16.msrb.mxu2 %v2200_v56  ;;  %1097 = vmatpush.bf16.msrb.mxu1 %v2192_v57  ;;  %v2138_v56 = vld [vmem:[%s3126_s0 + $0xdc] sm:$0xf]  ;;  %v1647_v57 = vld [vmem:[%s3126_s0 + $0xfc] sm:$0xf0] }
  0x3c   :  { %1195 = vmatpush.bf16.msrb.mxu3 %v2208_v58  ;;  %1244 = vmatpush.bf16.msrb.mxu0 %v2216_v59  ;;  %v1653_v58 = vld [vmem:[%s3126_s0 + $0xe0] sm:$0xf]  ;;  %v2143_v59 = vld [vmem:[%s3126_s0 + $0x100] sm:$0xf0] }
  0x3d   :  { %v1654_v1 = vor.u32 %v2143_v59, %v1653_v58 }
  0x3e   :  { %1147 = vmatpush.bf16.msrb.mxu2 %v2199_v60  ;;  %1098 = vmatpush.bf16.msrb.mxu1 %v2191_v61  ;;  %v2139_v60 = vld [vmem:[%s3126_s0 + $0xe4] sm:$0xf]  ;;  %v1655_v61 = vld [vmem:[%s3126_s0 + $0x104] sm:$0xf0] }
  0x40   :  { %1196 = vmatpush.bf16.msrb.mxu3 %v2207_v63  ;;  %1245 = vmatpush.bf16.msrb.mxu0 %v2215_v0  ;;  %v2144_v63 = vld [vmem:[%s3126_s0 + $0x108] sm:$0xf0]  ;;  %v1650_v0 = vor.u32 %v2138_v56, %v1647_v57 }
  0x41   :  { %1099 = vmatmul.bf16.vlgmr.msrb.gmra.mxu1 %v1542_v12  ;;  %1148 = vmatmul.bf16.vlgmr.msrb.gmra.mxu2 %v1546_v13  ;;  %v2148_v12 = vld [vmem:[%s3126_s0 + $0x12c] sm:$0xf]  ;;  %v1691_v13 = vld [vmem:[%s3126_s0 + $0x14c] sm:$0xf0] }
  0x42   :  { %1336 = vmatpush.bf16.msra.mxu2 %v2238_v2  ;;  %1287 = vmatpush.bf16.msra.mxu1 %v2230_v3  ;;  %v1658_v2 = vor.u32 %v2139_v60, %v1655_v61  ;;  %v1662_v3 = vor.u32 %v2144_v63, %v1661_v62  ;;  %v2174_v61 = vld [vmem:[%s3126_s0 + $0x1fc] sm:$0xf]  ;;  %v1791_v62 = vld [vmem:[%s3126_s0 + $0x21c] sm:$0xf0] }
  0x43   :  { %1197 = vmatmul.bf16.vlgmr.msrb.gmra.mxu3 %v1550_v14  ;;  %1246 = vmatmul.bf16.vlgmr.msrb.gmra.mxu0 %v1554_v15  ;;  %v1697_v14 = vld [vmem:[%s3126_s0 + $0x130] sm:$0xf]  ;;  %v2153_v15 = vld [vmem:[%s3126_s0 + $0x150] sm:$0xf0]  ;;  %v1797_v63 = vld [vmem:[%s3126_s0 + $0x200] sm:$0xf] }
  0x44   :  { %1385 = vmatpush.bf16.msra.mxu3 %v2246_v10  ;;  %1434 = vmatpush.bf16.msra.mxu0 %v2254_v11  ;;  %v1689_v10 = vld [vmem:[%s3126_s0 + $0x128] sm:$0xf]  ;;  %v2152_v11 = vld [vmem:[%s3126_s0 + $0x148] sm:$0xf0] }
  0x46   :  { %1337 = vmatpush.bf16.msra.mxu2 %v2237_v16  ;;  %1288 = vmatpush.bf16.msra.mxu1 %v2229_v17  ;;  %v1686_v16 = vor.u32 %v2147_v8, %v1683_v9  ;;  %v1690_v17 = vor.u32 %v2152_v11, %v1689_v10  ;;  %v1794_v8 = vor.u32 %v2174_v61, %v1791_v62  ;;  %v1605_v61 = vld [vmem:[%s3126_s0 + $0x68] sm:$0xf]  ;;  %v2128_v62 = vld [vmem:[%s3126_s0 + $0x88] sm:$0xf0] }
  0x48   :  { %1386 = vmatpush.bf16.msra.mxu3 %v2245_v18  ;;  %1435 = vmatpush.bf16.msra.mxu0 %v2253_v19  ;;  %v1694_v18 = vor.u32 %v2148_v12, %v1691_v13  ;;  %v1698_v19 = vor.u32 %v2153_v15, %v1697_v14 }
  0x4a   :  { %1338 = vmatpush.bf16.msra.mxu2 %v2236_v20  ;;  %1289 = vmatpush.bf16.msra.mxu1 %v2228_v21  ;;  %v2232_v20 = vld [vmem:[%s3124_s1 + $0x188] sm:$0xff] }
  0x4b   :  { %v2240_v21 = vld [vmem:[%s3124_s1 + $0x1c8] sm:$0xff] }
  0x4c   :  { %1387 = vmatpush.bf16.msra.mxu3 %v2244_v22  ;;  %1436 = vmatpush.bf16.msra.mxu0 %v2252_v23  ;;  %v2224_v22 = vld [vmem:[%s3124_s1 + $0x148] sm:$0xff] }
  0x4d   :  { %v2248_v23 = vld [vmem:[%s3124_s1 + $0x208] sm:$0xff] }
  0x4e   :  { %1339 = vmatpush.bf16.msra.mxu2 %v2235_v36  ;;  %1290 = vmatpush.bf16.msra.mxu1 %v2227_v38  ;;  %v2231_v36 = vld [vmem:[%s3124_s1 + $0x180] sm:$0xff] }
  0x4f   :  { %v2223_v38 = vld [vmem:[%s3124_s1 + $0x140] sm:$0xff] }
  0x50   :  { %1388 = vmatpush.bf16.msra.mxu3 %v2243_v37  ;;  %1437 = vmatpush.bf16.msra.mxu0 %v2251_v39  ;;  %v2239_v37 = vld [vmem:[%s3124_s1 + $0x1c0] sm:$0xff] }
  0x51   :  { %1104 = vmatmul.bf16.gmra.mxu1 %v1578_v32  ;;  %1153 = vmatmul.bf16.gmra.mxu2 %v1582_v33  ;;  %v1722_v32 = vor.u32 %v2156_v24, %v1719_v25  ;;  %v1726_v33 = vor.u32 %v2161_v27, %v1725_v26  ;;  %v2247_v39 = vld [vmem:[%s3124_s1 + $0x200] sm:$0xff]  ;;  %v2118_v24 = vld [vmem:[%s3126_s0 + $0x38] sm:$0xf0] }
  0x52   :  { %1340 = vmatpush.bf16.msra.mxu2 %v2234_v52  ;;  %1291 = vmatpush.bf16.msra.mxu1 %v2226_v54  ;;  %v1770_v52 = vor.u32 %v2171_v47, %v1769_v46  ;;  %v2784_v54 = vld [vmem:[%s3125_s2] ss:$0 sm:$0xff]  ;;  %v2114_v25 = vld [vmem:[%s3126_s0 + $0x1c] sm:$0xf] }
  0x53   :  { %1202 = vmatmul.bf16.gmra.mxu3 %v1586_v34  ;;  %1251 = vmatmul.bf16.gmra.mxu0 %v1590_v35  ;;  %v1730_v34 = vor.u32 %v2157_v28, %v1727_v29  ;;  %v1734_v35 = vor.u32 %v2162_v31, %v1733_v30  ;;  %v1563_v26 = vld [vmem:[%s3126_s0 + $0x3c] sm:$0xf0]  ;;  %v2119_v28 = vld [vmem:[%s3126_s0 + $0x40] sm:$0xf0] }
  0x54   :  { %1389 = vmatpush.bf16.msra.mxu3 %v2242_v53  ;;  %1438 = vmatpush.bf16.msra.mxu0 %v2250_v55  ;;  %v1569_v27 = vld [vmem:[%s3126_s0 + $0x20] sm:$0xf] }
  0x56   :  { %1341 = vmatpush.bf16.msra.mxu2 %v2233_v4  ;;  %1292 = vmatpush.bf16.msra.mxu1 %v2225_v6  ;;  %v2180_v4 = vld [vmem:[%s3126_s0 + $0x228] sm:$0xf0] }
  0x58   :  { %1390 = vmatpush.bf16.msra.mxu3 %v2241_v5  ;;  %1439 = vmatpush.bf16.msra.mxu0 %v2249_v7 }
  0x5a   :  { %1342 = vmatpush.bf16.msra.mxu2 %v2232_v20  ;;  %1293 = vmatpush.bf16.msra.mxu1 %v2224_v22  ;;  %v1555_v22 = vld [vmem:[%s3126_s0 + $0x34] sm:$0xf0] }
  0x5c   :  { %1391 = vmatpush.bf16.msra.mxu3 %v2240_v21  ;;  %1440 = vmatpush.bf16.msra.mxu0 %v2248_v23  ;;  %v2113_v21 = vld [vmem:[%s3126_s0 + $0x14] sm:$0xf]  ;;  %v1561_v23 = vld [vmem:[%s3126_s0 + $0x18] sm:$0xf] }
  0x5e   :  { %1343 = vmatpush.bf16.msra.mxu2 %v2231_v36  ;;  %1294 = vmatpush.bf16.msra.mxu1 %v2223_v38  ;;  %v1570_v38 = vor.u32 %v2119_v28, %v1569_v27  ;;  %v2131_v27 = vld [vmem:[%s3126_s0 + $0xa4] sm:$0xf]  ;;  %v1627_v28 = vld [vmem:[%s3126_s0 + $0xc4] sm:$0xf0] }
  0x60   :  { %1392 = vmatpush.bf16.msra.mxu3 %v2239_v37  ;;  %1441 = vmatpush.bf16.msra.mxu0 %v2247_v39  ;;  %v1566_v37 = vor.u32 %v2114_v25, %v1563_v26 }
  0x61   :  { %1109 = vmatmul.bf16.gmra.mxu1 %v1614_v48  ;;  %1158 = vmatmul.bf16.gmra.mxu2 %v1618_v49  ;;  %v1758_v48 = vor.u32 %v2165_v40, %v1755_v41  ;;  %v1762_v49 = vor.u32 %v2170_v43, %v1761_v42 }
  0x63   :  { %1207 = vmatmul.bf16.gmra.mxu3 %v1622_v50  ;;  %1256 = vmatmul.bf16.gmra.mxu0 %v1626_v51  ;;  %v1766_v51 = vor.u32 %v2166_v44, %v1763_v45 }
  0x71   :  { %1114 = vmatmul.bf16.gmra.mxu1 %v1650_v0  ;;  %1163 = vmatmul.bf16.gmra.mxu2 %v1654_v1  ;;  %v2179_v0 = vld [vmem:[%s3126_s0 + $0x220] sm:$0xf0] }
  0x72   :  { %v2175_v1 = vld [vmem:[%s3126_s0 + $0x204] sm:$0xf]  ;;  %v1798_v9 = vor.u32 %v2179_v0, %v1797_v63 }
  0x73   :  { %1212 = vmatmul.bf16.gmra.mxu3 %v1658_v2  ;;  %1261 = vmatmul.bf16.gmra.mxu0 %v1662_v3  ;;  %v1799_v2 = vld [vmem:[%s3126_s0 + $0x224] sm:$0xf0] }
  0x74   :  { %v1805_v3 = vld [vmem:[%s3126_s0 + $0x208] sm:$0xf]  ;;  %v1802_v12 = vor.u32 %v2175_v1, %v1799_v2 }
  0x75   :  { %v1806_v13 = vor.u32 %v2180_v4, %v1805_v3 }
  0x81   :  { %1119 = vmatmul.bf16.gmra.mxu1 %v1686_v16  ;;  %1168 = vmatmul.bf16.gmra.mxu2 %v1690_v17 }
  0x83   :  { %1217 = vmatmul.bf16.gmra.mxu3 %v1694_v18  ;;  %1266 = vmatmul.bf16.gmra.mxu0 %v1698_v19 }
  0x91   :  { %1124 = vmatmul.bf16.gmra.mxu1 %v1722_v32  ;;  %1173 = vmatmul.bf16.gmra.mxu2 %v1726_v33  ;;  %v1558_v33 = vor.u32 %v2113_v21, %v1555_v22 }
  0x93   :  { %1222 = vmatmul.bf16.gmra.mxu3 %v1730_v34  ;;  %1271 = vmatmul.bf16.gmra.mxu0 %v1734_v35  ;;  %v1562_v34 = vor.u32 %v2118_v24, %v1561_v23 }
  0x9e   :  { %v2779_v50 = vpop.f32.mrf.mxu1 }
  0xa0   :  { %v1051_v53 = vpop.f32.mrf.mxu0 }
  0xa1   :  { %1129 = vmatmul.bf16.gmra.mxu1 %v1758_v48  ;;  %1178 = vmatmul.bf16.gmra.mxu2 %v1762_v49  ;;  %v1052_v30 = vadd.f32 %v2784_v54, %v1051_v53  ;;  %v2122_v49 = vld [vmem:[%s3126_s0 + $0x5c] sm:$0xf]  ;;  %v1597_v53 = vld [vmem:[%s3126_s0 + $0x60] sm:$0xf] }
  0xa3   :  { %1227 = vmatmul.bf16.gmra.mxu3 %v1766_v51  ;;  %1276 = vmatmul.bf16.gmra.mxu0 %v1770_v52  ;;  %v1591_v51 = vld [vmem:[%s3126_s0 + $0x7c] sm:$0xf0] }
  0xa4   :  { %v1071_v55 = vpop.f32.mrf.mxu2  ;;  %v1594_v3 = vor.u32 %v2122_v49, %v1591_v51 }
  0xa5   :  { %v2787_v56 = vadd.f32 %v2784_v54, %v1071_v55  ;;  %v2127_v55 = vld [vmem:[%s3126_s0 + $0x80] sm:$0xf0] }
  0xa6   :  { %v1081_v57 = vpop.f32.mrf.mxu3  ;;  %v2792_v59 = vpop.f32.mrf.mxu1  ;;  %v1598_v4 = vor.u32 %v2127_v55, %v1597_v53 }
  0xa7   :  { %v2790_v58 = vadd.f32 %v2784_v54, %v1081_v57  ;;  %v2123_v57 = vld [vmem:[%s3126_s0 + $0x64] sm:$0xf] }
  0xa8   :  { %v1053_v60 = vpop.f32.mrf.mxu0 }
  0xa9   :  { %v1054_v42 = vadd.f32 %v2784_v54, %v1053_v60  ;;  %v1599_v60 = vld [vmem:[%s3126_s0 + $0x84] sm:$0xf0] }
  0xac   :  { %v1073_v5 = vpop.f32.mrf.mxu2 }
  0xad   :  { %v2819_v6 = vadd.f32 %v2784_v54, %v1073_v5 }
  0xae   :  { %v1083_v7 = vpop.f32.mrf.mxu3  ;;  %v2824_v11 = vpop.f32.mrf.mxu1 }
  0xaf   :  { %v2822_v10 = vadd.f32 %v2784_v54, %v1083_v7  ;;  %v1602_v7 = vor.u32 %v2123_v57, %v1599_v60 }
  0xb0   :  { %v1056_v14 = vpop.f32.mrf.mxu0 }
  0xb1   :  { %1134 = vmatmul.bf16.gmra.mxu1 %v1794_v8  ;;  %1183 = vmatmul.bf16.gmra.mxu2 %v1798_v9  ;;  %v1057_v0 = vadd.f32 %v2784_v54, %v1056_v14  ;;  %v1606_v8 = vor.u32 %v2128_v62, %v1605_v61 }
  0xb3   :  { %1232 = vmatmul.bf16.gmra.mxu3 %v1802_v12  ;;  %1281 = vmatmul.bf16.gmra.mxu0 %v1806_v13 }
  0xb4   :  { %v1076_v15 = vpop.f32.mrf.mxu2 }
  0xb5   :  { %v2827_v16 = vadd.f32 %v2784_v54, %v1076_v15 }
  0xb6   :  { %v1086_v17 = vpop.f32.mrf.mxu3  ;;  %v2832_v19 = vpop.f32.mrf.mxu1 }
  0xb7   :  { %v2830_v18 = vadd.f32 %v2784_v54, %v1086_v17 }
  0xb8   :  { %v1058_v20 = vpop.f32.mrf.mxu0 }
  0xb9   :  { %v1059_v21 = vadd.f32 %v2784_v54, %v1058_v20  ;;  %v1633_v20 = vld [vmem:[%s3126_s0 + $0xa8] sm:$0xf] }
  0xbc   :  { %v1078_v29 = vpop.f32.mrf.mxu2 }
  0xbd   :  { %v2860_v31 = vadd.f32 %v2784_v54, %v1078_v29 }
  0xbe   :  { %v1088_v32 = vpop.f32.mrf.mxu3  ;;  %v1100_v36 = vpop.f32.mrf.mxu1 }
  0xbf   :  { %v2863_v35 = vadd.f32 %v2784_v54, %v1088_v32  ;;  %v1101_v39 = vadd.f32 %v1100_v36, %v1052_v30  ;;  %v2136_v30 = vld [vmem:[%s3126_s0 + $0xc8] sm:$0xf0]  ;;  %v2137_v36 = vld [vmem:[%s3126_s0 + $0xd0] sm:$0xf0] }
  0xc0   :  { %v1247_v40 = vpop.f32.mrf.mxu0  ;;  %v2132_v32 = vld [vmem:[%s3126_s0 + $0xac] sm:$0xf] }
  0xc1   :  { %1295 = vmatmul.bf16.vlgmr.msra.gmra.mxu1 %v1558_v33  ;;  %1344 = vmatmul.bf16.vlgmr.msra.gmra.mxu2 %v1562_v34  ;;  %v1635_v33 = vld [vmem:[%s3126_s0 + $0xcc] sm:$0xf0] }
  0xc2   :  { %v1641_v34 = vld [vmem:[%s3126_s0 + $0xb0] sm:$0xf] }
  0xc3   :  { %1393 = vmatmul.bf16.vlgmr.msra.gmra.mxu3 %v1566_v37  ;;  %1442 = vmatmul.bf16.vlgmr.msra.gmra.mxu0 %v1570_v38  ;;  %v1062_v38 = vadd.f32 %v2784_v54, %v2779_v50  ;;  %v1064_v50 = vadd.f32 %v2784_v54, %v2792_v59  ;;  %v1669_v59 = vld [vmem:[%s3126_s0 + $0xf0] sm:$0xf] }
  0xc4   :  { %v1149_v41 = vpop.f32.mrf.mxu2 }
  0xc5   :  { %v1150_v43 = vadd.f32 %v1149_v41, %v1101_v39  ;;  %v1630_v41 = vor.u32 %v2131_v27, %v1627_v28 }
  0xc6   :  { %v1198_v44 = vpop.f32.mrf.mxu3  ;;  %v1102_v45 = vpop.f32.mrf.mxu1 }
  0xc7   :  { %v1199_v46 = vadd.f32 %v1198_v44, %v1150_v43  ;;  %v1103_v47 = vadd.f32 %v1102_v45, %v1054_v42  ;;  %v1634_v42 = vor.u32 %v2136_v30, %v1633_v20  ;;  %v1638_v44 = vor.u32 %v2132_v32, %v1635_v33 }
  0xc8   :  { %v1249_v48 = vpop.f32.mrf.mxu0  ;;  %v1642_v45 = vor.u32 %v2137_v36, %v1641_v34 }
  0xc9   :  { %v2872_v52 = vadd.f32 %v1247_v40, %v1199_v46 }
  0xcc   :  { %v1151_v63 = vpop.f32.mrf.mxu2 }
  0xcd   :  { %v1152_v1 = vadd.f32 %v1151_v63, %v1103_v47  ;;  %v2140_v63 = vld [vmem:[%s3126_s0 + $0xec] sm:$0xf] }
  0xce   :  { %v1200_v2 = vpop.f32.mrf.mxu3  ;;  %v1105_v5 = vpop.f32.mrf.mxu1 }
  0xcf   :  { %v1201_v9 = vadd.f32 %v1200_v2, %v1152_v1  ;;  %v1106_v12 = vadd.f32 %v1105_v5, %v1057_v0  ;;  %v1663_v0 = vld [vmem:[%s3126_s0 + $0x10c] sm:$0xf0]  ;;  %v2145_v2 = vld [vmem:[%s3126_s0 + $0x110] sm:$0xf0]  ;;  %v1677_v5 = vld [vmem:[%s3126_s0 + $0xf8] sm:$0xf] }
  0xd0   :  { %v1252_v13 = vpop.f32.mrf.mxu0 }
  0xd1   :  { %1300 = vmatmul.bf16.gmra.mxu1 %v1594_v3  ;;  %1349 = vmatmul.bf16.gmra.mxu2 %v1598_v4  ;;  %v2893_v15 = vadd.f32 %v1249_v48, %v1201_v9  ;;  %v2141_v3 = vld [vmem:[%s3126_s0 + $0xf4] sm:$0xf]  ;;  %v1671_v4 = vld [vmem:[%s3126_s0 + $0x114] sm:$0xf0]  ;;  %v1067_v9 = vadd.f32 %v2784_v54, %v2824_v11  ;;  %v1069_v11 = vadd.f32 %v2784_v54, %v2832_v19  ;;  %v2154_v19 = vld [vmem:[%s3126_s0 + $0x158] sm:$0xf0] }
  0xd2   :  { %v1705_v54 = vld [vmem:[%s3126_s0 + $0x138] sm:$0xf] }
  0xd3   :  { %1398 = vmatmul.bf16.gmra.mxu3 %v1602_v7  ;;  %1447 = vmatmul.bf16.gmra.mxu0 %v1606_v8  ;;  %v2146_v7 = vld [vmem:[%s3126_s0 + $0x118] sm:$0xf0] }
  0xd4   :  { %v1154_v17 = vpop.f32.mrf.mxu2 }
  0xd5   :  { %v1155_v14 = vadd.f32 %v1154_v17, %v1106_v12  ;;  %v1666_v17 = vor.u32 %v2140_v63, %v1663_v0 }
  0xd6   :  { %v1203_v22 = vpop.f32.mrf.mxu3  ;;  %v1107_v23 = vpop.f32.mrf.mxu1 }
  0xd7   :  { %v1204_v24 = vadd.f32 %v1203_v22, %v1155_v14  ;;  %v1108_v25 = vadd.f32 %v1107_v23, %v1059_v21  ;;  %v1670_v21 = vor.u32 %v2145_v2, %v1669_v59  ;;  %v1674_v22 = vor.u32 %v2141_v3, %v1671_v4 }
  0xd8   :  { %v1254_v26 = vpop.f32.mrf.mxu0  ;;  %v1678_v23 = vor.u32 %v2146_v7, %v1677_v5  ;;  %v2158_v5 = vld [vmem:[%s3126_s0 + $0x17c] sm:$0xf] }
  0xd9   :  { %v2902_v29 = vadd.f32 %v1252_v13, %v1204_v24 }
  0xdc   :  { %v1156_v37 = vpop.f32.mrf.mxu2 }
  0xdd   :  { %v1157_v39 = vadd.f32 %v1156_v37, %v1108_v25  ;;  %v2149_v37 = vld [vmem:[%s3126_s0 + $0x134] sm:$0xf] }
  0xde   :  { %v1205_v40 = vpop.f32.mrf.mxu3  ;;  %v1110_v43 = vpop.f32.mrf.mxu1 }
  0xdf   :  { %v1206_v46 = vadd.f32 %v1205_v40, %v1157_v39  ;;  %v1111_v47 = vadd.f32 %v1110_v43, %v1062_v38  ;;  %v1699_v38 = vld [vmem:[%s3126_s0 + $0x154] sm:$0xf0]  ;;  %v2150_v40 = vld [vmem:[%s3126_s0 + $0x13c] sm:$0xf]  ;;  %v2155_v43 = vld [vmem:[%s3126_s0 + $0x160] sm:$0xf0] }
  0xe0   :  { %v1257_v48 = vpop.f32.mrf.mxu0 }
  0xe1   :  { %1305 = vmatmul.bf16.gmra.mxu1 %v1630_v41  ;;  %1354 = vmatmul.bf16.gmra.mxu2 %v1634_v42  ;;  %v2924_v49 = vadd.f32 %v1254_v26, %v1206_v46  ;;  %v1707_v41 = vld [vmem:[%s3126_s0 + $0x15c] sm:$0xf0] }
  0xe2   :  { %v1713_v42 = vld [vmem:[%s3126_s0 + $0x140] sm:$0xf] }
  0xe3   :  { %1403 = vmatmul.bf16.gmra.mxu3 %v1638_v44  ;;  %1452 = vmatmul.bf16.gmra.mxu0 %v1642_v45 }
  0xe4   :  { %v1159_v51 = vpop.f32.mrf.mxu2 }
  0xe5   :  { %v1160_v53 = vadd.f32 %v1159_v51, %v1111_v47  ;;  %v1702_v47 = vor.u32 %v2149_v37, %v1699_v38 }
  0xe6   :  { %v1208_v55 = vpop.f32.mrf.mxu3  ;;  %v1112_v57 = vpop.f32.mrf.mxu1 }
  0xe7   :  { %v1209_v60 = vadd.f32 %v1208_v55, %v1160_v53  ;;  %v1113_v61 = vadd.f32 %v1112_v57, %v1064_v50  ;;  %v1710_v50 = vor.u32 %v2150_v40, %v1707_v41  ;;  %v1714_v53 = vor.u32 %v2155_v43, %v1713_v42  ;;  %v2167_v40 = vld [vmem:[%s3126_s0 + $0x1c4] sm:$0xf]  ;;  %v1777_v42 = vld [vmem:[%s3126_s0 + $0x1c8] sm:$0xf]  ;;  %v2172_v43 = vld [vmem:[%s3126_s0 + $0x1e8] sm:$0xf0] }
  0xe8   :  { %v1259_v62 = vpop.f32.mrf.mxu0 }
  0xe9   :  { %v2934_v1 = vadd.f32 %v1257_v48, %v1209_v60  ;;  %v1706_v48 = vor.u32 %v2154_v19, %v1705_v54 }
  0xec   :  { %v1161_v8 = vpop.f32.mrf.mxu2 }
  0xed   :  { %v1162_v12 = vadd.f32 %v1161_v8, %v1113_v61  ;;  %v1741_v8 = vld [vmem:[%s3126_s0 + $0x180] sm:$0xf] }
  0xee   :  { %v1210_v13 = vpop.f32.mrf.mxu3  ;;  %v1115_v14 = vpop.f32.mrf.mxu1 }
  0xef   :  { %v1211_v24 = vadd.f32 %v1210_v13, %v1162_v12  ;;  %v1116_v25 = vadd.f32 %v1115_v14, %v1067_v9  ;;  %v2163_v9 = vld [vmem:[%s3126_s0 + $0x1a0] sm:$0xf0]  ;;  %v1743_v12 = vld [vmem:[%s3126_s0 + $0x1a4] sm:$0xf0] }
  0xf0   :  { %v1262_v26 = vpop.f32.mrf.mxu0  ;;  %v1749_v13 = vld [vmem:[%s3126_s0 + $0x188] sm:$0xf] }
  0xf1   :  { %1310 = vmatmul.bf16.gmra.mxu1 %v1666_v17  ;;  %1359 = vmatmul.bf16.gmra.mxu2 %v1670_v21  ;;  %v2956_v27 = vadd.f32 %v1259_v62, %v1211_v24  ;;  %v2164_v17 = vld [vmem:[%s3126_s0 + $0x1a8] sm:$0xf0]  ;;  %v1742_v24 = vor.u32 %v2163_v9, %v1741_v8 }
  0xf3   :  { %1408 = vmatmul.bf16.gmra.mxu3 %v1674_v22  ;;  %1457 = vmatmul.bf16.gmra.mxu0 %v1678_v23 }
  0xf4   :  { %v1164_v28 = vpop.f32.mrf.mxu2 }
  0xf5   :  { %v1165_v20 = vadd.f32 %v1164_v28, %v1116_v25  ;;  %v1750_v28 = vor.u32 %v2164_v17, %v1749_v13  ;;  %v1813_v13 = vld [vmem:[%s3126_s0 + $0x210] sm:$0xf]  ;;  %v2181_v17 = vld [vmem:[%s3126_s0 + $0x230] sm:$0xf0] }
  0xf6   :  { %v1213_v30 = vpop.f32.mrf.mxu3  ;;  %v1117_v32 = vpop.f32.mrf.mxu1 }
  0xf7   :  { %v1214_v33 = vadd.f32 %v1213_v30, %v1165_v20  ;;  %v1118_v34 = vadd.f32 %v1117_v32, %v1069_v11 }
  0xf8   :  { %v1264_v36 = vpop.f32.mrf.mxu0 }
  0xf9   :  { %v2966_v39 = vadd.f32 %v1262_v26, %v1214_v33 }
  0xfc   :  { %v1166_v44 = vpop.f32.mrf.mxu2 }
  0xfd   :  { %v1167_v45 = vadd.f32 %v1166_v44, %v1118_v34  ;;  %v1779_v44 = vld [vmem:[%s3126_s0 + $0x1ec] sm:$0xf0] }
  0xfe   :  { %v1215_v46 = vpop.f32.mrf.mxu3  ;;  %v1120_v51 = vpop.f32.mrf.mxu1 }
  0xff   :  { %v1216_v55 = vadd.f32 %v1215_v46, %v1167_v45  ;;  %v1121_v57 = vadd.f32 %v1120_v51, %v2787_v56  ;;  %v1735_v56 = vld [vmem:[%s3126_s0 + $0x19c] sm:$0xf0]  ;;  %v1785_v45 = vld [vmem:[%s3126_s0 + $0x1d0] sm:$0xf]  ;;  %v2173_v46 = vld [vmem:[%s3126_s0 + $0x1f0] sm:$0xf0] }
 0x100   :  { %v1267_v60 = vpop.f32.mrf.mxu0  ;;  %v1738_v23 = vor.u32 %v2158_v5, %v1735_v56 }
 0x101   :  { %1315 = vmatmul.bf16.gmra.mxu1 %v1702_v47  ;;  %1364 = vmatmul.bf16.gmra.mxu2 %v1706_v48  ;;  %v2987_v61 = vadd.f32 %v1264_v36, %v1216_v55 }
 0x103   :  { %1413 = vmatmul.bf16.gmra.mxu3 %v1710_v50  ;;  %1462 = vmatmul.bf16.gmra.mxu0 %v1714_v53  ;;  %v1778_v53 = vor.u32 %v2172_v43, %v1777_v42 }
 0x104   :  { %v1169_v62 = vpop.f32.mrf.mxu2 }
 0x105   :  { %v1170_v63 = vadd.f32 %v1169_v62, %v1121_v57 }
 0x106   :  { %v1218_v0 = vpop.f32.mrf.mxu3  ;;  %v1122_v59 = vpop.f32.mrf.mxu1 }
 0x107   :  { %v1219_v2 = vadd.f32 %v1218_v0, %v1170_v63  ;;  %v1123_v3 = vadd.f32 %v1122_v59, %v2819_v6  ;;  %v2159_v6 = vld [vmem:[%s3126_s0 + $0x184] sm:$0xf] }
 0x108   :  { %v1269_v4 = vpop.f32.mrf.mxu0  ;;  %v1746_v26 = vor.u32 %v2159_v6, %v1743_v12  ;;  %v2176_v6 = vld [vmem:[%s3126_s0 + $0x20c] sm:$0xf] }
 0x109   :  { %v2996_v7 = vadd.f32 %v1267_v60, %v1219_v2  ;;  %v1786_v60 = vor.u32 %v2173_v46, %v1785_v45 }
 0x10c   :  { %v1171_v21 = vpop.f32.mrf.mxu2 }
 0x10d   :  { %v1172_v14 = vadd.f32 %v1171_v21, %v1123_v3  ;;  %v1815_v21 = vld [vmem:[%s3126_s0 + $0x234] sm:$0xf0] }
 0x10e   :  { %v1220_v22 = vpop.f32.mrf.mxu3  ;;  %v1125_v25 = vpop.f32.mrf.mxu1 }
 0x10f   :  { %v1221_v11 = vadd.f32 %v1220_v22, %v1172_v14  ;;  %v1126_v20 = vadd.f32 %v1125_v25, %v2827_v16  ;;  %v1771_v16 = vld [vmem:[%s3126_s0 + $0x1e4] sm:$0xf0]  ;;  %v1821_v14 = vld [vmem:[%s3126_s0 + $0x218] sm:$0xf]  ;;  %v2182_v22 = vld [vmem:[%s3126_s0 + $0x238] sm:$0xf0] }
 0x110   :  { %v1272_v30 = vpop.f32.mrf.mxu0  ;;  %v1774_v50 = vor.u32 %v2167_v40, %v1771_v16 }
 0x111   :  { %1320 = vmatmul.bf16.gmra.mxu1 %v1738_v23  ;;  %1369 = vmatmul.bf16.gmra.mxu2 %v1742_v24  ;;  %v3017_v32 = vadd.f32 %v1269_v4, %v1221_v11 }
 0x113   :  { %1418 = vmatmul.bf16.gmra.mxu3 %v1746_v26  ;;  %1467 = vmatmul.bf16.gmra.mxu0 %v1750_v28  ;;  %v1814_v28 = vor.u32 %v2181_v17, %v1813_v13 }
 0x114   :  { %v1174_v33 = vpop.f32.mrf.mxu2 }
 0x115   :  { %v1175_v34 = vadd.f32 %v1174_v33, %v1126_v20 }
 0x116   :  { %v1223_v36 = vpop.f32.mrf.mxu3  ;;  %v1127_v37 = vpop.f32.mrf.mxu1 }
 0x117   :  { %v1224_v38 = vadd.f32 %v1223_v36, %v1175_v34  ;;  %v1128_v54 = vadd.f32 %v1127_v37, %v2860_v31  ;;  %v2168_v31 = vld [vmem:[%s3126_s0 + $0x1cc] sm:$0xf] }
 0x118   :  { %v1274_v19 = vpop.f32.mrf.mxu0  ;;  %v1782_v57 = vor.u32 %v2168_v31, %v1779_v44 }
 0x119   :  { %v3026_v41 = vadd.f32 %v1272_v30, %v1224_v38  ;;  %v1822_v30 = vor.u32 %v2182_v22, %v1821_v14 }
 0x11c   :  { %v1176_v47 = vpop.f32.mrf.mxu2 }
 0x11d   :  { %v1177_v48 = vadd.f32 %v1176_v47, %v1128_v54 }
 0x11e   :  { %v1225_v51 = vpop.f32.mrf.mxu3  ;;  %v1130_v55 = vpop.f32.mrf.mxu1 }
 0x11f   :  { %v1226_v62 = vadd.f32 %v1225_v51, %v1177_v48  ;;  %v1131_v63 = vadd.f32 %v1130_v55, %v2790_v58  ;;  %v1807_v58 = vld [vmem:[%s3126_s0 + $0x22c] sm:$0xf0] }
 0x120   :  { %v1277_v0 = vpop.f32.mrf.mxu0  ;;  %v1810_v26 = vor.u32 %v2176_v6, %v1807_v58 }
 0x121   :  { %1325 = vmatmul.bf16.gmra.mxu1 %v1774_v50  ;;  %1374 = vmatmul.bf16.gmra.mxu2 %v1778_v53  ;;  %v3047_v59 = vadd.f32 %v1274_v19, %v1226_v62 }
 0x123   :  { %1423 = vmatmul.bf16.gmra.mxu3 %v1782_v57  ;;  %1472 = vmatmul.bf16.gmra.mxu0 %v1786_v60 }
 0x124   :  { %v1179_v2 = vpop.f32.mrf.mxu2 }
 0x125   :  { %v1180_v3 = vadd.f32 %v1179_v2, %v1131_v63 }
 0x126   :  { %v1228_v4 = vpop.f32.mrf.mxu3  ;;  %v1132_v5 = vpop.f32.mrf.mxu1 }
 0x127   :  { %v1229_v56 = vadd.f32 %v1228_v4, %v1180_v3  ;;  %v1133_v8 = vadd.f32 %v1132_v5, %v2822_v10  ;;  %v2177_v10 = vld [vmem:[%s3126_s0 + $0x214] sm:$0xf] }
 0x128   :  { %v1279_v9 = vpop.f32.mrf.mxu0  ;;  %v1818_v20 = vor.u32 %v2177_v10, %v1815_v21 }
 0x129   :  { %v3056_v12 = vadd.f32 %v1277_v0, %v1229_v56 }
 0x12c   :  { %v1181_v23 = vpop.f32.mrf.mxu2 }
 0x12d   :  { %v1182_v24 = vadd.f32 %v1181_v23, %v1133_v8 }
 0x12e   :  { %v1230_v25 = vpop.f32.mrf.mxu3  ;;  %v1135_v11 = vpop.f32.mrf.mxu1 }
 0x12f   :  { %v1231_v33 = vadd.f32 %v1230_v25, %v1182_v24  ;;  %v1136_v34 = vadd.f32 %v1135_v11, %v2830_v18 }
 0x130   :  { %v1282_v36 = vpop.f32.mrf.mxu0 }
 0x131   :  { %1330 = vmatmul.bf16.gmra.mxu1 %v1810_v26  ;;  %1379 = vmatmul.bf16.gmra.mxu2 %v1814_v28  ;;  %v3077_v37 = vadd.f32 %v1279_v9, %v1231_v33 }
 0x133   :  { %1428 = vmatmul.bf16.gmra.mxu3 %v1818_v20  ;;  %1477 = vmatmul.bf16.gmra.mxu0 %v1822_v30 }
 0x134   :  { %v1184_v38 = vpop.f32.mrf.mxu2 }
 0x135   :  { %v1185_v54 = vadd.f32 %v1184_v38, %v1136_v34 }
 0x136   :  { %v1233_v19 = vpop.f32.mrf.mxu3  ;;  %v1137_v40 = vpop.f32.mrf.mxu1 }
 0x137   :  { %v1234_v16 = vadd.f32 %v1233_v19, %v1185_v54  ;;  %v1138_v42 = vadd.f32 %v1137_v40, %v2863_v35 }
 0x138   :  { %v1284_v43 = vpop.f32.mrf.mxu0 }
 0x139   :  { %v3080_v31 = vadd.f32 %v1282_v36, %v1234_v16 }
 0x13c   :  { %v1186_v44 = vpop.f32.mrf.mxu2 }
 0x13d   :  { %v1187_v45 = vadd.f32 %v1186_v44, %v1138_v42 }
 0x13e   :  { %v1235_v18 = vpop.f32.mrf.mxu3  ;;  %v1296_v46 = vpop.f32.mrf.mxu1 }
 0x13f   :  { %v1236_v47 = vadd.f32 %v1235_v18, %v1187_v45  ;;  %v1297_v53 = vadd.f32 %v1296_v46, %v2872_v52 }
 0x140   :  { %v1443_v48 = vpop.f32.mrf.mxu0 }
 0x141   :  { %v3082_v51 = vadd.f32 %v1284_v43, %v1236_v47 }
 0x144   :  { %v1345_v50 = vpop.f32.mrf.mxu2 }
 0x145   :  { %v1346_v60 = vadd.f32 %v1345_v50, %v1297_v53 }
 0x146   :  { %v1394_v55 = vpop.f32.mrf.mxu3  ;;  %v1298_v57 = vpop.f32.mrf.mxu1 }
 0x147   :  { %v1395_v63 = vadd.f32 %v1394_v55, %v1346_v60  ;;  %v1299_v35 = vadd.f32 %v1298_v57, %v2893_v15 }
 0x148   :  { %v1445_v62 = vpop.f32.mrf.mxu0 }
 0x149   :  { %v1444_v5 = vadd.f32 %v1443_v48, %v1395_v63 }
 0x14b   :  { %v1483_v6 = vmax.f32 %v1444_v5, 0.0 }
 0x14c   :  { %v1347_v0 = vpop.f32.mrf.mxu2 }
 0x14d   :  { %v1348_v2 = vadd.f32 %v1347_v0, %v1299_v35 }
 0x14e   :  { %v1396_v3 = vpop.f32.mrf.mxu3  ;;  %v1301_v4 = vpop.f32.mrf.mxu1 }
 0x14f   :  { %v1397_v56 = vadd.f32 %v1396_v3, %v1348_v2  ;;  %v1302_v52 = vadd.f32 %v1301_v4, %v2902_v29 }
 0x150   :  { %v1448_v8 = vpop.f32.mrf.mxu0 }
 0x151   :  { %v1446_v9 = vadd.f32 %v1445_v62, %v1397_v56 }
 0x153   :  { %v1484_v58 = vmax.f32 %v1446_v9, 0.0 }
 0x154   :  { %v1350_v13 = vpop.f32.mrf.mxu2 }
 0x155   :  { %v2258_v17 = vpack.c.bf16 %v1484_v58, %v1483_v6  ;;  %v1351_v15 = vadd.f32 %v1350_v13, %v1302_v52 }
 0x156   :  { %v1399_v10 = vpop.f32.mrf.mxu3  ;;  %v1303_v21 = vpop.f32.mrf.mxu1 }
 0x157   :  { %2259 = vst [vmem:[%s3127_s3] sm:$0xff] %v2258_v17   ;;  %v1400_v22 = vadd.f32 %v1399_v10, %v1351_v15  ;;  %v1304_v23 = vadd.f32 %v1303_v21, %v2924_v49 }
 0x158   :  { %v1450_v14 = vpop.f32.mrf.mxu0 }
 0x159   :  { %v1449_v11 = vadd.f32 %v1448_v8, %v1400_v22 }
 0x15b   :  { %v1485_v29 = vmax.f32 %v1449_v11, 0.0 }
 0x15c   :  { %v1352_v24 = vpop.f32.mrf.mxu2 }
 0x15d   :  { %v1353_v25 = vadd.f32 %v1352_v24, %v1304_v23 }
 0x15e   :  { %v1401_v26 = vpop.f32.mrf.mxu3  ;;  %v1306_v28 = vpop.f32.mrf.mxu1 }
 0x15f   :  { %v1402_v20 = vadd.f32 %v1401_v26, %v1353_v25  ;;  %v1307_v54 = vadd.f32 %v1306_v28, %v2934_v1 }
 0x160   :  { %v1453_v30 = vpop.f32.mrf.mxu0 }
 0x161   :  { %v1451_v33 = vadd.f32 %v1450_v14, %v1402_v20 }
 0x163   :  { %v1486_v34 = vmax.f32 %v1451_v33, 0.0 }
 0x164   :  { %v1355_v36 = vpop.f32.mrf.mxu2 }
 0x165   :  { %v2263_v38 = vpack.c.bf16 %v1486_v34, %v1485_v29  ;;  %v1356_v49 = vadd.f32 %v1355_v36, %v1307_v54 }
 0x166   :  { %v1404_v19 = vpop.f32.mrf.mxu3  ;;  %v1308_v40 = vpop.f32.mrf.mxu1 }
 0x167   :  { %2295 = vst [vmem:[%s3127_s3 + $0x8] sm:$0xff] %v2263_v38   ;;  %v1405_v42 = vadd.f32 %v1404_v19, %v1356_v49  ;;  %v1309_v43 = vadd.f32 %v1308_v40, %v2956_v27 }
 0x168   :  { %v1455_v16 = vpop.f32.mrf.mxu0 }
 0x169   :  { %v1454_v47 = vadd.f32 %v1453_v30, %v1405_v42 }
 0x16b   :  { %v1487_v1 = vmax.f32 %v1454_v47, 0.0 }
 0x16c   :  { %v1357_v44 = vpop.f32.mrf.mxu2 }
 0x16d   :  { %v1358_v45 = vadd.f32 %v1357_v44, %v1309_v43 }
 0x16e   :  { %v1406_v18 = vpop.f32.mrf.mxu3  ;;  %v1311_v46 = vpop.f32.mrf.mxu1 }
 0x16f   :  { %v1407_v48 = vadd.f32 %v1406_v18, %v1358_v45  ;;  %v1312_v62 = vadd.f32 %v1311_v46, %v2966_v39 }
 0x170   :  { %v1458_v50 = vpop.f32.mrf.mxu0 }
 0x171   :  { %v1456_v53 = vadd.f32 %v1455_v16, %v1407_v48 }
 0x173   :  { %v1488_v55 = vmax.f32 %v1456_v53, 0.0 }
 0x174   :  { %v1360_v57 = vpop.f32.mrf.mxu2 }
 0x175   :  { %v2268_v60 = vpack.c.bf16 %v1488_v55, %v1487_v1  ;;  %v1361_v27 = vadd.f32 %v1360_v57, %v1312_v62 }
 0x176   :  { %v1409_v63 = vpop.f32.mrf.mxu3  ;;  %v1313_v35 = vpop.f32.mrf.mxu1 }
 0x177   :  { %2296 = vst [vmem:[%s3127_s3 + $0x10] sm:$0xff] %v2268_v60   ;;  %v1410_v2 = vadd.f32 %v1409_v63, %v1361_v27  ;;  %v1314_v3 = vadd.f32 %v1313_v35, %v2987_v61 }
 0x178   :  { %v1460_v0 = vpop.f32.mrf.mxu0 }
 0x179   :  { %v1459_v9 = vadd.f32 %v1458_v50, %v1410_v2 }
 0x17b   :  { %v1489_v39 = vmax.f32 %v1459_v9, 0.0 }
 0x17c   :  { %v1362_v4 = vpop.f32.mrf.mxu2 }
 0x17d   :  { %v1363_v5 = vadd.f32 %v1362_v4, %v1314_v3 }
 0x17e   :  { %v1411_v56 = vpop.f32.mrf.mxu3  ;;  %v1316_v8 = vpop.f32.mrf.mxu1 }
 0x17f   :  { %v1412_v6 = vadd.f32 %v1411_v56, %v1363_v5  ;;  %v1317_v21 = vadd.f32 %v1316_v8, %v2996_v7 }
 0x180   :  { %v1463_v58 = vpop.f32.mrf.mxu0 }
 0x181   :  { %v1461_v13 = vadd.f32 %v1460_v0, %v1412_v6 }
 0x183   :  { %v1490_v17 = vmax.f32 %v1461_v13, 0.0 }
 0x184   :  { %v1365_v52 = vpop.f32.mrf.mxu2 }
 0x185   :  { %v2273_v10 = vpack.c.bf16 %v1490_v17, %v1489_v39  ;;  %v1366_v61 = vadd.f32 %v1365_v52, %v1317_v21 }
 0x186   :  { %v1414_v15 = vpop.f32.mrf.mxu3  ;;  %v1318_v14 = vpop.f32.mrf.mxu1 }
 0x187   :  { %2297 = vst [vmem:[%s3127_s3 + $0x18] sm:$0xff] %v2273_v10   ;;  %v1415_v23 = vadd.f32 %v1414_v15, %v1366_v61  ;;  %v1319_v24 = vadd.f32 %v1318_v14, %v3017_v32 }
 0x188   :  { %v1465_v22 = vpop.f32.mrf.mxu0 }
 0x189   :  { %v1464_v20 = vadd.f32 %v1463_v58, %v1415_v23 }
 0x18b   :  { %v1491_v7 = vmax.f32 %v1464_v20, 0.0 }
 0x18c   :  { %v1367_v25 = vpop.f32.mrf.mxu2 }
 0x18d   :  { %v1368_v26 = vadd.f32 %v1367_v25, %v1319_v24 }
 0x18e   :  { %v1416_v28 = vpop.f32.mrf.mxu3  ;;  %v1321_v11 = vpop.f32.mrf.mxu1 }
 0x18f   :  { %v1417_v30 = vadd.f32 %v1416_v28, %v1368_v26  ;;  %v1322_v54 = vadd.f32 %v1321_v11, %v3026_v41 }
 0x190   :  { %v1468_v33 = vpop.f32.mrf.mxu0 }
 0x191   :  { %v1466_v29 = vadd.f32 %v1465_v22, %v1417_v30 }
 0x193   :  { %v1492_v34 = vmax.f32 %v1466_v29, 0.0 }
 0x194   :  { %v1370_v36 = vpop.f32.mrf.mxu2 }
 0x195   :  { %v2278_v38 = vpack.c.bf16 %v1492_v34, %v1491_v7  ;;  %v1371_v32 = vadd.f32 %v1370_v36, %v1322_v54 }
 0x196   :  { %v1419_v19 = vpop.f32.mrf.mxu3  ;;  %v1323_v40 = vpop.f32.mrf.mxu1 }
 0x197   :  { %2298 = vst [vmem:[%s3127_s3 + $0x20] sm:$0xff] %v2278_v38   ;;  %v1420_v16 = vadd.f32 %v1419_v19, %v1371_v32  ;;  %v1324_v42 = vadd.f32 %v1323_v40, %v3047_v59 }
 0x198   :  { %v1470_v49 = vpop.f32.mrf.mxu0 }
 0x199   :  { %v1469_v46 = vadd.f32 %v1468_v33, %v1420_v16 }
 0x19b   :  { %v1493_v41 = vmax.f32 %v1469_v46, 0.0 }
 0x19c   :  { %v1372_v43 = vpop.f32.mrf.mxu2 }
 0x19d   :  { %v1373_v44 = vadd.f32 %v1372_v43, %v1324_v42 }
 0x19e   :  { %v1421_v45 = vpop.f32.mrf.mxu3  ;;  %v1326_v18 = vpop.f32.mrf.mxu1 }
 0x19f   :  { %v1422_v47 = vadd.f32 %v1421_v45, %v1373_v44  ;;  %v1327_v57 = vadd.f32 %v1326_v18, %v3056_v12 }
 0x1a0   :  { %v1473_v50 = vpop.f32.mrf.mxu0 }
 0x1a1   :  { %v1471_v48 = vadd.f32 %v1470_v49, %v1422_v47 }
 0x1a3   :  { %v1494_v53 = vmax.f32 %v1471_v48, 0.0 }
 0x1a4   :  { %v1375_v1 = vpop.f32.mrf.mxu2 }
 0x1a5   :  { %v2283_v55 = vpack.c.bf16 %v1494_v53, %v1493_v41  ;;  %v1376_v59 = vadd.f32 %v1375_v1, %v1327_v57 }
 0x1a6   :  { %v1424_v60 = vpop.f32.mrf.mxu3  ;;  %v1328_v62 = vpop.f32.mrf.mxu1 }
 0x1a7   :  { %2299 = vst [vmem:[%s3127_s3 + $0x28] sm:$0xff] %v2283_v55   ;;  %v1425_v63 = vadd.f32 %v1424_v60, %v1376_v59  ;;  %v1329_v35 = vadd.f32 %v1328_v62, %v3077_v37 }
 0x1a8   :  { %v1475_v27 = vpop.f32.mrf.mxu0 }
 0x1a9   :  { %v1474_v5 = vadd.f32 %v1473_v50, %v1425_v63 }
 0x1ab   :  { %v1495_v9 = vmax.f32 %v1474_v5, 0.0 }
 0x1ac   :  { %v1377_v0 = vpop.f32.mrf.mxu2 }
 0x1ad   :  { %v1378_v2 = vadd.f32 %v1377_v0, %v1329_v35 }
 0x1ae   :  { %v1426_v3 = vpop.f32.mrf.mxu3  ;;  %v1331_v4 = vpop.f32.mrf.mxu1 }
 0x1af   :  { %v1427_v56 = vadd.f32 %v1426_v3, %v1378_v2  ;;  %v1332_v13 = vadd.f32 %v1331_v4, %v3080_v31 }
 0x1b0   :  { %v1478_v17 = vpop.f32.mrf.mxu0 }
 0x1b1   :  { %v1476_v8 = vadd.f32 %v1475_v27, %v1427_v56 }
 0x1b3   :  { %v1496_v12 = vmax.f32 %v1476_v8, 0.0 }
 0x1b4   :  { %v1380_v6 = vpop.f32.mrf.mxu2 }
 0x1b5   :  { %v2288_v58 = vpack.c.bf16 %v1496_v12, %v1495_v9  ;;  %v1381_v37 = vadd.f32 %v1380_v6, %v1332_v13 }
 0x1b6   :  { %v1429_v39 = vpop.f32.mrf.mxu3  ;;  %v1333_v52 = vpop.f32.mrf.mxu1 }
 0x1b7   :  { %2300 = vst [vmem:[%s3127_s3 + $0x30] sm:$0xff] %v2288_v58   ;;  %v1430_v10 = vadd.f32 %v1429_v39, %v1381_v37  ;;  %v1334_v21 = vadd.f32 %v1333_v52, %v3082_v51 }
 0x1b8   :  { %v1480_v24 = vpop.f32.mrf.mxu0 }
 0x1b9   :  { %v1479_v22 = vadd.f32 %v1478_v17, %v1430_v10 }
 0x1bb   :  { %v1497_v26 = vmax.f32 %v1479_v22, 0.0 }
 0x1bc   :  { %v1382_v15 = vpop.f32.mrf.mxu2 }
 0x1bd   :  { %v1383_v14 = vadd.f32 %v1382_v15, %v1334_v21 }
 0x1be   :  { %v1431_v61 = vpop.f32.mrf.mxu3 }
 0x1bf   :  { %v1432_v23 = vadd.f32 %v1431_v61, %v1383_v14 }
 0x1c1   :  { %v1481_v25 = vadd.f32 %v1480_v24, %v1432_v23 }
 0x1c3   :  { %v1498_v31 = vmax.f32 %v1481_v25, 0.0 }
 0x1c5   :  { %v2293_v28 = vpack.c.bf16 %v1498_v31, %v1497_v26 }
 0x1c7   :  { %2301 = vst [vmem:[%s3127_s3 + $0x38] sm:$0xff] %v2293_v28  }

// kernel: _lambda_.8
= control target key start
LH: loop header
LB: loop body
LE: loop exit
PB: predicated region body
PF: predicated region fallthrough
CT: control target
= control target key end

     0   :  { %s2766_s12 = smov 0   ;;  %s2768_s13 = smov 0   ;;  %s3397_s0 = inlined_call_operand.vmem [shape: bf16[2,10,10,128], index: 0, kind: input, shape index: {}]   ;;  %s3398_s1 = inlined_call_operand.vmem [shape: bf16[9,128,128], index: 1, kind: input, shape index: {}]   ;;  %s3399_s2 = inlined_call_operand.vmem [shape: f32[1,128], index: 2, kind: input, shape index: {}]   ;;  %s3400_s3 = inlined_call_operand.vmem [shape: bf16[2,8,8,128], index: 3, kind: output, shape index: {}]  }
   0x1   :  { %s2770_s14 = smov 0  }
   0x2 LB: > { %s25_s15 = sadd.s32 1, %s2740_s13  ;;  %p2014_p0 = scmp.ge.s32.totalorder %s2744_s14, 1  ;;  %s2744_s14 = sphi %s2770_s14, %s13_s14   ;;  %s2740_s13 = sphi %s2768_s13, %s3406_s13   ;;  %s2736_s12 = sphi %s2766_s12, %s3405_s12  }
   0x3   : > { %p27_p1 = scmp.ge.s32.totalorder %s25_s15, 2  ;;  %p168_p2 = scmp.lt.s32.totalorder %s2744_s14, 3 }
   0x5   : > { %s3408_s15 = smov (%p27_p1, %s25_s15), 0  ;;  %p169_p3 = pnand %p2014_p0, %p168_p2 }
   0x6   : > { %p202_p4 = scmp.lt.s32.totalorder (!%p169_p3), %s2736_s12, 1 }
   0x7   : > { %172 = sbr.rel (%p169_p3) target bundleno = 337 (0x151), region = 32 }
   0xc   : > { %v2592_v0 = vld [vmem:[%s3398_s1 + $0x78] sm:$0xff]  ;;  %v2591_v2 = vld [vmem:[%s3398_s1 + $0x70] sm:$0xff]  ;;  %s3410_s12 = smov (!%p202_p4, %s2736_s12), 1  ;;  %v2590_v6 = vld [vmem:[%s3398_s1 + $0x68] sm:$0xff]  ;;  %vm254_vm0 = vsmask.f32 3328 }
   0xd   : > { %v2600_v1 = vld [vmem:[%s3398_s1 + $0xb8] sm:$0xff]  ;;  %2680 = vmatpush.bf16.msra.mxu1 %v2592_v0  ;;  %450 = vmatpush.bf16.msra.mxu0 %v2592_v0  ;;  %v2599_v3 = vld [vmem:[%s3398_s1 + $0xb0] sm:$0xff]  ;;  %s2696_s26 = smul.u32 80, %s3410_s12  ;;  %v2598_v7 = vld [vmem:[%s3398_s1 + $0xa8] sm:$0xff]  ;;  %vm255_vm1 = vsmask.f32 7440 }
   0xe   : > { %720 = vmatpush.bf16.msra.mxu2 %v2600_v1  ;;  %v2612_v4 = vld [vmem:[%s3398_s1 + $0xf8] sm:$0xff]  ;;  %v2611_v5 = vld [vmem:[%s3398_s1 + $0xf0] sm:$0xff]  ;;  %v2589_v11 = vld [vmem:[%s3398_s1 + $0x60] sm:$0xff]  ;;  %vm604_vm2 = vcmask 1042432   ;;  %vm605_vm3 = vcmask 1046532   ;;  %s2572_s5 = sshll.u32 %s3410_s12, 5 }
   0xf   : > { %855 = vmatpush.bf16.msra.mxu3 %v2612_v4  ;;  %s2814_s8 = scalar_lea.vmem %s3397_s0, %s2696_s26  ;;  %v2597_v16 = vld [vmem:[%s3398_s1 + $0xa0] sm:$0xff]  ;;  %v2610_v17 = vld [vmem:[%s3398_s1 + $0xe8] sm:$0xff]  ;;  %v2588_v29 = vld [vmem:[%s3398_s1 + $0x58] sm:$0xff]  ;;  %s3367_s9 = scalar_lea.vmem %s3400_s3, %s2572_s5 }
  0x10   : > { %v226_v8 = vld [vmem:[%s2814_s8 + $0x20] sm:$0xf]  ;;  %v227_v9 = vld [vmem:[%s2814_s8 + $0x28] sm:$0xf]  ;;  %v2819_v10 = vld [vmem:[%s2814_s8 + $0x24] sm:$0x1] }
  0x11   : > { %2681 = vmatpush.bf16.msra.mxu1 %v2591_v2  ;;  %451 = vmatpush.bf16.msra.mxu0 %v2591_v2  ;;  %v2825_v12 = vld [vmem:[%s2814_s8 + $0x2c] sm:$0x1]  ;;  %v314_v13 = vshrl.u32 %v226_v8, 16  ;;  %v317_v14 = vshll.u32 %v226_v8, 16  ;;  %v328_v15 = vshrl.u32 %v227_v9, 16  ;;  %v331_v18 = vshll.u32 %v227_v9, 16  ;;  %vm2852_vm4 = vmor %vm254_vm0, %vm255_vm1 }
  0x12   : > { %721 = vmatpush.bf16.msra.mxu2 %v2599_v3  ;;  %v222_v19 = vld [vmem:[%s2814_s8] sm:$0xf]  ;;  %v323_v22 = vshll.u32 %v2819_v10, 16  ;;  %v223_v24 = vld [vmem:[%s2814_s8 + $0x8] sm:$0xf]  ;;  %v337_v26 = vshll.u32 %v2825_v12, 16  ;;  %vm2861_vm5 = vmor %vm604_vm2, %vm605_vm3 }
  0x13   : > { %856 = vmatpush.bf16.msra.mxu3 %v2611_v5  ;;  %v316_v20 = vrot.slane %v314_v13, 4  ;;  %v319_v21 = vrot.slane %v317_v14, 5  ;;  %v330_v23 = vrot.slane %v328_v15, 4  ;;  %v333_v25 = vrot.slane %v331_v18, 5  ;;  %v246_v27 = vld [vmem:[%s2814_s8 + $0x4] sm:$0x1] }
  0x14   : > { %v247_v28 = vld [vmem:[%s2814_s8 + $0xc] sm:$0x1]  ;;  %v258_v31 = vshrl.u32 %v222_v19, 16  ;;  %v261_v32 = vshll.u32 %v222_v19, 16  ;;  %v2609_v34 = vld [vmem:[%s3398_s1 + $0xe0] sm:$0xff]  ;;  %v267_v35 = vshll.u32 %v246_v27, 16 }
  0x15   : > { %2682 = vmatpush.bf16.msra.mxu1 %v2590_v6  ;;  %452 = vmatpush.bf16.msra.mxu0 %v2590_v6  ;;  %v320_v30 = vor.u32 %v319_v21, %v316_v20  ;;  %v334_v33 = vor.u32 %v333_v25, %v330_v23  ;;  %v272_v36 = vshrl.u32 %v223_v24, 16  ;;  %v275_v37 = vshll.u32 %v223_v24, 16  ;;  %v580_v38 = vld [vmem:[%s2814_s8] sm:$0xe]  ;;  %v581_v43 = vld [vmem:[%s2814_s8 + $0x8] sm:$0xe] }
  0x16   : > { %722 = vmatpush.bf16.msra.mxu2 %v2598_v7  ;;  %v325_v39 = vrot.slane %v323_v22, 5  ;;  %v260_v40 = vrot.slane %v258_v31, 4  ;;  %v263_v41 = vrot.slane %v261_v32, 5  ;;  %v281_v42 = vshll.u32 %v247_v28, 16  ;;  %v2596_v44 = vld [vmem:[%s3398_s1 + $0x98] sm:$0xff]  ;;  %v2587_v60 = vld [vmem:[%s3398_s1 + $0x50] sm:$0xff] }
  0x17   : > { %857 = vmatpush.bf16.msra.mxu3 %v2610_v17  ;;  %v321_v45 = vrot.slane %v320_v30, 4  ;;  %v339_v46 = vrot.slane %v337_v26, 5  ;;  %v274_v47 = vrot.slane %v272_v36, 4  ;;  %v277_v48 = vrot.slane %v275_v37, 5  ;;  %v2608_v56 = vld [vmem:[%s3398_s1 + $0xd8] sm:$0xff]  ;;  %v2595_v0 = vld [vmem:[%s3398_s1 + $0x90] sm:$0xff] }
  0x18   : > { %v335_v50 = vrot.slane %v334_v33, 4  ;;  %v264_v51 = vor.u32 %v263_v41, %v260_v40  ;;  %v2114_v52 = vrot.slane %v580_v38, 9  ;;  %v609_v53 = vrot.slane %v246_v27, 5  ;;  %v228_v59 = vld [vmem:[%s2814_s8 + $0x30] sm:$0xf]  ;;  %v2586_v14 = vld [vmem:[%s3398_s1 + $0x48] sm:$0xff] }
  0x19   : > { %2683 = vmatpush.bf16.msra.mxu1 %v2589_v11  ;;  %453 = vmatpush.bf16.msra.mxu0 %v2589_v11  ;;  %v269_v54 = vrot.slane %v267_v35, 5  ;;  %v278_v55 = vor.u32 %v277_v48, %v274_v47  ;;  %v2115_v58 = vrot.slane %v581_v43, 9  ;;  %v283_v62 = vrot.slane %v281_v42, 5  ;;  %v229_v3 = vld [vmem:[%s2814_s8 + $0x38] sm:$0xf]  ;;  %v2607_v11 = vld [vmem:[%s3398_s1 + $0xd0] sm:$0xff] }
  0x1a   : > { %723 = vmatpush.bf16.msra.mxu2 %v2597_v16  ;;  %v265_v61 = vrot.slane %v264_v51, 4  ;;  %v613_v63 = vrot.slane %v247_v28, 5  ;;  %v326_v1 = vsel %vm2852_vm4, %v321_v45, %v325_v39  ;;  %v340_v4 = vsel %vm2852_vm4, %v335_v50, %v339_v46  ;;  %v224_v7 = vld [vmem:[%s2814_s8 + $0x10] sm:$0xf]  ;;  %v2594_v19 = vld [vmem:[%s3398_s1 + $0x88] sm:$0xff]  ;;  %v2585_v24 = vld [vmem:[%s3398_s1 + $0x40] sm:$0xff] }
  0x1b   : > { %858 = vmatpush.bf16.msra.mxu3 %v2609_v34  ;;  %v279_v2 = vrot.slane %v278_v55, 4  ;;  %v610_v5 = vsel %vm2861_vm5, %v2114_v52, %v609_v53  ;;  %v342_v6 = vshrl.u32 %v228_v59, 16  ;;  %v345_v13 = vshll.u32 %v228_v59, 16  ;;  %v225_v22 = vld [vmem:[%s2814_s8 + $0x18] sm:$0xf]  ;;  %v2606_v31 = vld [vmem:[%s3398_s1 + $0xc8] sm:$0xff] }
  0x1c   : > { %v270_v8 = vsel %vm2852_vm4, %v265_v61, %v269_v54  ;;  %v614_v9 = vsel %vm2861_vm5, %v2115_v58, %v613_v63  ;;  %v2890_v15 = vunpack.c.l.b16 %v326_v1  ;;  %v356_v17 = vshrl.u32 %v229_v3, 16  ;;  %v2908_v32 = vld [vmem:[%s2814_s8 + $0x34] sm:$0x1]  ;;  %v2911_v36 = vld [vmem:[%s2814_s8 + $0x3c] sm:$0x1]  ;;  %v2593_v42 = vld [vmem:[%s3398_s1 + $0x80] sm:$0xff] }
  0x1d   : > { %2684 = vmatpush.bf16.msra.mxu1 %v2588_v29  ;;  %454 = vmatpush.bf16.msra.mxu0 %v2588_v29  ;;  %v284_v16 = vsel %vm2852_vm4, %v279_v2, %v283_v62  ;;  %v391_v18 = vunpack.c.l.b16 %v340_v4  ;;  %v656_v20 = vunpack.c.l.b16 %v610_v5  ;;  %v359_v21 = vshll.u32 %v229_v3, 16  ;;  %v2584_v29 = vld [vmem:[%s3398_s1 + $0x38] sm:$0xff]  ;;  %v2918_v43 = vld [vmem:[%s2814_s8 + $0x14] sm:$0x1]  ;;  %v2605_v58 = vld [vmem:[%s3398_s1 + $0xc0] sm:$0xff] }
  0x1e   : > { %724 = vmatpush.bf16.msra.mxu2 %v2596_v44  ;;  %v286_v23 = vshrl.u32 %v224_v7, 16  ;;  %v386_v25 = vunpack.c.l.b16 %v270_v8  ;;  %v657_v26 = vunpack.c.l.b16 %v614_v9  ;;  %v344_v27 = vrot.slane %v342_v6, 4  ;;  %v2921_v44 = vld [vmem:[%s2814_s8 + $0x1c] sm:$0x1]  ;;  %v2583_v52 = vld [vmem:[%s3398_s1 + $0x30] sm:$0xff] }
  0x1f   : > { %859 = vmatpush.bf16.msra.mxu3 %v2608_v56  ;;  %v289_v28 = vshll.u32 %v224_v7, 16  ;;  %v387_v30 = vunpack.c.l.b16 %v284_v16  ;;  %v347_v33 = vrot.slane %v345_v13, 5  ;;  %v358_v34 = vrot.slane %v356_v17, 4  ;;  %v2620_v45 = vld [vmem:[%s3398_s1 + $0x138] sm:$0xff]  ;;  %v2196_v63 = vld [vmem:[%s2814_s8 + $0x8] sm:$0xf] }
  0x20   : > { %v361_v35 = vrot.slane %v359_v21, 5  ;;  %v288_v37 = vrot.slane %v286_v23, 4  ;;  %v300_v39 = vshrl.u32 %v225_v22, 16  ;;  %v303_v40 = vshll.u32 %v225_v22, 16  ;;  %v2640_v48 = vld [vmem:[%s3398_s1 + $0x1b8] sm:$0xff]  ;;  %v2619_v1 = vld [vmem:[%s3398_s1 + $0x130] sm:$0xff] }
  0x21   : > { %2685 = vmatpush.bf16.msra.mxu1 %v2587_v60  ;;  %455 = vmatpush.bf16.msra.mxu0 %v2587_v60  ;;  %v291_v38 = vrot.slane %v289_v28, 5  ;;  %v396_v41 = vpack.c.b16 %v391_v18, %v2890_v15  ;;  %v664_v46 = vpack.c.b16 %v657_v26, %v656_v20  ;;  %v351_v47 = vshll.u32 %v2908_v32, 16  ;;  %v2648_v2 = vld [vmem:[%s3398_s1 + $0x1f8] sm:$0xff]  ;;  %v582_v4 = vld [vmem:[%s2814_s8 + $0x10] sm:$0xe]  ;;  %v2638_v26 = vld [vmem:[%s3398_s1 + $0x1a8] sm:$0xff] }
  0x22   : > { %725 = vmatpush.bf16.msra.mxu2 %v2595_v0  ;;  %v302_v50 = vrot.slane %v300_v39, 4  ;;  %v305_v51 = vrot.slane %v303_v40, 5  ;;  %v394_v53 = vpack.c.b16 %v387_v30, %v386_v25  ;;  %v348_v54 = vor.u32 %v347_v33, %v344_v27  ;;  %v2601_v0 = vld [vmem:[%s2814_s8 + $0xc] sm:$0xf0]  ;;  %v583_v5 = vld [vmem:[%s2814_s8 + $0x18] sm:$0xe] }
  0x23   : > { %860 = vmatpush.bf16.msra.mxu3 %v2607_v11  ;;  %v362_v55 = vor.u32 %v361_v35, %v358_v34  ;;  %v365_v56 = vshll.u32 %v2911_v36, 16  ;;  %v292_v59 = vor.u32 %v291_v38, %v288_v37  ;;  %v295_v60 = vshll.u32 %v2918_v43, 16  ;;  %v2639_v6 = vld [vmem:[%s3398_s1 + $0x1b0] sm:$0xff]  ;;  %v2242_v13 = vld [vmem:[%s2814_s8 + $0x8] sm:$0xf]  ;;  %v2581_v37 = vld [vmem:[%s3398_s1 + $0x20] sm:$0xff] }
  0x24   : > { %v306_v61 = vor.u32 %v305_v51, %v302_v50  ;;  %v309_v62 = vshll.u32 %v2921_v44, 16  ;;  %v353_v3 = vrot.slane %v351_v47, 5  ;;  %v349_v7 = vrot.slane %v348_v54, 4  ;;  %v2244_v18 = vld [vmem:[%s2814_s8 + $0x10] sm:$0xf]  ;;  %v2618_v25 = vld [vmem:[%s3398_s1 + $0x128] sm:$0xff] }
  0x25   : > { %2686 = vmatpush.bf16.msra.mxu1 %v2586_v14  ;;  %456 = vmatpush.bf16.msra.mxu0 %v2586_v14  ;;  %v363_v8 = vrot.slane %v362_v55, 4  ;;  %v367_v9 = vrot.slane %v365_v56, 5  ;;  %v2197_v11 = vor.u32 %v2601_v0, %v2196_v63  ;;  %v293_v14 = vrot.slane %v292_v59, 4  ;;  %v2646_v40 = vld [vmem:[%s3398_s1 + $0x1e8] sm:$0xff]  ;;  %v2580_v55 = vld [vmem:[%s3398_s1 + $0x18] sm:$0xff] }
  0x26   : > { %726 = vmatpush.bf16.msra.mxu2 %v2594_v19  ;;  %v297_v15 = vrot.slane %v295_v60, 5  ;;  %v307_v16 = vrot.slane %v306_v61, 4  ;;  %v311_v17 = vrot.slane %v309_v62, 5  ;;  %v2582_v19 = vld [vmem:[%s3398_s1 + $0x28] sm:$0xff]  ;;  %v2116_v20 = vrot.slane %v582_v4, 9 }
  0x27   : > { %861 = vmatpush.bf16.msra.mxu3 %v2606_v31  ;;  %v617_v21 = vrot.slane %v2918_v43, 5  ;;  %v2117_v22 = vrot.slane %v583_v5, 9  ;;  %v621_v23 = vrot.slane %v2921_v44, 5  ;;  %v354_v27 = vsel %vm2852_vm4, %v349_v7, %v353_v3  ;;  %v2617_v43 = vld [vmem:[%s3398_s1 + $0x120] sm:$0xff]  ;;  %v2993_v47 = vld [vmem:[%s2814_s8 + $0xc] sm:$0x1] }
  0x28   : > { %v368_v28 = vsel %vm2852_vm4, %v363_v8, %v367_v9  ;;  %v912_v30 = vshll.u32 %v2242_v13, 16  ;;  %v298_v31 = vsel %vm2852_vm4, %v293_v14, %v297_v15  ;;  %v312_v33 = vsel %vm2852_vm4, %v307_v16, %v311_v17  ;;  %v2637_v44 = vld [vmem:[%s3398_s1 + $0x1a0] sm:$0xff]  ;;  %v2999_v56 = vld [vmem:[%s2814_s8 + $0x14] sm:$0x1]  ;;  %v2200_v62 = vld [vmem:[%s2814_s8 + $0x18] sm:$0xf] }
  0x29   : > { %2687 = vmatpush.bf16.msra.mxu1 %v2585_v24  ;;  %457 = vmatpush.bf16.msra.mxu0 %v2585_v24  ;;  %v2647_v24 = vld [vmem:[%s3398_s1 + $0x1f0] sm:$0xff]  ;;  %v923_v34 = vshrl.u32 %v2244_v18, 16  ;;  %v926_v35 = vshll.u32 %v2244_v18, 16  ;;  %v618_v38 = vsel %vm2861_vm5, %v2116_v20, %v617_v21  ;;  %v622_v39 = vsel %vm2861_vm5, %v2117_v22, %v621_v23  ;;  %v2602_v63 = vld [vmem:[%s2814_s8 + $0x1c] sm:$0xf0]  ;;  %v2636_v17 = vld [vmem:[%s3398_s1 + $0x198] sm:$0xff] }
  0x2a   : > { %727 = vmatpush.bf16.msra.mxu2 %v2593_v42  ;;  %v393_v42 = vunpack.c.l.b16 %v368_v28  ;;  %v914_v50 = vrot.slane %v912_v30, 5  ;;  %v658_v51 = vunpack.c.l.b16 %v618_v38  ;;  %v918_v59 = vshll.u32 %v2993_v47, 16  ;;  %v585_v5 = vld [vmem:[%s2814_s8 + $0x28] sm:$0xe]  ;;  %v2615_v7 = vld [vmem:[%s3398_s1 + $0x110] sm:$0xff]  ;;  %v2645_v21 = vld [vmem:[%s3398_s1 + $0x1e0] sm:$0xff] }
  0x2b   : > { %862 = vmatpush.bf16.msra.mxu3 %v2605_v58  ;;  %v928_v54 = vrot.slane %v926_v35, 5  ;;  %v2616_v58 = vld [vmem:[%s3398_s1 + $0x118] sm:$0xff]  ;;  %v932_v4 = vshll.u32 %v2999_v56, 16  ;;  %v2201_v8 = vor.u32 %v2602_v63, %v2200_v62  ;;  %v625_v14 = vrot.slane %v2819_v10, 5  ;;  %v2578_v10 = vld [vmem:[%s3398_s1 + $0x8] sm:$0xff]  ;;  %v2635_v23 = vld [vmem:[%s3398_s1 + $0x190] sm:$0xff] }
  0x2c   : > { %468 = vmatmul.bf16.vlgmr.msra.gmra.mxu1 %v396_v41  ;;  %458 = vmatmul.bf16.vlgmr.msra.gmra.mxu0 %v394_v53  ;;  %v392_v41 = vunpack.c.l.b16 %v354_v27  ;;  %v925_v53 = vrot.slane %v923_v34, 4  ;;  %v920_v9 = vrot.slane %v918_v59, 5  ;;  %v2119_v15 = vrot.slane %v585_v5, 9  ;;  %v2246_v20 = vld [vmem:[%s2814_s8 + $0x18] sm:$0xf]  ;;  %v2577_v34 = vld [vmem:[%s3398_s1] sm:$0xff] }
  0x2d   : > { %551 = vmatpush.bf16.msrb.mxu1 %v2584_v29  ;;  %1101 = vmatpush.bf16.msrb.mxu0 %v2620_v45  ;;  %v909_v29 = vshrl.u32 %v2242_v13, 16  ;;  %v388_v45 = vunpack.c.l.b16 %v298_v31  ;;  %v629_v16 = vrot.slane %v2825_v12, 5  ;;  %v2248_v22 = vld [vmem:[%s2814_s8 + $0x20] sm:$0xf]  ;;  %v2614_v12 = vld [vmem:[%s3398_s1 + $0x108] sm:$0xff]  ;;  %v937_v28 = vshrl.u32 %v2246_v20, 16 }
  0x2e   : > { %1410 = vmatpush.bf16.msrb.mxu2 %v2640_v48  ;;  %863 = vmatmul.bf16.vlgmr.msra.gmra.mxu3 %v2197_v11  ;;  %v397_v60 = vpack.c.b16 %v393_v42, %v392_v41  ;;  %v929_v3 = vor.u32 %v928_v54, %v925_v53  ;;  %v940_v30 = vshll.u32 %v2246_v20, 16  ;;  %v951_v31 = vshrl.u32 %v2248_v22, 16  ;;  %v2068_v35 = vld [vmem:[%s2814_s8] sm:$0xf]  ;;  %v2627_v53 = vld [vmem:[%s3398_s1 + $0x170] sm:$0xff] }
  0x2f   : > { %728 = vmatmul.bf16.vlgmr.msra.gmra.mxu2 %v664_v46  ;;  %1656 = vmatpush.bf16.msrb.mxu3 %v2648_v2  ;;  %v389_v46 = vunpack.c.l.b16 %v312_v33  ;;  %v911_v48 = vrot.slane %v909_v29, 4  ;;  %v630_v27 = vsel %vm2861_vm5, %v2119_v15, %v629_v16  ;;  %v954_v33 = vshll.u32 %v2248_v22, 16  ;;  %v2613_v38 = vld [vmem:[%s3398_s1 + $0x100] sm:$0xff]  ;;  %v2603_v62 = vld [vmem:[%s2814_s8 + $0x2c] sm:$0xf0] }
  0x30   : > { %v930_v18 = vrot.slane %v929_v3, 4  ;;  %v2250_v3 = vld [vmem:[%s2814_s8 + $0x28] sm:$0xf]  ;;  %v587_v5 = vld [vmem:[%s2814_s8 + $0x38] sm:$0xe]  ;;  %v633_v20 = vrot.slane %v2908_v32, 5 }
  0x31   : > { %552 = vmatpush.bf16.msrb.mxu1 %v2583_v52  ;;  %1102 = vmatpush.bf16.msrb.mxu0 %v2619_v1  ;;  %v659_v52 = vunpack.c.l.b16 %v622_v39  ;;  %v395_v61 = vpack.c.b16 %v389_v46, %v388_v45  ;;  %v915_v0 = vor.u32 %v914_v50, %v911_v48  ;;  %v584_v1 = vld [vmem:[%s2814_s8 + $0x20] sm:$0xe]  ;;  %v2573_v39 = vld [vmem:[%s2814_s8 + $0x4] sm:$0xf0]  ;;  %v3063_v45 = vld [vmem:[%s3398_s1 + $0x238] sm:$0xff]  ;;  %v939_v48 = vrot.slane %v937_v28, 4 }
  0x32   : > { %1411 = vmatpush.bf16.msrb.mxu2 %v2639_v6  ;;  %v2579_v6 = vld [vmem:[%s3398_s1 + $0x10] sm:$0xff]  ;;  %v2118_v11 = vrot.slane %v584_v1, 9  ;;  %v3066_v46 = vld [vmem:[%s2814_s8 + $0x24] sm:$0x1]  ;;  %v942_v50 = vrot.slane %v940_v30, 5  ;;  %v2069_v54 = vor.u32 %v2573_v39, %v2068_v35  ;;  %v965_v15 = vshrl.u32 %v2250_v3, 16 }
  0x33   : > { %1657 = vmatpush.bf16.msrb.mxu3 %v2647_v24  ;;  %v665_v2 = vpack.c.b16 %v659_v52, %v658_v51  ;;  %v916_v13 = vrot.slane %v915_v0, 4  ;;  %v2644_v24 = vld [vmem:[%s3398_s1 + $0x1d8] sm:$0xff]  ;;  %v953_v51 = vrot.slane %v951_v31, 4  ;;  %v956_v52 = vrot.slane %v954_v33, 5  ;;  %v3079_v1 = vld [vmem:[%s3398_s1 + $0x230] sm:$0xff]  ;;  %v2633_v22 = vld [vmem:[%s3398_s1 + $0x180] sm:$0xff] }
  0x34   : > { %v960_v59 = vshll.u32 %v3066_v46, 16  ;;  %v943_v63 = vor.u32 %v942_v50, %v939_v48  ;;  %v968_v16 = vshll.u32 %v2250_v3, 16  ;;  %v2642_v32 = vld [vmem:[%s3398_s1 + $0x1c8] sm:$0xff]  ;;  %v3119_v28 = vld [vmem:[%s3398_s1 + $0x220] sm:$0xff]  ;;  %v2624_v31 = vld [vmem:[%s3398_s1 + $0x158] sm:$0xff] }
  0x35   : > { %553 = vmatpush.bf16.msrb.mxu1 %v2582_v19  ;;  %1103 = vmatpush.bf16.msrb.mxu0 %v2618_v25  ;;  %v934_v19 = vrot.slane %v932_v4, 5  ;;  %v921_v25 = vsel %vm2852_vm4, %v916_v13, %v920_v9  ;;  %v957_v0 = vor.u32 %v956_v52, %v953_v51  ;;  %v586_v4 = vld [vmem:[%s2814_s8 + $0x30] sm:$0xe]  ;;  %v3129_v33 = vld [vmem:[%s2814_s8 + $0x2c] sm:$0x1] }
  0x36   : > { %1412 = vmatpush.bf16.msrb.mxu2 %v2638_v26  ;;  %v626_v26 = vsel %vm2861_vm5, %v2118_v11, %v625_v14  ;;  %v962_v9 = vrot.slane %v960_v59, 5  ;;  %v2252_v11 = vld [vmem:[%s2814_s8 + $0x30] sm:$0xf]  ;;  %v944_v13 = vrot.slane %v943_v63, 4  ;;  %v3132_v39 = vld [vmem:[%s2814_s8 + $0x34] sm:$0x1] }
  0x37   : > { %1658 = vmatpush.bf16.msrb.mxu3 %v2646_v40  ;;  %v935_v29 = vsel %vm2852_vm4, %v930_v18, %v934_v19  ;;  %v1037_v40 = vunpack.c.l.b16 %v921_v25  ;;  %v660_v42 = vunpack.c.l.b16 %v626_v26  ;;  %v958_v14 = vrot.slane %v957_v0, 4  ;;  %v3098_v18 = vld [vmem:[%s3398_s1 + $0x228] sm:$0xff]  ;;  %v2444_v51 = vld [vmem:[%s2814_s8 + $0x18] sm:$0xf]  ;;  %v2604_v63 = vld [vmem:[%s2814_s8 + $0x3c] sm:$0xf0] }
  0x38   : > { %v1038_v41 = vunpack.c.l.b16 %v935_v29  ;;  %v2120_v19 = vrot.slane %v586_v4, 9  ;;  %v967_v26 = vrot.slane %v965_v15, 4  ;;  %v974_v52 = vshll.u32 %v3129_v33, 16  ;;  %v2254_v0 = vld [vmem:[%s2814_s8 + $0x38] sm:$0xf] }
  0x39   : > { %554 = vmatpush.bf16.msrb.mxu1 %v2581_v37  ;;  %1104 = vmatpush.bf16.msrb.mxu0 %v2617_v43  ;;  %v2628_v37 = vld [vmem:[%s3398_s1 + $0x178] sm:$0xff]  ;;  %v661_v43 = vunpack.c.l.b16 %v630_v27  ;;  %v963_v25 = vsel %vm2852_vm4, %v958_v14, %v962_v9  ;;  %v970_v27 = vrot.slane %v968_v16, 5  ;;  %v988_v59 = vshll.u32 %v3132_v39, 16  ;;  %v2256_v16 = vld [vmem:[%s2814_s8 + $0x40] sm:$0xf] }
  0x3a   : > { %1413 = vmatpush.bf16.msrb.mxu2 %v2637_v44  ;;  %v3058_v44 = vld [vmem:[%s2814_s8 + $0x1c] sm:$0x1]  ;;  %v634_v29 = vsel %vm2861_vm5, %v2120_v19, %v633_v20  ;;  %v2641_v19 = vld [vmem:[%s3398_s1 + $0x1c0] sm:$0xff]  ;;  %v996_v20 = vshll.u32 %v2254_v0, 16 }
  0x3b   : > { %1659 = vmatpush.bf16.msrb.mxu3 %v2645_v21  ;;  %v2121_v21 = vrot.slane %v587_v5, 9  ;;  %v971_v50 = vor.u32 %v970_v27, %v967_v26  ;;  %v3150_v5 = vld [vmem:[%s2814_s8 + $0x14] sm:$0x1]  ;;  %v990_v15 = vrot.slane %v988_v59, 5 }
  0x3c   : > { %473 = vmatmul.bf16.gmra.mxu1 %v397_v60  ;;  %463 = vmatmul.bf16.gmra.mxu0 %v395_v61  ;;  %v666_v60 = vpack.c.b16 %v661_v43, %v660_v42  ;;  %v2204_v61 = vld [vmem:[%s2814_s8 + $0x28] sm:$0xf]  ;;  %v2574_v42 = vld [vmem:[%s2814_s8 + $0x14] sm:$0xf0]  ;;  %v662_v43 = vunpack.c.l.b16 %v634_v29  ;;  %v3172_v27 = vld [vmem:[%s3398_s1 + $0x210] sm:$0xff] }
  0x3d   : > { %555 = vmatpush.bf16.msrb.mxu1 %v2580_v55  ;;  %1105 = vmatpush.bf16.msrb.mxu0 %v2616_v58  ;;  %v1045_v55 = vpack.c.b16 %v1038_v41, %v1037_v40  ;;  %v946_v58 = vshll.u32 %v3058_v44, 16  ;;  %v2442_v40 = vld [vmem:[%s2814_s8 + $0x10] sm:$0xf]  ;;  %v972_v4 = vrot.slane %v971_v50, 4  ;;  %v2306_v29 = vld [vmem:[%s2814_s8 + $0x8] sm:$0xe] }
  0x3e   : > { %1414 = vmatpush.bf16.msrb.mxu2 %v2636_v17  ;;  %868 = vmatmul.bf16.gmra.mxu3 %v2201_v8  ;;  %v2643_v17 = vld [vmem:[%s3398_s1 + $0x1d0] sm:$0xff] }
  0x3f   : > { %733 = vmatmul.bf16.gmra.mxu2 %v665_v2  ;;  %1660 = vmatpush.bf16.msrb.mxu3 %v2644_v24  ;;  %v2626_v2 = vld [vmem:[%s3398_s1 + $0x168] sm:$0xff]  ;;  %v948_v8 = vrot.slane %v946_v58, 5  ;;  %v982_v24 = vshll.u32 %v2252_v11, 16  ;;  %v2072_v41 = vld [vmem:[%s2814_s8 + $0x10] sm:$0xf] }
  0x41   : > { %556 = vmatpush.bf16.msrb.mxu1 %v2579_v6  ;;  %1106 = vmatpush.bf16.msrb.mxu0 %v2615_v7  ;;  %v2634_v6 = vld [vmem:[%s3398_s1 + $0x188] sm:$0xff]  ;;  %v2205_v7 = vor.u32 %v2603_v62, %v2204_v61  ;;  %v984_v35 = vrot.slane %v982_v24, 5  ;;  %v2073_v61 = vor.u32 %v2574_v42, %v2072_v41  ;;  %v3185_v42 = vld [vmem:[%s2814_s8 + $0x3c] sm:$0x1] }
  0x42   : > { %1415 = vmatpush.bf16.msrb.mxu2 %v2635_v23  ;;  %v979_v23 = vshrl.u32 %v2252_v11, 16 }
  0x43   : > { %1661 = vmatpush.bf16.msrb.mxu3 %v2643_v17  ;;  %v993_v17 = vshrl.u32 %v2254_v0, 16 }
  0x45   : > { %557 = vmatpush.bf16.msrb.mxu1 %v2578_v10  ;;  %1107 = vmatpush.bf16.msrb.mxu0 %v2614_v12  ;;  %v637_v10 = vrot.slane %v2911_v36, 5  ;;  %v2625_v12 = vld [vmem:[%s3398_s1 + $0x160] sm:$0xff]  ;;  %v949_v36 = vsel %vm2852_vm4, %v944_v13, %v948_v8 }
  0x46   : > { %1416 = vmatpush.bf16.msrb.mxu2 %v2634_v6  ;;  %v976_v6 = vrot.slane %v974_v52, 5 }
  0x47   : > { %v638_v30 = vsel %vm2861_vm5, %v2121_v21, %v637_v10  ;;  %1662 = vmatpush.bf16.msrb.mxu3 %v2642_v32  ;;  %v1473_v10 = vshll.u32 %v3150_v5, 16  ;;  %v1168_v32 = vrot.slane %v2999_v56, 5  ;;  %v995_v56 = vrot.slane %v993_v17, 4 }
  0x48   : > { %v663_v48 = vunpack.c.l.b16 %v638_v30 }
  0x49   : > { %558 = vmatpush.bf16.msrb.mxu1 %v2577_v34  ;;  %1108 = vmatpush.bf16.msrb.mxu0 %v2613_v38  ;;  %v981_v34 = vrot.slane %v979_v23, 4  ;;  %v1040_v38 = vunpack.c.l.b16 %v963_v25  ;;  %v1164_v23 = vrot.slane %v2993_v47, 5  ;;  %v1010_v25 = vshll.u32 %v2256_v16, 16 }
  0x4a   : > { %1417 = vmatpush.bf16.msrb.mxu2 %v2633_v22  ;;  %v667_v3 = vpack.c.b16 %v663_v48, %v662_v43  ;;  %v977_v47 = vsel %vm2852_vm4, %v972_v4, %v976_v6  ;;  %v2396_v4 = vld [vmem:[%s2814_s8 + $0x10] sm:$0xf] }
  0x4b   : > { %v985_v58 = vor.u32 %v984_v35, %v981_v34  ;;  %1663 = vmatpush.bf16.msrb.mxu3 %v2641_v19  ;;  %v2307_v34 = vld [vmem:[%s2814_s8 + $0x10] sm:$0xe]  ;;  %v2314_v35 = vrot.slane %v2306_v29, 9  ;;  %v1012_v52 = vrot.slane %v1010_v25, 5 }
  0x4c   : > { %559 = vmatmul.bf16.vlgmr.msrb.gmra.mxu1 %v2069_v54  ;;  %1109 = vmatmul.bf16.vlgmr.msrb.gmra.mxu0 %v1045_v55  ;;  %v1467_v54 = vshll.u32 %v2442_v40, 16  ;;  %v1478_v55 = vshrl.u32 %v2444_v51, 16  ;;  %v2315_v41 = vrot.slane %v2307_v34, 9  ;;  %v2649_v34 = vld [vmem:[%s3398_s1 + $0x200] sm:$0xff] }
  0x4d   : > { %1275 = vmatpush.bf16.msra.mxu1 %v2628_v37  ;;  %1830 = vmatpush.bf16.msra.mxu0 %v3063_v45  ;;  %v1039_v37 = vunpack.c.l.b16 %v949_v36  ;;  %v986_v14 = vrot.slane %v985_v58, 4  ;;  %v1007_v36 = vshrl.u32 %v2256_v16, 16  ;;  %v1165_v50 = vsel %vm2861_vm5, %v2314_v35, %v1164_v23  ;;  %v3217_v23 = vld [vmem:[%s2814_s8 + $0x2c] sm:$0x1] }
  0x4e   : > { %873 = vmatmul.bf16.gmra.mxu3 %v2205_v7  ;;  %2688 = vmatpush.bf16.msra.mxu2 %v3063_v45  ;;  %v2208_v45 = vld [vmem:[%s2814_s8 + $0x38] sm:$0xf]  ;;  %v3153_v7 = vld [vmem:[%s2814_s8 + $0x1c] sm:$0x1]  ;;  %v1469_v9 = vrot.slane %v1467_v54, 5  ;;  %v1480_v11 = vrot.slane %v1478_v55, 4  ;;  %v1211_v54 = vunpack.c.l.b16 %v1165_v50  ;;  %v1041_v58 = vunpack.c.l.b16 %v977_v47 }
  0x4f   : > { %738 = vmatmul.bf16.gmra.mxu2 %v666_v60  ;;  %v2623_v60 = vld [vmem:[%s3398_s1 + $0x150] sm:$0xff]  ;;  %v1046_v62 = vpack.c.b16 %v1040_v38, %v1039_v37  ;;  %v2209_v13 = vor.u32 %v2604_v63, %v2208_v45  ;;  %v1487_v24 = vshll.u32 %v3153_v7, 16  ;;  %v991_v30 = vsel %vm2852_vm4, %v986_v14, %v990_v15  ;;  %v2076_v55 = vld [vmem:[%s2814_s8 + $0x20] sm:$0xf]  ;;  %v2575_v45 = vld [vmem:[%s2814_s8 + $0x24] sm:$0xf0] }
  0x50   : > { %v998_v37 = vrot.slane %v996_v20, 5  ;;  %v1042_v59 = vunpack.c.l.b16 %v991_v30  ;;  %v1002_v63 = vshll.u32 %v3185_v42, 16  ;;  %v2077_v17 = vor.u32 %v2575_v45, %v2076_v55  ;;  %v2080_v55 = vld [vmem:[%s2814_s8 + $0x30] sm:$0xf] }
  0x51   : > { %1276 = vmatpush.bf16.msra.mxu1 %v2627_v53  ;;  %1831 = vmatpush.bf16.msra.mxu0 %v3079_v1  ;;  %v1464_v53 = vshrl.u32 %v2442_v40, 16  ;;  %v1475_v40 = vrot.slane %v1473_v10, 5  ;;  %v1489_v48 = vrot.slane %v1487_v24, 5 }
  0x52   : > { %2689 = vmatpush.bf16.msra.mxu2 %v3079_v1  ;;  %v2622_v1 = vld [vmem:[%s3398_s1 + $0x148] sm:$0xff] }
  0x53   : > { %v1466_v8 = vrot.slane %v1464_v53, 4  ;;  %v1169_v53 = vsel %vm2861_vm5, %v2315_v41, %v1168_v32 }
  0x55   : > { %1277 = vmatpush.bf16.msra.mxu1 %v2626_v2  ;;  %1832 = vmatpush.bf16.msra.mxu0 %v3098_v18  ;;  %v1481_v2 = vshll.u32 %v2444_v51, 16  ;;  %v1470_v21 = vor.u32 %v1469_v9, %v1466_v8  ;;  %v1009_v51 = vrot.slane %v1007_v36, 4 }
  0x56   : > { %2690 = vmatpush.bf16.msra.mxu2 %v3098_v18  ;;  %v2650_v18 = vld [vmem:[%s3398_s1 + $0x208] sm:$0xff] }
  0x57   : > { %v1483_v22 = vrot.slane %v1481_v2, 5  ;;  %v1471_v38 = vrot.slane %v1470_v21, 4  ;;  %v2446_v2 = vld [vmem:[%s2814_s8 + $0x20] sm:$0xf] }
  0x58   : > { %v1492_v9 = vshrl.u32 %v2446_v2, 16 }
  0x59   : > { %1278 = vmatpush.bf16.msra.mxu1 %v2625_v12  ;;  %1833 = vmatpush.bf16.msra.mxu0 %v3119_v28  ;;  %v2652_v12 = vld [vmem:[%s3398_s1 + $0x218] sm:$0xff]  ;;  %v1484_v26 = vor.u32 %v1483_v22, %v1480_v11  ;;  %v1476_v0 = vsel %vm2852_vm4, %v1471_v38, %v1475_v40  ;;  %v1495_v11 = vshll.u32 %v2446_v2, 16  ;;  %v3214_v22 = vld [vmem:[%s2814_s8 + $0x24] sm:$0x1]  ;;  %v2309_v38 = vld [vmem:[%s2814_s8 + $0x20] sm:$0xe] }
  0x5a   : > { %2691 = vmatpush.bf16.msra.mxu2 %v3119_v28  ;;  %v1013_v28 = vor.u32 %v1012_v52, %v1009_v51  ;;  %v1494_v19 = vrot.slane %v1492_v9, 4  ;;  %v1592_v21 = vunpack.c.l.b16 %v1476_v0  ;;  %v1172_v52 = vrot.slane %v3058_v44, 5 }
  0x5b   : > { %v1485_v43 = vrot.slane %v1484_v26, 4  ;;  %v1497_v20 = vrot.slane %v1495_v11, 5  ;;  %v1004_v26 = vrot.slane %v1002_v63, 5  ;;  %v2506_v63 = vld [vmem:[%s2814_s8 + $0x10] sm:$0xe] }
  0x5c   : > { %564 = vmatmul.bf16.gmra.mxu1 %v2073_v61  ;;  %1114 = vmatmul.bf16.gmra.mxu0 %v1046_v62  ;;  %v1212_v61 = vunpack.c.l.b16 %v1169_v53  ;;  %v999_v62 = vor.u32 %v998_v37, %v995_v56  ;;  %v1014_v29 = vrot.slane %v1013_v28, 4  ;;  %v1501_v56 = vshll.u32 %v3214_v22, 16  ;;  %v2308_v37 = vld [vmem:[%s2814_s8 + $0x18] sm:$0xe] }
  0x5d   : > { %1279 = vmatpush.bf16.msra.mxu1 %v2624_v31  ;;  %1834 = vmatpush.bf16.msra.mxu0 %v2652_v12  ;;  %v2621_v31 = vld [vmem:[%s3398_s1 + $0x140] sm:$0xff]  ;;  %v1490_v6 = vsel %vm2852_vm4, %v1485_v43, %v1489_v48  ;;  %v1498_v30 = vor.u32 %v1497_v20, %v1494_v19  ;;  %v2316_v50 = vrot.slane %v2308_v37, 9  ;;  %v2317_v53 = vrot.slane %v2309_v38, 9 }
  0x5e   : > { %878 = vmatmul.bf16.gmra.mxu3 %v2209_v13  ;;  %v3209_v8 = vpack.c.b16 %v1212_v61, %v1211_v54  ;;  %v2629_v13 = vld [vmem:[%s2814_s8 + $0x14] sm:$0xf0]  ;;  %2692 = vmatpush.bf16.msra.mxu2 %v2652_v12  ;;  %v1593_v10 = vunpack.c.l.b16 %v1490_v6  ;;  %v1000_v25 = vrot.slane %v999_v62, 4  ;;  %v1515_v12 = vshll.u32 %v3217_v23, 16 }
  0x5f   : > { %743 = vmatmul.bf16.gmra.mxu2 %v667_v3  ;;  %v2448_v3 = vld [vmem:[%s2814_s8 + $0x28] sm:$0xf]  ;;  %v2397_v36 = vor.u32 %v2629_v13, %v2396_v4  ;;  %v1503_v43 = vrot.slane %v1501_v56, 5  ;;  %v1176_v54 = vrot.slane %v3066_v46, 5  ;;  %v1719_v62 = vrot.slane %v3150_v5, 5 }
  0x60   : > { %v1506_v15 = vshrl.u32 %v2448_v3, 16  ;;  %v1509_v16 = vshll.u32 %v2448_v3, 16  ;;  %v1005_v40 = vsel %vm2852_vm4, %v1000_v25, %v1004_v26  ;;  %v1517_v48 = vrot.slane %v1515_v12, 5  ;;  %v2507_v3 = vld [vmem:[%s2814_s8 + $0x18] sm:$0xe] }
  0x61   : > { %1280 = vmatpush.bf16.msra.mxu1 %v2623_v60  ;;  %1835 = vmatpush.bf16.msra.mxu0 %v3172_v27  ;;  %v3198_v60 = vld [vmem:[%s2814_s8 + $0x44] sm:$0x1]  ;;  %v1043_v45 = vunpack.c.l.b16 %v1005_v40  ;;  %v1177_v61 = vsel %vm2861_vm5, %v2317_v53, %v1176_v54  ;;  %v2450_v4 = vld [vmem:[%s2814_s8 + $0x30] sm:$0xf]  ;;  %v2452_v6 = vld [vmem:[%s2814_s8 + $0x38] sm:$0xf] }
  0x62   : > { %v1016_v14 = vshll.u32 %v3198_v60, 16  ;;  %v1508_v24 = vrot.slane %v1506_v15, 4  ;;  %v1511_v32 = vrot.slane %v1509_v16, 5  ;;  %2693 = vmatpush.bf16.msra.mxu2 %v3172_v27  ;;  %v1499_v27 = vrot.slane %v1498_v30, 4  ;;  %v2400_v16 = vld [vmem:[%s2814_s8 + $0x20] sm:$0xf] }
  0x63   : > { %v1214_v0 = vunpack.c.l.b16 %v1177_v61  ;;  %v1520_v11 = vshrl.u32 %v2450_v4, 16  ;;  %v1523_v13 = vshll.u32 %v2450_v4, 16  ;;  %v1534_v5 = vshrl.u32 %v2452_v6, 16  ;;  %v2310_v53 = vld [vmem:[%s2814_s8 + $0x28] sm:$0xe] }
  0x64   : > { %v1018_v47 = vrot.slane %v1016_v14, 5  ;;  %v1512_v35 = vor.u32 %v1511_v32, %v1508_v24  ;;  %v1504_v46 = vsel %vm2852_vm4, %v1499_v27, %v1503_v43  ;;  %v1723_v15 = vrot.slane %v3153_v7, 5  ;;  %v2311_v54 = vld [vmem:[%s2814_s8 + $0x30] sm:$0xe]  ;;  %v2508_v4 = vld [vmem:[%s2814_s8 + $0x20] sm:$0xe] }
  0x65   : > { %1281 = vmatpush.bf16.msra.mxu1 %v2622_v1  ;;  %1836 = vmatpush.bf16.msra.mxu0 %v2650_v18  ;;  %v1047_v1 = vpack.c.b16 %v1042_v59, %v1041_v58  ;;  %v1173_v59 = vsel %vm2861_vm5, %v2316_v50, %v1172_v52  ;;  %v1594_v19 = vunpack.c.l.b16 %v1504_v46  ;;  %v1522_v24 = vrot.slane %v1520_v11, 4  ;;  %v2404_v50 = vld [vmem:[%s2814_s8 + $0x30] sm:$0xf]  ;;  %v2509_v11 = vld [vmem:[%s2814_s8 + $0x28] sm:$0xe] }
  0x66   : > { %v1019_v41 = vsel %vm2852_vm4, %v1014_v29, %v1018_v47  ;;  %2694 = vmatpush.bf16.msra.mxu2 %v2650_v18  ;;  %v1513_v51 = vrot.slane %v1512_v35, 4  ;;  %v2576_v18 = vld [vmem:[%s2814_s8 + $0x34] sm:$0xf0]  ;;  %v1213_v44 = vunpack.c.l.b16 %v1173_v59  ;;  %v1525_v32 = vrot.slane %v1523_v13, 5  ;;  %v3254_v29 = vld [vmem:[%s2814_s8 + $0x34] sm:$0x1] }
  0x67   : > { %v1044_v58 = vunpack.c.l.b16 %v1019_v41  ;;  %v2081_v28 = vor.u32 %v2576_v18, %v2080_v55  ;;  %v3257_v47 = vld [vmem:[%s2814_s8 + $0x3c] sm:$0x1]  ;;  %v2454_v55 = vld [vmem:[%s2814_s8 + $0x40] sm:$0xf]  ;;  %v2319_v59 = vrot.slane %v2311_v54, 9  ;;  %v1184_v61 = vrot.slane %v3132_v39, 5 }
  0x68   : > { %v1518_v2 = vsel %vm2852_vm4, %v1513_v51, %v1517_v48  ;;  %v3248_v9 = vpack.c.b16 %v1214_v0, %v1213_v44  ;;  %v1526_v12 = vor.u32 %v1525_v32, %v1522_v24  ;;  %v1543_v35 = vshll.u32 %v3257_v47, 16  ;;  %v2456_v18 = vld [vmem:[%s2814_s8 + $0x48] sm:$0xf] }
  0x69   : > { %1282 = vmatpush.bf16.msra.mxu1 %v2621_v31  ;;  %v1600_v31 = vpack.c.b16 %v1593_v10, %v1592_v21  ;;  %1837 = vmatpush.bf16.msra.mxu0 %v2649_v34  ;;  %v1048_v14 = vpack.c.b16 %v1044_v58, %v1043_v45  ;;  %v1595_v20 = vunpack.c.l.b16 %v1518_v2  ;;  %v2514_v21 = vrot.slane %v2506_v63, 9 }
  0x6a   : > { %2695 = vmatpush.bf16.msra.mxu2 %v2649_v34  ;;  %v2515_v10 = vrot.slane %v2507_v3, 9  ;;  %v1527_v40 = vrot.slane %v1526_v12, 4  ;;  %v1545_v43 = vrot.slane %v1543_v35, 5  ;;  %v2318_v45 = vrot.slane %v2310_v53, 9 }
  0x6b   : > { %v1601_v30 = vpack.c.b16 %v1595_v20, %v1594_v19  ;;  %v1720_v7 = vsel %vm2861_vm5, %v2514_v21, %v1719_v62  ;;  %v1180_v58 = vrot.slane %v3129_v33, 5  ;;  %v2631_v62 = vld [vmem:[%s2814_s8 + $0x34] sm:$0xf0]  ;;  %v1548_v63 = vshrl.u32 %v2454_v55, 16 }
  0x6c   : > { %569 = vmatmul.bf16.gmra.mxu1 %v2077_v17  ;;  %1119 = vmatmul.bf16.gmra.mxu0 %v1047_v1  ;;  %v2630_v17 = vld [vmem:[%s2814_s8 + $0x24] sm:$0xf0]  ;;  %v1537_v1 = vshll.u32 %v2452_v6, 16  ;;  %v1724_v56 = vsel %vm2861_vm5, %v2515_v10, %v1723_v15  ;;  %v1766_v37 = vunpack.c.l.b16 %v1720_v7  ;;  %v1551_v44 = vshll.u32 %v2454_v55, 16  ;;  %v3284_v15 = vld [vmem:[%s2814_s8 + $0x44] sm:$0x1] }
  0x6d   : > { %v2401_v26 = vor.u32 %v2630_v17, %v2400_v16  ;;  %v1767_v38 = vunpack.c.l.b16 %v1724_v56  ;;  %v1562_v0 = vshrl.u32 %v2456_v18, 16  ;;  %v1565_v46 = vshll.u32 %v2456_v18, 16  ;;  %v3287_v16 = vld [vmem:[%s2814_s8 + $0x4c] sm:$0x1] }
  0x6e   : > { %1664 = vmatmul.bf16.vlgmr.msrb.gmra.mxu3 %v1600_v31  ;;  %v1539_v25 = vrot.slane %v1537_v1, 5  ;;  %v1529_v31 = vshll.u32 %v3254_v29, 16  ;;  %v1181_v6 = vsel %vm2861_vm5, %v2318_v45, %v1180_v58  ;;  %v1185_v33 = vsel %vm2861_vm5, %v2319_v59, %v1184_v61  ;;  %v2511_v61 = vld [vmem:[%s2814_s8 + $0x38] sm:$0xe] }
  0x6f   : > { %1418 = vmatmul.bf16.vlgmr.msrb.gmra.mxu2 %v2397_v36  ;;  %v1536_v36 = vrot.slane %v1534_v5, 4  ;;  %v1774_v48 = vpack.c.b16 %v1767_v38, %v1766_v37  ;;  %v1215_v13 = vunpack.c.l.b16 %v1181_v6  ;;  %v1216_v39 = vunpack.c.l.b16 %v1185_v33  ;;  %v2312_v38 = vld [vmem:[%s2814_s8 + $0x38] sm:$0xe] }
  0x70   : > { %v1531_v41 = vrot.slane %v1529_v31, 5  ;;  %v1550_v5 = vrot.slane %v1548_v63, 4  ;;  %v1564_v17 = vrot.slane %v1562_v0, 4  ;;  %v1567_v1 = vrot.slane %v1565_v46, 5  ;;  %v2513_v63 = vld [vmem:[%s2814_s8 + $0x48] sm:$0xe] }
  0x71   : > { %v1540_v34 = vor.u32 %v1539_v25, %v1536_v36  ;;  %v2516_v19 = vrot.slane %v2508_v4, 9  ;;  %v3289_v20 = vpack.c.b16 %v1216_v39, %v1215_v13  ;;  %v1727_v10 = vrot.slane %v3214_v22, 5 }
  0x72   : > { %v1532_v51 = vsel %vm2852_vm4, %v1527_v40, %v1531_v41  ;;  %v2517_v24 = vrot.slane %v2509_v11, 9  ;;  %v1731_v32 = vrot.slane %v3217_v23, 5  ;;  %v1557_v25 = vshll.u32 %v3284_v15, 16  ;;  %v2313_v40 = vld [vmem:[%s2814_s8 + $0x40] sm:$0xe] }
  0x73   : > { %v1541_v27 = vrot.slane %v1540_v34, 4  ;;  %v1596_v2 = vunpack.c.l.b16 %v1532_v51  ;;  %v1728_v7 = vsel %vm2861_vm5, %v2516_v19, %v1727_v10  ;;  %v2320_v41 = vrot.slane %v2312_v38, 9  ;;  %v2632_v51 = vld [vmem:[%s2814_s8 + $0x44] sm:$0xf0] }
  0x74   : > { %v1732_v22 = vsel %vm2861_vm5, %v2517_v24, %v1731_v32  ;;  %v1559_v23 = vrot.slane %v1557_v25, 5  ;;  %v1768_v31 = vunpack.c.l.b16 %v1728_v7  ;;  %v1735_v0 = vrot.slane %v3254_v29, 5 }
  0x75   : > { %v1546_v52 = vsel %vm2852_vm4, %v1541_v27, %v1545_v43  ;;  %v1769_v34 = vunpack.c.l.b16 %v1732_v22  ;;  %v1188_v27 = vrot.slane %v3185_v42, 5  ;;  %v2321_v43 = vrot.slane %v2313_v40, 9  ;;  %v2510_v42 = vld [vmem:[%s2814_s8 + $0x30] sm:$0xe] }
  0x76   : > { %v1597_v3 = vunpack.c.l.b16 %v1546_v52  ;;  %v2519_v46 = vrot.slane %v2511_v61, 9  ;;  %v1747_v4 = vrot.slane %v3287_v16, 5  ;;  %v2521_v33 = vrot.slane %v2513_v63, 9 }
  0x77   : > { %v1775_v52 = vpack.c.b16 %v1769_v34, %v1768_v31  ;;  %v1189_v53 = vsel %vm2861_vm5, %v2320_v41, %v1188_v27 }
  0x78   : > { %v1602_v21 = vpack.c.b16 %v1597_v3, %v1596_v2  ;;  %v1217_v45 = vunpack.c.l.b16 %v1189_v53  ;;  %v1739_v2 = vrot.slane %v3257_v47, 5  ;;  %v1743_v3 = vrot.slane %v3284_v15, 5 }
  0x79   : > { %v1748_v29 = vsel %vm2861_vm5, %v2521_v33, %v1747_v4 }
  0x7c   : > { %574 = vmatmul.bf16.gmra.mxu1 %v2081_v28  ;;  %1124 = vmatmul.bf16.gmra.mxu0 %v1048_v14  ;;  %v1553_v28 = vrot.slane %v1551_v44, 5  ;;  %v2405_v14 = vor.u32 %v2631_v62, %v2404_v50  ;;  %v2408_v50 = vld [vmem:[%s2814_s8 + $0x40] sm:$0xf]  ;;  %v2518_v44 = vrot.slane %v2510_v42, 9 }
  0x7d   : > { %v2409_v59 = vor.u32 %v2632_v51, %v2408_v50  ;;  %v2512_v62 = vld [vmem:[%s2814_s8 + $0x40] sm:$0xe] }
  0x7e   : > { %1669 = vmatmul.bf16.gmra.mxu3 %v1601_v30  ;;  %v1554_v36 = vor.u32 %v1553_v28, %v1550_v5  ;;  %v1571_v30 = vshll.u32 %v3287_v16, 16  ;;  %v2520_v6 = vrot.slane %v2512_v62, 9  ;;  %v1736_v11 = vsel %vm2861_vm5, %v2518_v44, %v1735_v0 }
  0x7f   : > { %1423 = vmatmul.bf16.gmra.mxu2 %v2401_v26  ;;  %v1568_v26 = vor.u32 %v1567_v1, %v1564_v17  ;;  %v1770_v47 = vunpack.c.l.b16 %v1736_v11  ;;  %v1773_v28 = vunpack.c.l.b16 %v1748_v29 }
  0x80   : > { %v1573_v12 = vrot.slane %v1571_v30, 5  ;;  %v1744_v13 = vsel %vm2861_vm5, %v2520_v6, %v1743_v3 }
  0x81   : > { %v1569_v56 = vrot.slane %v1568_v26, 4  ;;  %v1772_v5 = vunpack.c.l.b16 %v1744_v13 }
  0x83   : > { %v1574_v37 = vsel %vm2852_vm4, %v1569_v56, %v1573_v12  ;;  %v1777_v17 = vpack.c.b16 %v1773_v28, %v1772_v5 }
  0x84   : > { %v1599_v55 = vunpack.c.l.b16 %v1574_v37 }
  0x8c   : > { %1283 = vmatmul.bf16.vlgmr.msra.gmra.mxu1 %v3209_v8  ;;  %1838 = vmatmul.bf16.vlgmr.msra.gmra.mxu0 %v1774_v48  ;;  %v1555_v8 = vrot.slane %v1554_v36, 4  ;;  %v1192_v48 = vrot.slane %v3198_v60, 5 }
  0x8e   : > { %1674 = vmatmul.bf16.gmra.mxu3 %v1602_v21  ;;  %v1560_v35 = vsel %vm2852_vm4, %v1555_v8, %v1559_v23  ;;  %v1193_v49 = vsel %vm2861_vm5, %v2321_v43, %v1192_v48 }
  0x8f   : > { %1428 = vmatmul.bf16.gmra.mxu2 %v2405_v14  ;;  %v1598_v54 = vunpack.c.l.b16 %v1560_v35  ;;  %v1218_v58 = vunpack.c.l.b16 %v1193_v49 }
  0x91   : > { %v1222_v18 = vpack.c.b16 %v1218_v58, %v1217_v45  ;;  %v1603_v60 = vpack.c.b16 %v1599_v55, %v1598_v54 }
  0x9c   : > { %1288 = vmatmul.bf16.gmra.mxu1 %v3248_v9  ;;  %1843 = vmatmul.bf16.gmra.mxu0 %v1775_v52  ;;  %v1740_v9 = vsel %vm2861_vm5, %v2519_v46, %v1739_v2 }
  0x9d   : > { %v1771_v39 = vunpack.c.l.b16 %v1740_v9 }
  0x9e   : > { %1679 = vmatmul.bf16.gmra.mxu3 %v1603_v60 }
  0x9f   : > { %1433 = vmatmul.bf16.gmra.mxu2 %v2409_v59  ;;  %v1776_v14 = vpack.c.b16 %v1771_v39, %v1770_v47 }
  0xa9   : > { %v469_v15 = vpop.f32.mrf.mxu1  ;;  %v459_v16 = vpop.f32.mrf.mxu0 }
  0xac   : > { %1293 = vmatmul.bf16.gmra.mxu1 %v3289_v20  ;;  %1848 = vmatmul.bf16.gmra.mxu0 %v1776_v14 }
  0xaf   : > { %1853 = vmatmul.bf16.vlgmr.msra.gmra.mxu2 %v1777_v17 }
  0xb1   : > { %v471_v19 = vpop.f32.mrf.mxu1  ;;  %v461_v21 = vpop.f32.mrf.mxu0 }
  0xb2   : > { %v729_v1 = vpop.f32.mrf.mxu2  ;;  %v864_v10 = vpop.f32.mrf.mxu3 }
  0xb9   : > { %v474_v32 = vpop.f32.mrf.mxu1  ;;  %v464_v57 = vpop.f32.mrf.mxu0 }
  0xba   : > { %v731_v24 = vpop.f32.mrf.mxu2  ;;  %v3332_v36 = vpop.f32.mrf.mxu3 }
  0xbc   : > { %1298 = vmatmul.bf16.gmra.mxu1 %v1222_v18 }
  0xc1   : > { %v476_v26 = vpop.f32.mrf.mxu1  ;;  %v466_v30 = vpop.f32.mrf.mxu0 }
  0xc2   : > { %v734_v25 = vpop.f32.mrf.mxu2  ;;  %v869_v7 = vpop.f32.mrf.mxu3 }
  0xc9   : > { %v560_v8 = vpop.f32.mrf.mxu1  ;;  %v1110_v23 = vpop.f32.mrf.mxu0 }
  0xca   : > { %v736_v22 = vpop.f32.mrf.mxu2  ;;  %v561_v20 = vadd.f32 %v560_v8, %v459_v16  ;;  %v3334_v12 = vpop.f32.mrf.mxu3 }
  0xcc   : > { %v749_v56 = vadd.f32 %v729_v1, %v561_v20 }
  0xce   : > { %v884_v31 = vadd.f32 %v864_v10, %v749_v56 }
  0xd0   : > { %v1130_v34 = vadd.f32 %v1110_v23, %v884_v31 }
  0xd1   : > { %v562_v37 = vpop.f32.mrf.mxu1  ;;  %v1112_v38 = vpop.f32.mrf.mxu0 }
  0xd2   : > { %v739_v35 = vpop.f32.mrf.mxu2  ;;  %v563_v40 = vadd.f32 %v562_v37, %v461_v21  ;;  %v874_v27 = vpop.f32.mrf.mxu3 }
  0xd4   : > { %v750_v41 = vadd.f32 %v731_v24, %v563_v40 }
  0xd9   : > { %v565_v48 = vpop.f32.mrf.mxu1  ;;  %v1115_v50 = vpop.f32.mrf.mxu0 }
  0xda   : > { %v741_v43 = vpop.f32.mrf.mxu2  ;;  %v566_v51 = vadd.f32 %v565_v48, %v464_v57  ;;  %v3336_v55 = vpop.f32.mrf.mxu3 }
  0xdc   : > { %v751_v52 = vadd.f32 %v734_v25, %v566_v51 }
  0xde   : > { %v886_v53 = vadd.f32 %v869_v7, %v751_v52 }
  0xe0   : > { %v1132_v49 = vadd.f32 %v1115_v50, %v886_v53 }
  0xe1   : > { %v567_v45 = vpop.f32.mrf.mxu1  ;;  %v3338_v58 = vpop.f32.mrf.mxu0 }
  0xe2   : > { %v744_v54 = vpop.f32.mrf.mxu2  ;;  %v568_v59 = vadd.f32 %v567_v45, %v466_v30  ;;  %v879_v60 = vpop.f32.mrf.mxu3  ;;  %v885_v30 = vadd.f32 %v3332_v36, %v750_v41 }
  0xe4   : > { %v752_v42 = vadd.f32 %v736_v22, %v568_v59  ;;  %v1131_v7 = vadd.f32 %v1112_v38, %v885_v30 }
  0xe6   : > { %v887_v48 = vadd.f32 %v3334_v12, %v752_v42 }
  0xe8   : > { %v1133_v59 = vadd.f32 %v3338_v58, %v887_v48 }
  0xe9   : > { %v570_v18 = vpop.f32.mrf.mxu1  ;;  %v1120_v62 = vpop.f32.mrf.mxu0 }
  0xea   : > { %v746_v61 = vpop.f32.mrf.mxu2  ;;  %v571_v63 = vadd.f32 %v570_v18, %v469_v15  ;;  %v3346_v11 = vpop.f32.mrf.mxu3 }
  0xec   : > { %v753_v44 = vadd.f32 %v739_v35, %v571_v63 }
  0xee   : > { %v888_v0 = vadd.f32 %v874_v27, %v753_v44 }
  0xf0   : > { %v3340_v46 = vadd.f32 %v1120_v62, %v888_v0 }
  0xf1   : > { %v572_v3 = vpop.f32.mrf.mxu1  ;;  %v3342_v4 = vpop.f32.mrf.mxu0 }
  0xf2   : > { %v1419_v2 = vpop.f32.mrf.mxu2  ;;  %v573_v6 = vadd.f32 %v572_v3, %v471_v19  ;;  %v1665_v28 = vpop.f32.mrf.mxu3 }
  0xf4   : > { %v3344_v33 = vadd.f32 %v741_v43, %v573_v6 }
  0xf9   : > { %v575_v13 = vpop.f32.mrf.mxu1  ;;  %v1125_v29 = vpop.f32.mrf.mxu0 }
  0xfa   : > { %v1421_v9 = vpop.f32.mrf.mxu2  ;;  %v576_v47 = vadd.f32 %v575_v13, %v474_v32  ;;  %v1667_v19 = vpop.f32.mrf.mxu3  ;;  %v889_v13 = vadd.f32 %v3336_v55, %v3344_v33 }
  0xfc   : > { %v755_v39 = vadd.f32 %v744_v54, %v576_v47 }
  0xfe   : > { %v890_v5 = vadd.f32 %v879_v60, %v755_v39 }
 0x100   : > { %v3348_v14 = vadd.f32 %v1125_v29, %v890_v5 }
 0x101   : > { %v577_v16 = vpop.f32.mrf.mxu1  ;;  %v3350_v17 = vpop.f32.mrf.mxu0 }
 0x102   : > { %v1424_v15 = vpop.f32.mrf.mxu2  ;;  %v578_v1 = vadd.f32 %v577_v16, %v476_v26  ;;  %v1670_v56 = vpop.f32.mrf.mxu3  ;;  %v3358_v26 = vld [vmem:[%s3399_s2] ss:$0 sm:$0xff] }
 0x104   : > { %v3352_v21 = vadd.f32 %v746_v61, %v578_v1 }
 0x109   : > { %v1284_v10 = vpop.f32.mrf.mxu1  ;;  %v1839_v24 = vpop.f32.mrf.mxu0 }
 0x10a   : > { %v1304_v57 = vadd.f32 %v1284_v10, %v1130_v34  ;;  %v1426_v25 = vpop.f32.mrf.mxu2  ;;  %v1672_v53 = vpop.f32.mrf.mxu3 }
 0x10c   : > { %v1439_v32 = vadd.f32 %v1419_v2, %v1304_v57 }
 0x10e   : > { %v1685_v22 = vadd.f32 %v1665_v28, %v1439_v32  ;;  %v1135_v28 = vadd.f32 %v3342_v4, %v889_v13 }
 0x110   : > { %v1859_v31 = vadd.f32 %v1839_v24, %v1685_v22  ;;  %v891_v22 = vadd.f32 %v3346_v11, %v3352_v21 }
 0x111   : > { %v1286_v8 = vpop.f32.mrf.mxu1  ;;  %v1841_v23 = vpop.f32.mrf.mxu0 }
 0x112   : > { %v1305_v20 = vadd.f32 %v1286_v8, %v1131_v7  ;;  %v1429_v37 = vpop.f32.mrf.mxu2  ;;  %v1871_v40 = vadd.f32 %v3358_v26, %v1859_v31  ;;  %v1675_v60 = vpop.f32.mrf.mxu3 }
 0x114   : > { %v1440_v35 = vadd.f32 %v1421_v9, %v1305_v20  ;;  %v1879_v50 = vmax.f32 %v1871_v40, 0.0 }
 0x116   : > { %v1686_v34 = vadd.f32 %v1667_v19, %v1440_v35  ;;  %v1137_v35 = vadd.f32 %v3350_v17, %v891_v22 }
 0x118   : > { %v1860_v36 = vadd.f32 %v1841_v23, %v1686_v34 }
 0x119   : > { %v1289_v41 = vpop.f32.mrf.mxu1  ;;  %v1844_v27 = vpop.f32.mrf.mxu0 }
 0x11a   : > { %v1872_v38 = vadd.f32 %v3358_v26, %v1860_v36  ;;  %v1306_v43 = vadd.f32 %v1289_v41, %v1132_v49  ;;  %v1431_v45 = vpop.f32.mrf.mxu2  ;;  %v1677_v16 = vpop.f32.mrf.mxu3 }
 0x11c   : > { %v1880_v51 = vmax.f32 %v1872_v38, 0.0  ;;  %v1441_v52 = vadd.f32 %v1424_v15, %v1306_v43 }
 0x11e   : > { %v2660_v54 = vpack.c.bf16 %v1880_v51, %v1879_v50  ;;  %v1687_v61 = vadd.f32 %v1670_v56, %v1441_v52 }
 0x120   : > { %2661 = vst [vmem:[%s3367_s9] sm:$0xff] %v2660_v54   ;;  %v1861_v12 = vadd.f32 %v1844_v27, %v1687_v61 }
 0x121   : > { %v1291_v18 = vpop.f32.mrf.mxu1  ;;  %v1846_v49 = vpop.f32.mrf.mxu0 }
 0x122   : > { %v1307_v62 = vadd.f32 %v1291_v18, %v1133_v59  ;;  %v1873_v44 = vadd.f32 %v3358_v26, %v1861_v12  ;;  %v1434_v2 = vpop.f32.mrf.mxu2  ;;  %v1680_v4 = vpop.f32.mrf.mxu3 }
 0x124   : > { %v1442_v42 = vadd.f32 %v1426_v25, %v1307_v62  ;;  %v1881_v29 = vmax.f32 %v1873_v44, 0.0 }
 0x126   : > { %v1688_v63 = vadd.f32 %v1672_v53, %v1442_v42 }
 0x128   : > { %v1862_v0 = vadd.f32 %v1846_v49, %v1688_v63 }
 0x129   : > { %v1294_v3 = vpop.f32.mrf.mxu1  ;;  %v1849_v58 = vpop.f32.mrf.mxu0 }
 0x12a   : > { %v1874_v6 = vadd.f32 %v3358_v26, %v1862_v0  ;;  %v1308_v9 = vadd.f32 %v1294_v3, %v3340_v46  ;;  %v1436_v10 = vpop.f32.mrf.mxu2  ;;  %v1682_v27 = vpop.f32.mrf.mxu3 }
 0x12c   : > { %v1882_v47 = vmax.f32 %v1874_v6, 0.0  ;;  %v1443_v39 = vadd.f32 %v1429_v37, %v1308_v9 }
 0x12e   : > { %v2665_v5 = vpack.c.bf16 %v1882_v47, %v1881_v29  ;;  %v1689_v15 = vadd.f32 %v1675_v60, %v1443_v39 }
 0x130   : > { %2677 = vst [vmem:[%s3367_s9 + $0x8] sm:$0xff] %v2665_v5   ;;  %v1863_v24 = vadd.f32 %v1849_v58, %v1689_v15 }
 0x131   : > { %v1296_v1 = vpop.f32.mrf.mxu1  ;;  %v1851_v46 = vpop.f32.mrf.mxu0 }
 0x132   : > { %v1309_v19 = vadd.f32 %v1296_v1, %v1135_v28  ;;  %v1875_v30 = vadd.f32 %v3358_v26, %v1863_v24  ;;  %v1854_v56 = vpop.f32.mrf.mxu2 }
 0x134   : > { %v1444_v57 = vadd.f32 %v1431_v45, %v1309_v19  ;;  %v1883_v8 = vmax.f32 %v1875_v30, 0.0 }
 0x136   : > { %v1690_v25 = vadd.f32 %v1677_v16, %v1444_v57 }
 0x138   : > { %v1864_v55 = vadd.f32 %v1851_v46, %v1690_v25 }
 0x139   : > { %v1299_v33 = vpop.f32.mrf.mxu1 }
 0x13a   : > { %v1876_v32 = vadd.f32 %v3358_v26, %v1864_v55  ;;  %v1310_v7 = vadd.f32 %v1299_v33, %v3348_v14  ;;  %v1856_v38 = vpop.f32.mrf.mxu2 }
 0x13c   : > { %v1884_v23 = vmax.f32 %v1876_v32, 0.0  ;;  %v1445_v20 = vadd.f32 %v1434_v2, %v1310_v7 }
 0x13e   : > { %v2670_v31 = vpack.c.bf16 %v1884_v23, %v1883_v8  ;;  %v1691_v37 = vadd.f32 %v1680_v4, %v1445_v20 }
 0x140   : > { %2678 = vst [vmem:[%s3367_s9 + $0x10] sm:$0xff] %v2670_v31   ;;  %v1865_v36 = vadd.f32 %v1854_v56, %v1691_v37 }
 0x141   : > { %v1301_v34 = vpop.f32.mrf.mxu1 }
 0x142   : > { %v1311_v40 = vadd.f32 %v1301_v34, %v1137_v35  ;;  %v1877_v43 = vadd.f32 %v3358_v26, %v1865_v36 }
 0x144   : > { %v1446_v41 = vadd.f32 %v1436_v10, %v1311_v40  ;;  %v1885_v48 = vmax.f32 %v1877_v43, 0.0 }
 0x146   : > { %v1692_v14 = vadd.f32 %v1682_v27, %v1446_v41 }
 0x148   : > { %v1866_v11 = vadd.f32 %v1856_v38, %v1692_v14 }
 0x14a   : > { %v1878_v21 = vadd.f32 %v3358_v26, %v1866_v11 }
 0x14c   : > { %v1886_v50 = vmax.f32 %v1878_v21, 0.0 }
 0x14e   : > { %v2675_v51 = vpack.c.bf16 %v1886_v50, %v1885_v48 }
 0x150   : > { %2679 = vst [vmem:[%s3367_s9 + $0x18] sm:$0xff] %v2675_v51  }
 0x151 PF: > { %s13_s14 = sadd.s32 1, %s2744_s14   ;;  %s3405_s12 = smov %s2740_s13 }
 0x152   : > { %p10_p5 = scmp.ge.s32.totalorder %s13_s14, 4   ;;  %s3406_s13 = smov %s3408_s15 }
 0x154   :  { %12 = sbr.rel (!%p10_p5) target bundleno = 2 (0x2), region = 78 }

// kernel: _lambda_.7
= control target key start
LH: loop header
LB: loop body
LE: loop exit
PB: predicated region body
PF: predicated region fallthrough
CT: control target
= control target key end

     0   :  { %s2893_s15 = smov 0   ;;  %s2895_s16 = smov 0   ;;  %s3540_s0 = inlined_call_operand.vmem [shape: bf16[2,10,10,128], index: 0, kind: input, shape index: {}]   ;;  %s3541_s1 = inlined_call_operand.vmem [shape: bf16[9,128,128], index: 1, kind: input, shape index: {}]   ;;  %s3542_s2 = inlined_call_operand.vmem [shape: f32[1,128], index: 2, kind: input, shape index: {}]   ;;  %s3543_s3 = inlined_call_operand.vmem [shape: bf16[2,8,8,128], index: 3, kind: input, shape index: {}]   ;;  %s3544_s4 = inlined_call_operand.vmem [shape: bf16[2,8,8,128], index: 4, kind: output, shape index: {}]  }
   0x1   :  { %s2897_s17 = smov 0  }
   0x2 LB: > { %s26_s18 = sadd.s32 1, %s2862_s16  ;;  %p2114_p0 = scmp.ge.s32.totalorder %s2866_s17, 1  ;;  %s2866_s17 = sphi %s2897_s17, %s14_s17   ;;  %s2862_s16 = sphi %s2895_s16, %s3550_s16   ;;  %s2858_s15 = sphi %s2893_s15, %s3549_s15  }
   0x3   : > { %p28_p1 = scmp.ge.s32.totalorder %s26_s18, 2  ;;  %p208_p2 = scmp.lt.s32.totalorder %s2866_s17, 3 }
   0x5   : > { %s3552_s18 = smov (%p28_p1, %s26_s18), 0  ;;  %p209_p3 = pnand %p2114_p0, %p208_p2 }
   0x6   : > { %p252_p4 = scmp.lt.s32.totalorder (!%p209_p3), %s2858_s15, 1 }
   0x7   : > { %212 = sbr.rel (%p209_p3) target bundleno = 339 (0x153), region = 36 }
   0xc   : > { %v2695_v0 = vld [vmem:[%s3541_s1 + $0x78] sm:$0xff]  ;;  %v2694_v2 = vld [vmem:[%s3541_s1 + $0x70] sm:$0xff]  ;;  %s3554_s15 = smov (!%p252_p4, %s2858_s15), 1  ;;  %v2693_v6 = vld [vmem:[%s3541_s1 + $0x68] sm:$0xff]  ;;  %vm312_vm0 = vsmask.f32 3328 }
   0xd   : > { %v2703_v1 = vld [vmem:[%s3541_s1 + $0xb8] sm:$0xff]  ;;  %2802 = vmatpush.bf16.msra.mxu1 %v2695_v0  ;;  %508 = vmatpush.bf16.msra.mxu0 %v2695_v0  ;;  %v2702_v3 = vld [vmem:[%s3541_s1 + $0xb0] sm:$0xff]  ;;  %s2818_s29 = smul.u32 80, %s3554_s15  ;;  %v2701_v7 = vld [vmem:[%s3541_s1 + $0xa8] sm:$0xff]  ;;  %vm313_vm1 = vsmask.f32 7440 }
   0xe   : > { %778 = vmatpush.bf16.msra.mxu2 %v2703_v1  ;;  %v2715_v4 = vld [vmem:[%s3541_s1 + $0xf8] sm:$0xff]  ;;  %v2714_v5 = vld [vmem:[%s3541_s1 + $0xf0] sm:$0xff]  ;;  %v2692_v11 = vld [vmem:[%s3541_s1 + $0x60] sm:$0xff]  ;;  %vm662_vm2 = vcmask 1042432   ;;  %vm663_vm3 = vcmask 1046532  }
   0xf   : > { %913 = vmatpush.bf16.msra.mxu3 %v2715_v4  ;;  %s2941_s12 = scalar_lea.vmem %s3540_s0, %s2818_s29  ;;  %v2700_v16 = vld [vmem:[%s3541_s1 + $0xa0] sm:$0xff]  ;;  %v2713_v17 = vld [vmem:[%s3541_s1 + $0xe8] sm:$0xff]  ;;  %v2691_v29 = vld [vmem:[%s3541_s1 + $0x58] sm:$0xff] }
  0x10   : > { %v284_v8 = vld [vmem:[%s2941_s12 + $0x20] sm:$0xf]  ;;  %v285_v9 = vld [vmem:[%s2941_s12 + $0x28] sm:$0xf]  ;;  %v2946_v10 = vld [vmem:[%s2941_s12 + $0x24] sm:$0x1] }
  0x11   : > { %2803 = vmatpush.bf16.msra.mxu1 %v2694_v2  ;;  %509 = vmatpush.bf16.msra.mxu0 %v2694_v2  ;;  %v2952_v12 = vld [vmem:[%s2941_s12 + $0x2c] sm:$0x1]  ;;  %v372_v13 = vshrl.u32 %v284_v8, 16  ;;  %v375_v14 = vshll.u32 %v284_v8, 16  ;;  %v386_v15 = vshrl.u32 %v285_v9, 16  ;;  %v389_v18 = vshll.u32 %v285_v9, 16  ;;  %vm2979_vm4 = vmor %vm312_vm0, %vm313_vm1 }
  0x12   : > { %779 = vmatpush.bf16.msra.mxu2 %v2702_v3  ;;  %v280_v19 = vld [vmem:[%s2941_s12] sm:$0xf]  ;;  %v381_v22 = vshll.u32 %v2946_v10, 16  ;;  %v281_v24 = vld [vmem:[%s2941_s12 + $0x8] sm:$0xf]  ;;  %v395_v26 = vshll.u32 %v2952_v12, 16  ;;  %vm2988_vm5 = vmor %vm662_vm2, %vm663_vm3 }
  0x13   : > { %914 = vmatpush.bf16.msra.mxu3 %v2714_v5  ;;  %v374_v20 = vrot.slane %v372_v13, 4  ;;  %v377_v21 = vrot.slane %v375_v14, 5  ;;  %v388_v23 = vrot.slane %v386_v15, 4  ;;  %v391_v25 = vrot.slane %v389_v18, 5  ;;  %v304_v27 = vld [vmem:[%s2941_s12 + $0x4] sm:$0x1] }
  0x14   : > { %v305_v28 = vld [vmem:[%s2941_s12 + $0xc] sm:$0x1]  ;;  %v316_v31 = vshrl.u32 %v280_v19, 16  ;;  %v319_v32 = vshll.u32 %v280_v19, 16  ;;  %v2712_v34 = vld [vmem:[%s3541_s1 + $0xe0] sm:$0xff]  ;;  %v325_v35 = vshll.u32 %v304_v27, 16 }
  0x15   : > { %2804 = vmatpush.bf16.msra.mxu1 %v2693_v6  ;;  %510 = vmatpush.bf16.msra.mxu0 %v2693_v6  ;;  %v378_v30 = vor.u32 %v377_v21, %v374_v20  ;;  %v392_v33 = vor.u32 %v391_v25, %v388_v23  ;;  %v330_v36 = vshrl.u32 %v281_v24, 16  ;;  %v333_v37 = vshll.u32 %v281_v24, 16  ;;  %v638_v38 = vld [vmem:[%s2941_s12] sm:$0xe]  ;;  %v639_v43 = vld [vmem:[%s2941_s12 + $0x8] sm:$0xe] }
  0x16   : > { %780 = vmatpush.bf16.msra.mxu2 %v2701_v7  ;;  %v383_v39 = vrot.slane %v381_v22, 5  ;;  %v318_v40 = vrot.slane %v316_v31, 4  ;;  %v321_v41 = vrot.slane %v319_v32, 5  ;;  %v339_v42 = vshll.u32 %v305_v28, 16  ;;  %v2699_v44 = vld [vmem:[%s3541_s1 + $0x98] sm:$0xff]  ;;  %v2690_v60 = vld [vmem:[%s3541_s1 + $0x50] sm:$0xff] }
  0x17   : > { %915 = vmatpush.bf16.msra.mxu3 %v2713_v17  ;;  %v379_v45 = vrot.slane %v378_v30, 4  ;;  %v397_v46 = vrot.slane %v395_v26, 5  ;;  %v332_v47 = vrot.slane %v330_v36, 4  ;;  %v335_v48 = vrot.slane %v333_v37, 5  ;;  %v2711_v56 = vld [vmem:[%s3541_s1 + $0xd8] sm:$0xff]  ;;  %v2698_v0 = vld [vmem:[%s3541_s1 + $0x90] sm:$0xff] }
  0x18   : > { %v393_v50 = vrot.slane %v392_v33, 4  ;;  %v322_v51 = vor.u32 %v321_v41, %v318_v40  ;;  %v2216_v52 = vrot.slane %v638_v38, 9  ;;  %v667_v53 = vrot.slane %v304_v27, 5  ;;  %v286_v59 = vld [vmem:[%s2941_s12 + $0x30] sm:$0xf]  ;;  %v2689_v14 = vld [vmem:[%s3541_s1 + $0x48] sm:$0xff] }
  0x19   : > { %2805 = vmatpush.bf16.msra.mxu1 %v2692_v11  ;;  %511 = vmatpush.bf16.msra.mxu0 %v2692_v11  ;;  %v327_v54 = vrot.slane %v325_v35, 5  ;;  %v336_v55 = vor.u32 %v335_v48, %v332_v47  ;;  %v2217_v58 = vrot.slane %v639_v43, 9  ;;  %v341_v62 = vrot.slane %v339_v42, 5  ;;  %v287_v3 = vld [vmem:[%s2941_s12 + $0x38] sm:$0xf]  ;;  %v2710_v11 = vld [vmem:[%s3541_s1 + $0xd0] sm:$0xff] }
  0x1a   : > { %781 = vmatpush.bf16.msra.mxu2 %v2700_v16  ;;  %v323_v61 = vrot.slane %v322_v51, 4  ;;  %v671_v63 = vrot.slane %v305_v28, 5  ;;  %v384_v1 = vsel %vm2979_vm4, %v379_v45, %v383_v39  ;;  %v398_v4 = vsel %vm2979_vm4, %v393_v50, %v397_v46  ;;  %v282_v7 = vld [vmem:[%s2941_s12 + $0x10] sm:$0xf]  ;;  %v2697_v19 = vld [vmem:[%s3541_s1 + $0x88] sm:$0xff]  ;;  %v2688_v24 = vld [vmem:[%s3541_s1 + $0x40] sm:$0xff] }
  0x1b   : > { %916 = vmatpush.bf16.msra.mxu3 %v2712_v34  ;;  %v337_v2 = vrot.slane %v336_v55, 4  ;;  %v668_v5 = vsel %vm2988_vm5, %v2216_v52, %v667_v53  ;;  %v400_v6 = vshrl.u32 %v286_v59, 16  ;;  %v403_v13 = vshll.u32 %v286_v59, 16  ;;  %v283_v22 = vld [vmem:[%s2941_s12 + $0x18] sm:$0xf]  ;;  %v2709_v31 = vld [vmem:[%s3541_s1 + $0xc8] sm:$0xff] }
  0x1c   : > { %v328_v8 = vsel %vm2979_vm4, %v323_v61, %v327_v54  ;;  %v672_v9 = vsel %vm2988_vm5, %v2217_v58, %v671_v63  ;;  %v3017_v15 = vunpack.c.l.b16 %v384_v1  ;;  %v414_v17 = vshrl.u32 %v287_v3, 16  ;;  %v3035_v32 = vld [vmem:[%s2941_s12 + $0x34] sm:$0x1]  ;;  %v3038_v36 = vld [vmem:[%s2941_s12 + $0x3c] sm:$0x1]  ;;  %v2696_v42 = vld [vmem:[%s3541_s1 + $0x80] sm:$0xff] }
  0x1d   : > { %2806 = vmatpush.bf16.msra.mxu1 %v2691_v29  ;;  %512 = vmatpush.bf16.msra.mxu0 %v2691_v29  ;;  %v342_v16 = vsel %vm2979_vm4, %v337_v2, %v341_v62  ;;  %v449_v18 = vunpack.c.l.b16 %v398_v4  ;;  %v714_v20 = vunpack.c.l.b16 %v668_v5  ;;  %v417_v21 = vshll.u32 %v287_v3, 16  ;;  %v2687_v29 = vld [vmem:[%s3541_s1 + $0x38] sm:$0xff]  ;;  %v3045_v43 = vld [vmem:[%s2941_s12 + $0x14] sm:$0x1]  ;;  %v2708_v58 = vld [vmem:[%s3541_s1 + $0xc0] sm:$0xff] }
  0x1e   : > { %782 = vmatpush.bf16.msra.mxu2 %v2699_v44  ;;  %v344_v23 = vshrl.u32 %v282_v7, 16  ;;  %v444_v25 = vunpack.c.l.b16 %v328_v8  ;;  %v715_v26 = vunpack.c.l.b16 %v672_v9  ;;  %v402_v27 = vrot.slane %v400_v6, 4  ;;  %v3048_v44 = vld [vmem:[%s2941_s12 + $0x1c] sm:$0x1]  ;;  %v2686_v52 = vld [vmem:[%s3541_s1 + $0x30] sm:$0xff] }
  0x1f   : > { %917 = vmatpush.bf16.msra.mxu3 %v2711_v56  ;;  %v347_v28 = vshll.u32 %v282_v7, 16  ;;  %v445_v30 = vunpack.c.l.b16 %v342_v16  ;;  %v405_v33 = vrot.slane %v403_v13, 5  ;;  %v416_v34 = vrot.slane %v414_v17, 4  ;;  %v2723_v45 = vld [vmem:[%s3541_s1 + $0x138] sm:$0xff]  ;;  %v2298_v63 = vld [vmem:[%s2941_s12 + $0x8] sm:$0xf] }
  0x20   : > { %v419_v35 = vrot.slane %v417_v21, 5  ;;  %v346_v37 = vrot.slane %v344_v23, 4  ;;  %v358_v39 = vshrl.u32 %v283_v22, 16  ;;  %v361_v40 = vshll.u32 %v283_v22, 16  ;;  %v2743_v48 = vld [vmem:[%s3541_s1 + $0x1b8] sm:$0xff]  ;;  %v2722_v1 = vld [vmem:[%s3541_s1 + $0x130] sm:$0xff] }
  0x21   : > { %2807 = vmatpush.bf16.msra.mxu1 %v2690_v60  ;;  %513 = vmatpush.bf16.msra.mxu0 %v2690_v60  ;;  %v349_v38 = vrot.slane %v347_v28, 5  ;;  %v454_v41 = vpack.c.b16 %v449_v18, %v3017_v15  ;;  %v722_v46 = vpack.c.b16 %v715_v26, %v714_v20  ;;  %v409_v47 = vshll.u32 %v3035_v32, 16  ;;  %v2751_v2 = vld [vmem:[%s3541_s1 + $0x1f8] sm:$0xff]  ;;  %v640_v4 = vld [vmem:[%s2941_s12 + $0x10] sm:$0xe]  ;;  %v2741_v26 = vld [vmem:[%s3541_s1 + $0x1a8] sm:$0xff] }
  0x22   : > { %783 = vmatpush.bf16.msra.mxu2 %v2698_v0  ;;  %v360_v50 = vrot.slane %v358_v39, 4  ;;  %v363_v51 = vrot.slane %v361_v40, 5  ;;  %v452_v53 = vpack.c.b16 %v445_v30, %v444_v25  ;;  %v406_v54 = vor.u32 %v405_v33, %v402_v27  ;;  %v2704_v0 = vld [vmem:[%s2941_s12 + $0xc] sm:$0xf0]  ;;  %v641_v5 = vld [vmem:[%s2941_s12 + $0x18] sm:$0xe] }
  0x23   : > { %918 = vmatpush.bf16.msra.mxu3 %v2710_v11  ;;  %v420_v55 = vor.u32 %v419_v35, %v416_v34  ;;  %v423_v56 = vshll.u32 %v3038_v36, 16  ;;  %v350_v59 = vor.u32 %v349_v38, %v346_v37  ;;  %v353_v60 = vshll.u32 %v3045_v43, 16  ;;  %v2742_v6 = vld [vmem:[%s3541_s1 + $0x1b0] sm:$0xff]  ;;  %v2344_v13 = vld [vmem:[%s2941_s12 + $0x8] sm:$0xf]  ;;  %v2684_v37 = vld [vmem:[%s3541_s1 + $0x20] sm:$0xff] }
  0x24   : > { %v364_v61 = vor.u32 %v363_v51, %v360_v50  ;;  %v367_v62 = vshll.u32 %v3048_v44, 16  ;;  %v411_v3 = vrot.slane %v409_v47, 5  ;;  %v407_v7 = vrot.slane %v406_v54, 4  ;;  %v2346_v18 = vld [vmem:[%s2941_s12 + $0x10] sm:$0xf]  ;;  %v2721_v25 = vld [vmem:[%s3541_s1 + $0x128] sm:$0xff] }
  0x25   : > { %2808 = vmatpush.bf16.msra.mxu1 %v2689_v14  ;;  %514 = vmatpush.bf16.msra.mxu0 %v2689_v14  ;;  %v421_v8 = vrot.slane %v420_v55, 4  ;;  %v425_v9 = vrot.slane %v423_v56, 5  ;;  %v2299_v11 = vor.u32 %v2704_v0, %v2298_v63  ;;  %v351_v14 = vrot.slane %v350_v59, 4  ;;  %v2749_v40 = vld [vmem:[%s3541_s1 + $0x1e8] sm:$0xff]  ;;  %v2683_v55 = vld [vmem:[%s3541_s1 + $0x18] sm:$0xff] }
  0x26   : > { %784 = vmatpush.bf16.msra.mxu2 %v2697_v19  ;;  %v355_v15 = vrot.slane %v353_v60, 5  ;;  %v365_v16 = vrot.slane %v364_v61, 4  ;;  %v369_v17 = vrot.slane %v367_v62, 5  ;;  %v2685_v19 = vld [vmem:[%s3541_s1 + $0x28] sm:$0xff]  ;;  %v2218_v20 = vrot.slane %v640_v4, 9 }
  0x27   : > { %919 = vmatpush.bf16.msra.mxu3 %v2709_v31  ;;  %v675_v21 = vrot.slane %v3045_v43, 5  ;;  %v2219_v22 = vrot.slane %v641_v5, 9  ;;  %v679_v23 = vrot.slane %v3048_v44, 5  ;;  %v412_v27 = vsel %vm2979_vm4, %v407_v7, %v411_v3  ;;  %v2720_v43 = vld [vmem:[%s3541_s1 + $0x120] sm:$0xff]  ;;  %v3120_v47 = vld [vmem:[%s2941_s12 + $0xc] sm:$0x1] }
  0x28   : > { %v426_v28 = vsel %vm2979_vm4, %v421_v8, %v425_v9  ;;  %v970_v30 = vshll.u32 %v2344_v13, 16  ;;  %v356_v31 = vsel %vm2979_vm4, %v351_v14, %v355_v15  ;;  %v370_v33 = vsel %vm2979_vm4, %v365_v16, %v369_v17  ;;  %v2740_v44 = vld [vmem:[%s3541_s1 + $0x1a0] sm:$0xff]  ;;  %v3126_v56 = vld [vmem:[%s2941_s12 + $0x14] sm:$0x1]  ;;  %v2302_v62 = vld [vmem:[%s2941_s12 + $0x18] sm:$0xf] }
  0x29   : > { %2809 = vmatpush.bf16.msra.mxu1 %v2688_v24  ;;  %515 = vmatpush.bf16.msra.mxu0 %v2688_v24  ;;  %v2750_v24 = vld [vmem:[%s3541_s1 + $0x1f0] sm:$0xff]  ;;  %v981_v34 = vshrl.u32 %v2346_v18, 16  ;;  %v984_v35 = vshll.u32 %v2346_v18, 16  ;;  %v676_v38 = vsel %vm2988_vm5, %v2218_v20, %v675_v21  ;;  %v680_v39 = vsel %vm2988_vm5, %v2219_v22, %v679_v23  ;;  %v2705_v63 = vld [vmem:[%s2941_s12 + $0x1c] sm:$0xf0]  ;;  %v2739_v17 = vld [vmem:[%s3541_s1 + $0x198] sm:$0xff] }
  0x2a   : > { %785 = vmatpush.bf16.msra.mxu2 %v2696_v42  ;;  %v451_v42 = vunpack.c.l.b16 %v426_v28  ;;  %v972_v50 = vrot.slane %v970_v30, 5  ;;  %v716_v51 = vunpack.c.l.b16 %v676_v38  ;;  %v976_v59 = vshll.u32 %v3120_v47, 16  ;;  %v643_v5 = vld [vmem:[%s2941_s12 + $0x28] sm:$0xe]  ;;  %v2718_v7 = vld [vmem:[%s3541_s1 + $0x110] sm:$0xff]  ;;  %v2748_v21 = vld [vmem:[%s3541_s1 + $0x1e0] sm:$0xff] }
  0x2b   : > { %920 = vmatpush.bf16.msra.mxu3 %v2708_v58  ;;  %v986_v54 = vrot.slane %v984_v35, 5  ;;  %v2719_v58 = vld [vmem:[%s3541_s1 + $0x118] sm:$0xff]  ;;  %v990_v4 = vshll.u32 %v3126_v56, 16  ;;  %v2303_v8 = vor.u32 %v2705_v63, %v2302_v62  ;;  %v683_v14 = vrot.slane %v2946_v10, 5  ;;  %v2681_v10 = vld [vmem:[%s3541_s1 + $0x8] sm:$0xff]  ;;  %v2738_v23 = vld [vmem:[%s3541_s1 + $0x190] sm:$0xff] }
  0x2c   : > { %526 = vmatmul.bf16.vlgmr.msra.gmra.mxu1 %v454_v41  ;;  %516 = vmatmul.bf16.vlgmr.msra.gmra.mxu0 %v452_v53  ;;  %v450_v41 = vunpack.c.l.b16 %v412_v27  ;;  %v983_v53 = vrot.slane %v981_v34, 4  ;;  %v978_v9 = vrot.slane %v976_v59, 5  ;;  %v2221_v15 = vrot.slane %v643_v5, 9  ;;  %v2348_v20 = vld [vmem:[%s2941_s12 + $0x18] sm:$0xf]  ;;  %v2680_v34 = vld [vmem:[%s3541_s1] sm:$0xff] }
  0x2d   : > { %609 = vmatpush.bf16.msrb.mxu1 %v2687_v29  ;;  %1159 = vmatpush.bf16.msrb.mxu0 %v2723_v45  ;;  %v967_v29 = vshrl.u32 %v2344_v13, 16  ;;  %v446_v45 = vunpack.c.l.b16 %v356_v31  ;;  %v687_v16 = vrot.slane %v2952_v12, 5  ;;  %v2350_v22 = vld [vmem:[%s2941_s12 + $0x20] sm:$0xf]  ;;  %v2717_v12 = vld [vmem:[%s3541_s1 + $0x108] sm:$0xff]  ;;  %v995_v28 = vshrl.u32 %v2348_v20, 16 }
  0x2e   : > { %1468 = vmatpush.bf16.msrb.mxu2 %v2743_v48  ;;  %921 = vmatmul.bf16.vlgmr.msra.gmra.mxu3 %v2299_v11  ;;  %v455_v60 = vpack.c.b16 %v451_v42, %v450_v41  ;;  %v987_v3 = vor.u32 %v986_v54, %v983_v53  ;;  %v998_v30 = vshll.u32 %v2348_v20, 16  ;;  %v1009_v31 = vshrl.u32 %v2350_v22, 16  ;;  %v2170_v35 = vld [vmem:[%s2941_s12] sm:$0xf]  ;;  %v2730_v53 = vld [vmem:[%s3541_s1 + $0x170] sm:$0xff] }
  0x2f   : > { %786 = vmatmul.bf16.vlgmr.msra.gmra.mxu2 %v722_v46  ;;  %1714 = vmatpush.bf16.msrb.mxu3 %v2751_v2  ;;  %v447_v46 = vunpack.c.l.b16 %v370_v33  ;;  %v969_v48 = vrot.slane %v967_v29, 4  ;;  %v688_v27 = vsel %vm2988_vm5, %v2221_v15, %v687_v16  ;;  %v1012_v33 = vshll.u32 %v2350_v22, 16  ;;  %v2716_v38 = vld [vmem:[%s3541_s1 + $0x100] sm:$0xff]  ;;  %v2706_v62 = vld [vmem:[%s2941_s12 + $0x2c] sm:$0xf0] }
  0x30   : > { %v988_v18 = vrot.slane %v987_v3, 4  ;;  %v2352_v3 = vld [vmem:[%s2941_s12 + $0x28] sm:$0xf]  ;;  %v645_v5 = vld [vmem:[%s2941_s12 + $0x38] sm:$0xe]  ;;  %v691_v20 = vrot.slane %v3035_v32, 5 }
  0x31   : > { %610 = vmatpush.bf16.msrb.mxu1 %v2686_v52  ;;  %1160 = vmatpush.bf16.msrb.mxu0 %v2722_v1  ;;  %v717_v52 = vunpack.c.l.b16 %v680_v39  ;;  %v453_v61 = vpack.c.b16 %v447_v46, %v446_v45  ;;  %v973_v0 = vor.u32 %v972_v50, %v969_v48  ;;  %v642_v1 = vld [vmem:[%s2941_s12 + $0x20] sm:$0xe]  ;;  %v2676_v39 = vld [vmem:[%s2941_s12 + $0x4] sm:$0xf0]  ;;  %v3190_v45 = vld [vmem:[%s3541_s1 + $0x238] sm:$0xff]  ;;  %v997_v48 = vrot.slane %v995_v28, 4 }
  0x32   : > { %1469 = vmatpush.bf16.msrb.mxu2 %v2742_v6  ;;  %v2682_v6 = vld [vmem:[%s3541_s1 + $0x10] sm:$0xff]  ;;  %v2220_v11 = vrot.slane %v642_v1, 9  ;;  %v3193_v46 = vld [vmem:[%s2941_s12 + $0x24] sm:$0x1]  ;;  %v1000_v50 = vrot.slane %v998_v30, 5  ;;  %v2171_v54 = vor.u32 %v2676_v39, %v2170_v35  ;;  %v1023_v15 = vshrl.u32 %v2352_v3, 16 }
  0x33   : > { %1715 = vmatpush.bf16.msrb.mxu3 %v2750_v24  ;;  %v723_v2 = vpack.c.b16 %v717_v52, %v716_v51  ;;  %v974_v13 = vrot.slane %v973_v0, 4  ;;  %v2747_v24 = vld [vmem:[%s3541_s1 + $0x1d8] sm:$0xff]  ;;  %v1011_v51 = vrot.slane %v1009_v31, 4  ;;  %v1014_v52 = vrot.slane %v1012_v33, 5  ;;  %v3206_v1 = vld [vmem:[%s3541_s1 + $0x230] sm:$0xff]  ;;  %v2736_v22 = vld [vmem:[%s3541_s1 + $0x180] sm:$0xff] }
  0x34   : > { %v1018_v59 = vshll.u32 %v3193_v46, 16  ;;  %v1001_v63 = vor.u32 %v1000_v50, %v997_v48  ;;  %v1026_v16 = vshll.u32 %v2352_v3, 16  ;;  %v2745_v32 = vld [vmem:[%s3541_s1 + $0x1c8] sm:$0xff]  ;;  %v3246_v28 = vld [vmem:[%s3541_s1 + $0x220] sm:$0xff]  ;;  %v2727_v31 = vld [vmem:[%s3541_s1 + $0x158] sm:$0xff] }
  0x35   : > { %611 = vmatpush.bf16.msrb.mxu1 %v2685_v19  ;;  %1161 = vmatpush.bf16.msrb.mxu0 %v2721_v25  ;;  %v992_v19 = vrot.slane %v990_v4, 5  ;;  %v979_v25 = vsel %vm2979_vm4, %v974_v13, %v978_v9  ;;  %v1015_v0 = vor.u32 %v1014_v52, %v1011_v51  ;;  %v644_v4 = vld [vmem:[%s2941_s12 + $0x30] sm:$0xe]  ;;  %v3256_v33 = vld [vmem:[%s2941_s12 + $0x2c] sm:$0x1] }
  0x36   : > { %1470 = vmatpush.bf16.msrb.mxu2 %v2741_v26  ;;  %v684_v26 = vsel %vm2988_vm5, %v2220_v11, %v683_v14  ;;  %v1020_v9 = vrot.slane %v1018_v59, 5  ;;  %v2354_v11 = vld [vmem:[%s2941_s12 + $0x30] sm:$0xf]  ;;  %v1002_v13 = vrot.slane %v1001_v63, 4  ;;  %v3259_v39 = vld [vmem:[%s2941_s12 + $0x34] sm:$0x1] }
  0x37   : > { %1716 = vmatpush.bf16.msrb.mxu3 %v2749_v40  ;;  %v993_v29 = vsel %vm2979_vm4, %v988_v18, %v992_v19  ;;  %v1095_v40 = vunpack.c.l.b16 %v979_v25  ;;  %v718_v42 = vunpack.c.l.b16 %v684_v26  ;;  %v1016_v14 = vrot.slane %v1015_v0, 4  ;;  %v3225_v18 = vld [vmem:[%s3541_s1 + $0x228] sm:$0xff]  ;;  %v2546_v51 = vld [vmem:[%s2941_s12 + $0x18] sm:$0xf]  ;;  %v2707_v63 = vld [vmem:[%s2941_s12 + $0x3c] sm:$0xf0] }
  0x38   : > { %v1096_v41 = vunpack.c.l.b16 %v993_v29  ;;  %v2222_v19 = vrot.slane %v644_v4, 9  ;;  %v1025_v26 = vrot.slane %v1023_v15, 4  ;;  %v1032_v52 = vshll.u32 %v3256_v33, 16  ;;  %v2356_v0 = vld [vmem:[%s2941_s12 + $0x38] sm:$0xf] }
  0x39   : > { %612 = vmatpush.bf16.msrb.mxu1 %v2684_v37  ;;  %1162 = vmatpush.bf16.msrb.mxu0 %v2720_v43  ;;  %v2731_v37 = vld [vmem:[%s3541_s1 + $0x178] sm:$0xff]  ;;  %v719_v43 = vunpack.c.l.b16 %v688_v27  ;;  %v1021_v25 = vsel %vm2979_vm4, %v1016_v14, %v1020_v9  ;;  %v1028_v27 = vrot.slane %v1026_v16, 5  ;;  %v1046_v59 = vshll.u32 %v3259_v39, 16  ;;  %v2358_v16 = vld [vmem:[%s2941_s12 + $0x40] sm:$0xf] }
  0x3a   : > { %1471 = vmatpush.bf16.msrb.mxu2 %v2740_v44  ;;  %v3185_v44 = vld [vmem:[%s2941_s12 + $0x1c] sm:$0x1]  ;;  %v692_v29 = vsel %vm2988_vm5, %v2222_v19, %v691_v20  ;;  %v2744_v19 = vld [vmem:[%s3541_s1 + $0x1c0] sm:$0xff]  ;;  %v1054_v20 = vshll.u32 %v2356_v0, 16 }
  0x3b   : > { %1717 = vmatpush.bf16.msrb.mxu3 %v2748_v21  ;;  %v2223_v21 = vrot.slane %v645_v5, 9  ;;  %v1029_v50 = vor.u32 %v1028_v27, %v1025_v26  ;;  %v3277_v5 = vld [vmem:[%s2941_s12 + $0x14] sm:$0x1]  ;;  %v1048_v15 = vrot.slane %v1046_v59, 5 }
  0x3c   : > { %531 = vmatmul.bf16.gmra.mxu1 %v455_v60  ;;  %521 = vmatmul.bf16.gmra.mxu0 %v453_v61  ;;  %v724_v60 = vpack.c.b16 %v719_v43, %v718_v42  ;;  %v2306_v61 = vld [vmem:[%s2941_s12 + $0x28] sm:$0xf]  ;;  %v2677_v42 = vld [vmem:[%s2941_s12 + $0x14] sm:$0xf0]  ;;  %v720_v43 = vunpack.c.l.b16 %v692_v29  ;;  %v3299_v27 = vld [vmem:[%s3541_s1 + $0x210] sm:$0xff] }
  0x3d   : > { %613 = vmatpush.bf16.msrb.mxu1 %v2683_v55  ;;  %1163 = vmatpush.bf16.msrb.mxu0 %v2719_v58  ;;  %v1103_v55 = vpack.c.b16 %v1096_v41, %v1095_v40  ;;  %v1004_v58 = vshll.u32 %v3185_v44, 16  ;;  %v2544_v40 = vld [vmem:[%s2941_s12 + $0x10] sm:$0xf]  ;;  %v1030_v4 = vrot.slane %v1029_v50, 4  ;;  %v2408_v29 = vld [vmem:[%s2941_s12 + $0x8] sm:$0xe] }
  0x3e   : > { %1472 = vmatpush.bf16.msrb.mxu2 %v2739_v17  ;;  %926 = vmatmul.bf16.gmra.mxu3 %v2303_v8  ;;  %v2746_v17 = vld [vmem:[%s3541_s1 + $0x1d0] sm:$0xff] }
  0x3f   : > { %791 = vmatmul.bf16.gmra.mxu2 %v723_v2  ;;  %1718 = vmatpush.bf16.msrb.mxu3 %v2747_v24  ;;  %v2729_v2 = vld [vmem:[%s3541_s1 + $0x168] sm:$0xff]  ;;  %v1006_v8 = vrot.slane %v1004_v58, 5  ;;  %v1040_v24 = vshll.u32 %v2354_v11, 16  ;;  %v2174_v41 = vld [vmem:[%s2941_s12 + $0x10] sm:$0xf] }
  0x41   : > { %614 = vmatpush.bf16.msrb.mxu1 %v2682_v6  ;;  %1164 = vmatpush.bf16.msrb.mxu0 %v2718_v7  ;;  %v2737_v6 = vld [vmem:[%s3541_s1 + $0x188] sm:$0xff]  ;;  %v2307_v7 = vor.u32 %v2706_v62, %v2306_v61  ;;  %v1042_v35 = vrot.slane %v1040_v24, 5  ;;  %v2175_v61 = vor.u32 %v2677_v42, %v2174_v41  ;;  %v3312_v42 = vld [vmem:[%s2941_s12 + $0x3c] sm:$0x1] }
  0x42   : > { %1473 = vmatpush.bf16.msrb.mxu2 %v2738_v23  ;;  %v1037_v23 = vshrl.u32 %v2354_v11, 16 }
  0x43   : > { %1719 = vmatpush.bf16.msrb.mxu3 %v2746_v17  ;;  %v1051_v17 = vshrl.u32 %v2356_v0, 16 }
  0x45   : > { %615 = vmatpush.bf16.msrb.mxu1 %v2681_v10  ;;  %1165 = vmatpush.bf16.msrb.mxu0 %v2717_v12  ;;  %v695_v10 = vrot.slane %v3038_v36, 5  ;;  %v2728_v12 = vld [vmem:[%s3541_s1 + $0x160] sm:$0xff]  ;;  %v1007_v36 = vsel %vm2979_vm4, %v1002_v13, %v1006_v8 }
  0x46   : > { %1474 = vmatpush.bf16.msrb.mxu2 %v2737_v6  ;;  %v1034_v6 = vrot.slane %v1032_v52, 5 }
  0x47   : > { %v696_v30 = vsel %vm2988_vm5, %v2223_v21, %v695_v10  ;;  %1720 = vmatpush.bf16.msrb.mxu3 %v2745_v32  ;;  %v1531_v10 = vshll.u32 %v3277_v5, 16  ;;  %v1226_v32 = vrot.slane %v3126_v56, 5  ;;  %v1053_v56 = vrot.slane %v1051_v17, 4 }
  0x48   : > { %v721_v48 = vunpack.c.l.b16 %v696_v30 }
  0x49   : > { %616 = vmatpush.bf16.msrb.mxu1 %v2680_v34  ;;  %1166 = vmatpush.bf16.msrb.mxu0 %v2716_v38  ;;  %v1039_v34 = vrot.slane %v1037_v23, 4  ;;  %v1098_v38 = vunpack.c.l.b16 %v1021_v25  ;;  %v1222_v23 = vrot.slane %v3120_v47, 5  ;;  %v1068_v25 = vshll.u32 %v2358_v16, 16 }
  0x4a   : > { %1475 = vmatpush.bf16.msrb.mxu2 %v2736_v22  ;;  %v725_v3 = vpack.c.b16 %v721_v48, %v720_v43  ;;  %v1035_v47 = vsel %vm2979_vm4, %v1030_v4, %v1034_v6  ;;  %v2498_v4 = vld [vmem:[%s2941_s12 + $0x10] sm:$0xf] }
  0x4b   : > { %v1043_v58 = vor.u32 %v1042_v35, %v1039_v34  ;;  %1721 = vmatpush.bf16.msrb.mxu3 %v2744_v19  ;;  %v2409_v34 = vld [vmem:[%s2941_s12 + $0x10] sm:$0xe]  ;;  %v2416_v35 = vrot.slane %v2408_v29, 9  ;;  %v1070_v52 = vrot.slane %v1068_v25, 5 }
  0x4c   : > { %617 = vmatmul.bf16.vlgmr.msrb.gmra.mxu1 %v2171_v54  ;;  %1167 = vmatmul.bf16.vlgmr.msrb.gmra.mxu0 %v1103_v55  ;;  %v1525_v54 = vshll.u32 %v2544_v40, 16  ;;  %v1536_v55 = vshrl.u32 %v2546_v51, 16  ;;  %v2417_v41 = vrot.slane %v2409_v34, 9  ;;  %v2752_v34 = vld [vmem:[%s3541_s1 + $0x200] sm:$0xff] }
  0x4d   : > { %1333 = vmatpush.bf16.msra.mxu1 %v2731_v37  ;;  %1888 = vmatpush.bf16.msra.mxu0 %v3190_v45  ;;  %v1097_v37 = vunpack.c.l.b16 %v1007_v36  ;;  %v1044_v14 = vrot.slane %v1043_v58, 4  ;;  %v1065_v36 = vshrl.u32 %v2358_v16, 16  ;;  %v1223_v50 = vsel %vm2988_vm5, %v2416_v35, %v1222_v23  ;;  %v3344_v23 = vld [vmem:[%s2941_s12 + $0x2c] sm:$0x1] }
  0x4e   : > { %931 = vmatmul.bf16.gmra.mxu3 %v2307_v7  ;;  %2810 = vmatpush.bf16.msra.mxu2 %v3190_v45  ;;  %v2310_v45 = vld [vmem:[%s2941_s12 + $0x38] sm:$0xf]  ;;  %v3280_v7 = vld [vmem:[%s2941_s12 + $0x1c] sm:$0x1]  ;;  %v1527_v9 = vrot.slane %v1525_v54, 5  ;;  %v1538_v11 = vrot.slane %v1536_v55, 4  ;;  %v1269_v54 = vunpack.c.l.b16 %v1223_v50  ;;  %v1099_v58 = vunpack.c.l.b16 %v1035_v47 }
  0x4f   : > { %796 = vmatmul.bf16.gmra.mxu2 %v724_v60  ;;  %v2726_v60 = vld [vmem:[%s3541_s1 + $0x150] sm:$0xff]  ;;  %v1104_v62 = vpack.c.b16 %v1098_v38, %v1097_v37  ;;  %v2311_v13 = vor.u32 %v2707_v63, %v2310_v45  ;;  %v1545_v24 = vshll.u32 %v3280_v7, 16  ;;  %v1049_v30 = vsel %vm2979_vm4, %v1044_v14, %v1048_v15  ;;  %v2178_v55 = vld [vmem:[%s2941_s12 + $0x20] sm:$0xf]  ;;  %v2678_v45 = vld [vmem:[%s2941_s12 + $0x24] sm:$0xf0] }
  0x50   : > { %v1056_v37 = vrot.slane %v1054_v20, 5  ;;  %v1100_v59 = vunpack.c.l.b16 %v1049_v30  ;;  %v1060_v63 = vshll.u32 %v3312_v42, 16  ;;  %v2179_v17 = vor.u32 %v2678_v45, %v2178_v55  ;;  %v2182_v55 = vld [vmem:[%s2941_s12 + $0x30] sm:$0xf] }
  0x51   : > { %1334 = vmatpush.bf16.msra.mxu1 %v2730_v53  ;;  %1889 = vmatpush.bf16.msra.mxu0 %v3206_v1  ;;  %v1522_v53 = vshrl.u32 %v2544_v40, 16  ;;  %v1533_v40 = vrot.slane %v1531_v10, 5  ;;  %v1547_v48 = vrot.slane %v1545_v24, 5 }
  0x52   : > { %2811 = vmatpush.bf16.msra.mxu2 %v3206_v1  ;;  %v2725_v1 = vld [vmem:[%s3541_s1 + $0x148] sm:$0xff] }
  0x53   : > { %v1524_v8 = vrot.slane %v1522_v53, 4  ;;  %v1227_v53 = vsel %vm2988_vm5, %v2417_v41, %v1226_v32 }
  0x55   : > { %1335 = vmatpush.bf16.msra.mxu1 %v2729_v2  ;;  %1890 = vmatpush.bf16.msra.mxu0 %v3225_v18  ;;  %v1539_v2 = vshll.u32 %v2546_v51, 16  ;;  %v1528_v21 = vor.u32 %v1527_v9, %v1524_v8  ;;  %v1067_v51 = vrot.slane %v1065_v36, 4 }
  0x56   : > { %2812 = vmatpush.bf16.msra.mxu2 %v3225_v18  ;;  %v2753_v18 = vld [vmem:[%s3541_s1 + $0x208] sm:$0xff] }
  0x57   : > { %v1541_v22 = vrot.slane %v1539_v2, 5  ;;  %v1529_v38 = vrot.slane %v1528_v21, 4  ;;  %v2548_v2 = vld [vmem:[%s2941_s12 + $0x20] sm:$0xf] }
  0x58   : > { %v1550_v9 = vshrl.u32 %v2548_v2, 16 }
  0x59   : > { %1336 = vmatpush.bf16.msra.mxu1 %v2728_v12  ;;  %1891 = vmatpush.bf16.msra.mxu0 %v3246_v28  ;;  %v2755_v12 = vld [vmem:[%s3541_s1 + $0x218] sm:$0xff]  ;;  %v1542_v26 = vor.u32 %v1541_v22, %v1538_v11  ;;  %v1534_v0 = vsel %vm2979_vm4, %v1529_v38, %v1533_v40  ;;  %v1553_v11 = vshll.u32 %v2548_v2, 16  ;;  %v3341_v22 = vld [vmem:[%s2941_s12 + $0x24] sm:$0x1]  ;;  %v2411_v38 = vld [vmem:[%s2941_s12 + $0x20] sm:$0xe] }
  0x5a   : > { %2813 = vmatpush.bf16.msra.mxu2 %v3246_v28  ;;  %v1071_v28 = vor.u32 %v1070_v52, %v1067_v51  ;;  %v1552_v19 = vrot.slane %v1550_v9, 4  ;;  %v1650_v21 = vunpack.c.l.b16 %v1534_v0  ;;  %v1230_v52 = vrot.slane %v3185_v44, 5 }
  0x5b   : > { %v1543_v43 = vrot.slane %v1542_v26, 4  ;;  %v1555_v20 = vrot.slane %v1553_v11, 5  ;;  %v1062_v26 = vrot.slane %v1060_v63, 5  ;;  %v2608_v63 = vld [vmem:[%s2941_s12 + $0x10] sm:$0xe] }
  0x5c   : > { %622 = vmatmul.bf16.gmra.mxu1 %v2175_v61  ;;  %1172 = vmatmul.bf16.gmra.mxu0 %v1104_v62  ;;  %v1270_v61 = vunpack.c.l.b16 %v1227_v53  ;;  %v1057_v62 = vor.u32 %v1056_v37, %v1053_v56  ;;  %v1072_v29 = vrot.slane %v1071_v28, 4  ;;  %v1559_v56 = vshll.u32 %v3341_v22, 16  ;;  %v2410_v37 = vld [vmem:[%s2941_s12 + $0x18] sm:$0xe] }
  0x5d   : > { %1337 = vmatpush.bf16.msra.mxu1 %v2727_v31  ;;  %1892 = vmatpush.bf16.msra.mxu0 %v2755_v12  ;;  %v2724_v31 = vld [vmem:[%s3541_s1 + $0x140] sm:$0xff]  ;;  %v1548_v6 = vsel %vm2979_vm4, %v1543_v43, %v1547_v48  ;;  %v1556_v30 = vor.u32 %v1555_v20, %v1552_v19  ;;  %v2418_v50 = vrot.slane %v2410_v37, 9  ;;  %v2419_v53 = vrot.slane %v2411_v38, 9 }
  0x5e   : > { %936 = vmatmul.bf16.gmra.mxu3 %v2311_v13  ;;  %v3336_v8 = vpack.c.b16 %v1270_v61, %v1269_v54  ;;  %v2732_v13 = vld [vmem:[%s2941_s12 + $0x14] sm:$0xf0]  ;;  %2814 = vmatpush.bf16.msra.mxu2 %v2755_v12  ;;  %v1651_v10 = vunpack.c.l.b16 %v1548_v6  ;;  %v1058_v25 = vrot.slane %v1057_v62, 4  ;;  %v1573_v12 = vshll.u32 %v3344_v23, 16 }
  0x5f   : > { %801 = vmatmul.bf16.gmra.mxu2 %v725_v3  ;;  %v2550_v3 = vld [vmem:[%s2941_s12 + $0x28] sm:$0xf]  ;;  %v2499_v36 = vor.u32 %v2732_v13, %v2498_v4  ;;  %v1561_v43 = vrot.slane %v1559_v56, 5  ;;  %v1234_v54 = vrot.slane %v3193_v46, 5  ;;  %v1777_v62 = vrot.slane %v3277_v5, 5 }
  0x60   : > { %v1564_v15 = vshrl.u32 %v2550_v3, 16  ;;  %v1567_v16 = vshll.u32 %v2550_v3, 16  ;;  %v1063_v40 = vsel %vm2979_vm4, %v1058_v25, %v1062_v26  ;;  %v1575_v48 = vrot.slane %v1573_v12, 5  ;;  %v2609_v3 = vld [vmem:[%s2941_s12 + $0x18] sm:$0xe] }
  0x61   : > { %1338 = vmatpush.bf16.msra.mxu1 %v2726_v60  ;;  %1893 = vmatpush.bf16.msra.mxu0 %v3299_v27  ;;  %v3325_v60 = vld [vmem:[%s2941_s12 + $0x44] sm:$0x1]  ;;  %v1101_v45 = vunpack.c.l.b16 %v1063_v40  ;;  %v1235_v61 = vsel %vm2988_vm5, %v2419_v53, %v1234_v54  ;;  %v2552_v4 = vld [vmem:[%s2941_s12 + $0x30] sm:$0xf]  ;;  %v2554_v6 = vld [vmem:[%s2941_s12 + $0x38] sm:$0xf] }
  0x62   : > { %v1074_v14 = vshll.u32 %v3325_v60, 16  ;;  %v1566_v24 = vrot.slane %v1564_v15, 4  ;;  %v1569_v32 = vrot.slane %v1567_v16, 5  ;;  %2815 = vmatpush.bf16.msra.mxu2 %v3299_v27  ;;  %v1557_v27 = vrot.slane %v1556_v30, 4  ;;  %v2502_v16 = vld [vmem:[%s2941_s12 + $0x20] sm:$0xf] }
  0x63   : > { %v1272_v0 = vunpack.c.l.b16 %v1235_v61  ;;  %v1578_v11 = vshrl.u32 %v2552_v4, 16  ;;  %v1581_v13 = vshll.u32 %v2552_v4, 16  ;;  %v1592_v5 = vshrl.u32 %v2554_v6, 16  ;;  %v2412_v53 = vld [vmem:[%s2941_s12 + $0x28] sm:$0xe] }
  0x64   : > { %v1076_v47 = vrot.slane %v1074_v14, 5  ;;  %v1570_v35 = vor.u32 %v1569_v32, %v1566_v24  ;;  %v1562_v46 = vsel %vm2979_vm4, %v1557_v27, %v1561_v43  ;;  %v1781_v15 = vrot.slane %v3280_v7, 5  ;;  %v2413_v54 = vld [vmem:[%s2941_s12 + $0x30] sm:$0xe]  ;;  %v2610_v4 = vld [vmem:[%s2941_s12 + $0x20] sm:$0xe] }
  0x65   : > { %1339 = vmatpush.bf16.msra.mxu1 %v2725_v1  ;;  %1894 = vmatpush.bf16.msra.mxu0 %v2753_v18  ;;  %v1105_v1 = vpack.c.b16 %v1100_v59, %v1099_v58  ;;  %v1231_v59 = vsel %vm2988_vm5, %v2418_v50, %v1230_v52  ;;  %v1652_v19 = vunpack.c.l.b16 %v1562_v46  ;;  %v1580_v24 = vrot.slane %v1578_v11, 4  ;;  %v2506_v50 = vld [vmem:[%s2941_s12 + $0x30] sm:$0xf]  ;;  %v2611_v11 = vld [vmem:[%s2941_s12 + $0x28] sm:$0xe] }
  0x66   : > { %v1077_v41 = vsel %vm2979_vm4, %v1072_v29, %v1076_v47  ;;  %2816 = vmatpush.bf16.msra.mxu2 %v2753_v18  ;;  %v1571_v51 = vrot.slane %v1570_v35, 4  ;;  %v2679_v18 = vld [vmem:[%s2941_s12 + $0x34] sm:$0xf0]  ;;  %v1271_v44 = vunpack.c.l.b16 %v1231_v59  ;;  %v1583_v32 = vrot.slane %v1581_v13, 5  ;;  %v3381_v29 = vld [vmem:[%s2941_s12 + $0x34] sm:$0x1] }
  0x67   : > { %v1102_v58 = vunpack.c.l.b16 %v1077_v41  ;;  %v2183_v28 = vor.u32 %v2679_v18, %v2182_v55  ;;  %v3384_v47 = vld [vmem:[%s2941_s12 + $0x3c] sm:$0x1]  ;;  %v2556_v55 = vld [vmem:[%s2941_s12 + $0x40] sm:$0xf]  ;;  %v2421_v59 = vrot.slane %v2413_v54, 9  ;;  %v1242_v61 = vrot.slane %v3259_v39, 5 }
  0x68   : > { %v1576_v2 = vsel %vm2979_vm4, %v1571_v51, %v1575_v48  ;;  %v3375_v9 = vpack.c.b16 %v1272_v0, %v1271_v44  ;;  %v1584_v12 = vor.u32 %v1583_v32, %v1580_v24  ;;  %v1601_v35 = vshll.u32 %v3384_v47, 16  ;;  %v2558_v18 = vld [vmem:[%s2941_s12 + $0x48] sm:$0xf] }
  0x69   : > { %1340 = vmatpush.bf16.msra.mxu1 %v2724_v31  ;;  %v1658_v31 = vpack.c.b16 %v1651_v10, %v1650_v21  ;;  %1895 = vmatpush.bf16.msra.mxu0 %v2752_v34  ;;  %v1106_v14 = vpack.c.b16 %v1102_v58, %v1101_v45  ;;  %v1653_v20 = vunpack.c.l.b16 %v1576_v2  ;;  %v2616_v21 = vrot.slane %v2608_v63, 9 }
  0x6a   : > { %2817 = vmatpush.bf16.msra.mxu2 %v2752_v34  ;;  %v2617_v10 = vrot.slane %v2609_v3, 9  ;;  %v1585_v40 = vrot.slane %v1584_v12, 4  ;;  %v1603_v43 = vrot.slane %v1601_v35, 5  ;;  %v2420_v45 = vrot.slane %v2412_v53, 9 }
  0x6b   : > { %v1659_v30 = vpack.c.b16 %v1653_v20, %v1652_v19  ;;  %v1778_v7 = vsel %vm2988_vm5, %v2616_v21, %v1777_v62  ;;  %v1238_v58 = vrot.slane %v3256_v33, 5  ;;  %v2734_v62 = vld [vmem:[%s2941_s12 + $0x34] sm:$0xf0]  ;;  %v1606_v63 = vshrl.u32 %v2556_v55, 16 }
  0x6c   : > { %627 = vmatmul.bf16.gmra.mxu1 %v2179_v17  ;;  %1177 = vmatmul.bf16.gmra.mxu0 %v1105_v1  ;;  %v2733_v17 = vld [vmem:[%s2941_s12 + $0x24] sm:$0xf0]  ;;  %v1595_v1 = vshll.u32 %v2554_v6, 16  ;;  %v1782_v56 = vsel %vm2988_vm5, %v2617_v10, %v1781_v15  ;;  %v1824_v37 = vunpack.c.l.b16 %v1778_v7  ;;  %v1609_v44 = vshll.u32 %v2556_v55, 16  ;;  %v3411_v15 = vld [vmem:[%s2941_s12 + $0x44] sm:$0x1] }
  0x6d   : > { %v2503_v26 = vor.u32 %v2733_v17, %v2502_v16  ;;  %v1825_v38 = vunpack.c.l.b16 %v1782_v56  ;;  %v1620_v0 = vshrl.u32 %v2558_v18, 16  ;;  %v1623_v46 = vshll.u32 %v2558_v18, 16  ;;  %v3414_v16 = vld [vmem:[%s2941_s12 + $0x4c] sm:$0x1] }
  0x6e   : > { %1722 = vmatmul.bf16.vlgmr.msrb.gmra.mxu3 %v1658_v31  ;;  %v1597_v25 = vrot.slane %v1595_v1, 5  ;;  %v1587_v31 = vshll.u32 %v3381_v29, 16  ;;  %v1239_v6 = vsel %vm2988_vm5, %v2420_v45, %v1238_v58  ;;  %v1243_v33 = vsel %vm2988_vm5, %v2421_v59, %v1242_v61  ;;  %v2613_v61 = vld [vmem:[%s2941_s12 + $0x38] sm:$0xe] }
  0x6f   : > { %1476 = vmatmul.bf16.vlgmr.msrb.gmra.mxu2 %v2499_v36  ;;  %v1594_v36 = vrot.slane %v1592_v5, 4  ;;  %v1832_v48 = vpack.c.b16 %v1825_v38, %v1824_v37  ;;  %v1273_v13 = vunpack.c.l.b16 %v1239_v6  ;;  %v1274_v39 = vunpack.c.l.b16 %v1243_v33  ;;  %v2414_v38 = vld [vmem:[%s2941_s12 + $0x38] sm:$0xe] }
  0x70   : > { %v1589_v41 = vrot.slane %v1587_v31, 5  ;;  %v1608_v5 = vrot.slane %v1606_v63, 4  ;;  %v1622_v17 = vrot.slane %v1620_v0, 4  ;;  %v1625_v1 = vrot.slane %v1623_v46, 5  ;;  %v2615_v63 = vld [vmem:[%s2941_s12 + $0x48] sm:$0xe] }
  0x71   : > { %v1598_v34 = vor.u32 %v1597_v25, %v1594_v36  ;;  %v2618_v19 = vrot.slane %v2610_v4, 9  ;;  %v3416_v20 = vpack.c.b16 %v1274_v39, %v1273_v13  ;;  %v1785_v10 = vrot.slane %v3341_v22, 5 }
  0x72   : > { %v1590_v51 = vsel %vm2979_vm4, %v1585_v40, %v1589_v41  ;;  %v2619_v24 = vrot.slane %v2611_v11, 9  ;;  %v1789_v32 = vrot.slane %v3344_v23, 5  ;;  %v1615_v25 = vshll.u32 %v3411_v15, 16  ;;  %v2415_v40 = vld [vmem:[%s2941_s12 + $0x40] sm:$0xe] }
  0x73   : > { %v1599_v27 = vrot.slane %v1598_v34, 4  ;;  %v1654_v2 = vunpack.c.l.b16 %v1590_v51  ;;  %v1786_v7 = vsel %vm2988_vm5, %v2618_v19, %v1785_v10  ;;  %v2422_v41 = vrot.slane %v2414_v38, 9  ;;  %v2735_v51 = vld [vmem:[%s2941_s12 + $0x44] sm:$0xf0] }
  0x74   : > { %v1790_v22 = vsel %vm2988_vm5, %v2619_v24, %v1789_v32  ;;  %v1617_v23 = vrot.slane %v1615_v25, 5  ;;  %v1826_v31 = vunpack.c.l.b16 %v1786_v7  ;;  %v1793_v0 = vrot.slane %v3381_v29, 5 }
  0x75   : > { %v1604_v52 = vsel %vm2979_vm4, %v1599_v27, %v1603_v43  ;;  %v1827_v34 = vunpack.c.l.b16 %v1790_v22  ;;  %v1246_v27 = vrot.slane %v3312_v42, 5  ;;  %v2423_v43 = vrot.slane %v2415_v40, 9  ;;  %v2612_v42 = vld [vmem:[%s2941_s12 + $0x30] sm:$0xe] }
  0x76   : > { %v1655_v3 = vunpack.c.l.b16 %v1604_v52  ;;  %v2621_v46 = vrot.slane %v2613_v61, 9  ;;  %v1805_v4 = vrot.slane %v3414_v16, 5  ;;  %v2623_v33 = vrot.slane %v2615_v63, 9 }
  0x77   : > { %v1833_v52 = vpack.c.b16 %v1827_v34, %v1826_v31  ;;  %v1247_v53 = vsel %vm2988_vm5, %v2422_v41, %v1246_v27 }
  0x78   : > { %v1660_v21 = vpack.c.b16 %v1655_v3, %v1654_v2  ;;  %v1275_v45 = vunpack.c.l.b16 %v1247_v53  ;;  %v1797_v2 = vrot.slane %v3384_v47, 5  ;;  %v1801_v3 = vrot.slane %v3411_v15, 5 }
  0x79   : > { %v1806_v29 = vsel %vm2988_vm5, %v2623_v33, %v1805_v4 }
  0x7c   : > { %632 = vmatmul.bf16.gmra.mxu1 %v2183_v28  ;;  %1182 = vmatmul.bf16.gmra.mxu0 %v1106_v14  ;;  %v1611_v28 = vrot.slane %v1609_v44, 5  ;;  %v2507_v14 = vor.u32 %v2734_v62, %v2506_v50  ;;  %v2510_v50 = vld [vmem:[%s2941_s12 + $0x40] sm:$0xf]  ;;  %v2620_v44 = vrot.slane %v2612_v42, 9 }
  0x7d   : > { %v2511_v59 = vor.u32 %v2735_v51, %v2510_v50  ;;  %v2614_v62 = vld [vmem:[%s2941_s12 + $0x40] sm:$0xe]  ;;  %s2674_s12 = sshll.u32 %s3554_s15, 5 }
  0x7e   : > { %1727 = vmatmul.bf16.gmra.mxu3 %v1659_v30  ;;  %v1612_v36 = vor.u32 %v1611_v28, %v1608_v5  ;;  %v1629_v30 = vshll.u32 %v3414_v16, 16  ;;  %v2622_v6 = vrot.slane %v2614_v62, 9  ;;  %v1794_v11 = vsel %vm2988_vm5, %v2620_v44, %v1793_v0  ;;  %s3490_s21 = scalar_lea.vmem %s3543_s3, %s2674_s12  ;;  %s3507_s26 = scalar_lea.vmem %s3544_s4, %s2674_s12 }
  0x7f   : > { %1481 = vmatmul.bf16.gmra.mxu2 %v2503_v26  ;;  %v1626_v26 = vor.u32 %v1625_v1, %v1622_v17  ;;  %v1828_v47 = vunpack.c.l.b16 %v1794_v11  ;;  %v1831_v28 = vunpack.c.l.b16 %v1806_v29 }
  0x80   : > { %v1631_v12 = vrot.slane %v1629_v30, 5  ;;  %v1802_v13 = vsel %vm2988_vm5, %v2622_v6, %v1801_v3 }
  0x81   : > { %v1627_v56 = vrot.slane %v1626_v26, 4  ;;  %v1830_v5 = vunpack.c.l.b16 %v1802_v13 }
  0x83   : > { %v1632_v37 = vsel %vm2979_vm4, %v1627_v56, %v1631_v12  ;;  %v1835_v17 = vpack.c.b16 %v1831_v28, %v1830_v5 }
  0x84   : > { %v1657_v55 = vunpack.c.l.b16 %v1632_v37 }
  0x8c   : > { %1341 = vmatmul.bf16.vlgmr.msra.gmra.mxu1 %v3336_v8  ;;  %1896 = vmatmul.bf16.vlgmr.msra.gmra.mxu0 %v1832_v48  ;;  %v1613_v8 = vrot.slane %v1612_v36, 4  ;;  %v1250_v48 = vrot.slane %v3325_v60, 5 }
  0x8e   : > { %1732 = vmatmul.bf16.gmra.mxu3 %v1660_v21  ;;  %v1618_v35 = vsel %vm2979_vm4, %v1613_v8, %v1617_v23  ;;  %v1251_v49 = vsel %vm2988_vm5, %v2423_v43, %v1250_v48 }
  0x8f   : > { %1486 = vmatmul.bf16.gmra.mxu2 %v2507_v14  ;;  %v1656_v54 = vunpack.c.l.b16 %v1618_v35  ;;  %v1276_v58 = vunpack.c.l.b16 %v1251_v49 }
  0x91   : > { %v1280_v18 = vpack.c.b16 %v1276_v58, %v1275_v45  ;;  %v1661_v60 = vpack.c.b16 %v1657_v55, %v1656_v54 }
  0x9c   : > { %1346 = vmatmul.bf16.gmra.mxu1 %v3375_v9  ;;  %1901 = vmatmul.bf16.gmra.mxu0 %v1833_v52  ;;  %v1798_v9 = vsel %vm2988_vm5, %v2621_v46, %v1797_v2 }
  0x9d   : > { %v1829_v39 = vunpack.c.l.b16 %v1798_v9 }
  0x9e   : > { %1737 = vmatmul.bf16.gmra.mxu3 %v1661_v60 }
  0x9f   : > { %1491 = vmatmul.bf16.gmra.mxu2 %v2511_v59  ;;  %v1834_v14 = vpack.c.b16 %v1829_v39, %v1828_v47 }
  0xa9   : > { %v527_v15 = vpop.f32.mrf.mxu1  ;;  %v517_v16 = vpop.f32.mrf.mxu0 }
  0xac   : > { %1351 = vmatmul.bf16.gmra.mxu1 %v3416_v20  ;;  %1906 = vmatmul.bf16.gmra.mxu0 %v1834_v14 }
  0xaf   : > { %1911 = vmatmul.bf16.vlgmr.msra.gmra.mxu2 %v1835_v17 }
  0xb1   : > { %v529_v19 = vpop.f32.mrf.mxu1  ;;  %v519_v21 = vpop.f32.mrf.mxu0 }
  0xb2   : > { %v787_v1 = vpop.f32.mrf.mxu2  ;;  %v922_v10 = vpop.f32.mrf.mxu3 }
  0xb9   : > { %v532_v32 = vpop.f32.mrf.mxu1  ;;  %v522_v57 = vpop.f32.mrf.mxu0 }
  0xba   : > { %v789_v24 = vpop.f32.mrf.mxu2  ;;  %v3459_v36 = vpop.f32.mrf.mxu3 }
  0xbc   : > { %1356 = vmatmul.bf16.gmra.mxu1 %v1280_v18 }
  0xc1   : > { %v534_v26 = vpop.f32.mrf.mxu1  ;;  %v524_v30 = vpop.f32.mrf.mxu0 }
  0xc2   : > { %v792_v25 = vpop.f32.mrf.mxu2  ;;  %v927_v7 = vpop.f32.mrf.mxu3 }
  0xc9   : > { %v618_v8 = vpop.f32.mrf.mxu1  ;;  %v1168_v23 = vpop.f32.mrf.mxu0 }
  0xca   : > { %v794_v22 = vpop.f32.mrf.mxu2  ;;  %v619_v20 = vadd.f32 %v618_v8, %v517_v16  ;;  %v3461_v12 = vpop.f32.mrf.mxu3 }
  0xcc   : > { %v807_v56 = vadd.f32 %v787_v1, %v619_v20  ;;  %v3495_v20 = vld [vmem:[%s3542_s2] ss:$0 sm:$0xff] }
  0xce   : > { %v942_v31 = vadd.f32 %v922_v10, %v807_v56  ;;  %v2761_v56 = vld [vmem:[%s3490_s21] sm:$0xff]  }
  0xd0   : > { %v1188_v34 = vadd.f32 %v1168_v23, %v942_v31 }
  0xd1   : > { %v620_v37 = vpop.f32.mrf.mxu1  ;;  %v1170_v38 = vpop.f32.mrf.mxu0 }
  0xd2   : > { %v797_v35 = vpop.f32.mrf.mxu2  ;;  %v621_v40 = vadd.f32 %v620_v37, %v519_v21  ;;  %v932_v27 = vpop.f32.mrf.mxu3 }
  0xd4   : > { %v808_v41 = vadd.f32 %v789_v24, %v621_v40 }
  0xd9   : > { %v623_v48 = vpop.f32.mrf.mxu1  ;;  %v1173_v50 = vpop.f32.mrf.mxu0 }
  0xda   : > { %v799_v43 = vpop.f32.mrf.mxu2  ;;  %v624_v51 = vadd.f32 %v623_v48, %v522_v57  ;;  %v3465_v55 = vpop.f32.mrf.mxu3 }
  0xdc   : > { %v809_v52 = vadd.f32 %v792_v25, %v624_v51 }
  0xde   : > { %v944_v53 = vadd.f32 %v927_v7, %v809_v52 }
  0xe0   : > { %v3463_v49 = vadd.f32 %v1173_v50, %v944_v53 }
  0xe1   : > { %v625_v45 = vpop.f32.mrf.mxu1  ;;  %v3467_v58 = vpop.f32.mrf.mxu0 }
  0xe2   : > { %v802_v54 = vpop.f32.mrf.mxu2  ;;  %v626_v59 = vadd.f32 %v625_v45, %v524_v30  ;;  %v937_v60 = vpop.f32.mrf.mxu3 }
  0xe4   : > { %v810_v42 = vadd.f32 %v794_v22, %v626_v59 }
  0xe6   : > { %v945_v53 = vadd.f32 %v3461_v12, %v810_v42 }
  0xe9   : > { %v628_v18 = vpop.f32.mrf.mxu1  ;;  %v1178_v62 = vpop.f32.mrf.mxu0 }
  0xea   : > { %v804_v61 = vpop.f32.mrf.mxu2  ;;  %v629_v63 = vadd.f32 %v628_v18, %v527_v15  ;;  %v3475_v11 = vpop.f32.mrf.mxu3 }
  0xec   : > { %v811_v44 = vadd.f32 %v797_v35, %v629_v63 }
  0xee   : > { %v946_v0 = vadd.f32 %v932_v27, %v811_v44  ;;  %v2763_v27 = vunpack.c.h.bf16 %v2761_v56 }
  0xf0   : > { %v3469_v46 = vadd.f32 %v1178_v62, %v946_v0 }
  0xf1   : > { %v630_v3 = vpop.f32.mrf.mxu1  ;;  %v3471_v4 = vpop.f32.mrf.mxu0 }
  0xf2   : > { %v1477_v2 = vpop.f32.mrf.mxu2  ;;  %v631_v6 = vadd.f32 %v630_v3, %v529_v19  ;;  %v1723_v28 = vpop.f32.mrf.mxu3 }
  0xf4   : > { %v3473_v33 = vadd.f32 %v799_v43, %v631_v6 }
  0xf9   : > { %v633_v13 = vpop.f32.mrf.mxu1  ;;  %v1183_v29 = vpop.f32.mrf.mxu0 }
  0xfa   : > { %v1479_v9 = vpop.f32.mrf.mxu2  ;;  %v634_v47 = vadd.f32 %v633_v13, %v532_v32  ;;  %v1725_v21 = vpop.f32.mrf.mxu3  ;;  %v943_v32 = vadd.f32 %v3459_v36, %v808_v41 }
  0xfc   : > { %v813_v39 = vadd.f32 %v802_v54, %v634_v47  ;;  %v1189_v22 = vadd.f32 %v1170_v38, %v943_v32  ;;  %v2762_v38 = vunpack.c.l.bf16 %v2761_v56 }
  0xfe   : > { %v948_v5 = vadd.f32 %v937_v60, %v813_v39  ;;  %v1191_v60 = vadd.f32 %v3467_v58, %v945_v53 }
 0x100   : > { %v3477_v14 = vadd.f32 %v1183_v29, %v948_v5 }
 0x101   : > { %v635_v16 = vpop.f32.mrf.mxu1  ;;  %v3479_v17 = vpop.f32.mrf.mxu0 }
 0x102   : > { %v1482_v15 = vpop.f32.mrf.mxu2  ;;  %v636_v1 = vadd.f32 %v635_v16, %v534_v26  ;;  %v1728_v31 = vpop.f32.mrf.mxu3 }
 0x104   : > { %v3481_v19 = vadd.f32 %v804_v61, %v636_v1 }
 0x109   : > { %v1342_v10 = vpop.f32.mrf.mxu1  ;;  %v1897_v24 = vpop.f32.mrf.mxu0 }
 0x10a   : > { %v1362_v57 = vadd.f32 %v1342_v10, %v1188_v34  ;;  %v1484_v25 = vpop.f32.mrf.mxu2  ;;  %v1730_v59 = vpop.f32.mrf.mxu3 }
 0x10c   : > { %v1497_v30 = vadd.f32 %v1477_v2, %v1362_v57  ;;  %v2796_v2 = vld [vmem:[%s3490_s21 + $0x8] sm:$0xff]  }
 0x10d   : > { %v2767_v39 = vunpack.c.h.bf16 %v2796_v2 }
 0x10e   : > { %v1743_v7 = vadd.f32 %v1723_v28, %v1497_v30 }
 0x110   : > { %v1917_v23 = vadd.f32 %v1897_v24, %v1743_v7 }
 0x111   : > { %v1344_v26 = vpop.f32.mrf.mxu1  ;;  %v1899_v8 = vpop.f32.mrf.mxu0 }
 0x112   : > { %v1363_v36 = vadd.f32 %v1344_v26, %v1189_v22  ;;  %v1487_v35 = vpop.f32.mrf.mxu2  ;;  %v1929_v37 = vadd.f32 %v3495_v20, %v1917_v23  ;;  %v1733_v29 = vpop.f32.mrf.mxu3 }
 0x114   : > { %v1498_v34 = vadd.f32 %v1479_v9, %v1363_v36  ;;  %v1953_v50 = vadd.f32 %v2762_v38, %v1929_v37  ;;  %v2766_v9 = vunpack.c.l.bf16 %v2796_v2 }
 0x116   : > { %v1744_v40 = vadd.f32 %v1725_v21, %v1498_v34  ;;  %v1961_v61 = vmax.f32 %v1953_v50, 0.0  ;;  %v947_v21 = vadd.f32 %v3465_v55, %v3473_v33 }
 0x118   : > { %v1918_v41 = vadd.f32 %v1899_v8, %v1744_v40  ;;  %v1193_v30 = vadd.f32 %v3471_v4, %v947_v21 }
 0x119   : > { %v1347_v43 = vpop.f32.mrf.mxu1  ;;  %v1902_v48 = vpop.f32.mrf.mxu0 }
 0x11a   : > { %v1930_v51 = vadd.f32 %v3495_v20, %v1918_v41  ;;  %v1364_v52 = vadd.f32 %v1347_v43, %v3463_v49  ;;  %v1489_v63 = vpop.f32.mrf.mxu2  ;;  %v1735_v22 = vpop.f32.mrf.mxu3  ;;  %v949_v43 = vadd.f32 %v3475_v11, %v3481_v19 }
 0x11c   : > { %v1954_v54 = vadd.f32 %v2763_v27, %v1930_v51  ;;  %v1499_v45 = vadd.f32 %v1482_v15, %v1364_v52 }
 0x11e   : > { %v1962_v18 = vmax.f32 %v1954_v54, 0.0  ;;  %v1745_v62 = vadd.f32 %v1728_v31, %v1499_v45  ;;  %v1195_v45 = vadd.f32 %v3479_v17, %v949_v43 }
 0x120   : > { %v2779_v49 = vpack.c.bf16 %v1962_v18, %v1961_v61  ;;  %v1919_v42 = vadd.f32 %v1902_v48, %v1745_v62 }
 0x121   : > { %v1349_v44 = vpop.f32.mrf.mxu1  ;;  %v1904_v12 = vpop.f32.mrf.mxu0 }
 0x122   : > { %2780 = vst [vmem:[%s3507_s26] sm:$0xff] %v2779_v49   ;;  %v1365_v0 = vadd.f32 %v1349_v44, %v1191_v60  ;;  %v1931_v6 = vadd.f32 %v3495_v20, %v1919_v42  ;;  %v1492_v5 = vpop.f32.mrf.mxu2  ;;  %v1738_v27 = vpop.f32.mrf.mxu3 }
 0x124   : > { %v1500_v3 = vadd.f32 %v1484_v25, %v1365_v0  ;;  %v1955_v15 = vadd.f32 %v2766_v9, %v1931_v6 }
 0x126   : > { %v1746_v13 = vadd.f32 %v1730_v59, %v1500_v3  ;;  %v1963_v57 = vmax.f32 %v1955_v15, 0.0 }
 0x128   : > { %v1920_v47 = vadd.f32 %v1904_v12, %v1746_v13 }
 0x129   : > { %v1352_v28 = vpop.f32.mrf.mxu1  ;;  %v1907_v1 = vpop.f32.mrf.mxu0 }
 0x12a   : > { %v1932_v58 = vadd.f32 %v3495_v20, %v1920_v47  ;;  %v1366_v16 = vadd.f32 %v1352_v28, %v3469_v46  ;;  %v1494_v36 = vpop.f32.mrf.mxu2  ;;  %v2797_v46 = vld [vmem:[%s3490_s21 + $0x10] sm:$0xff]   ;;  %v1740_v60 = vpop.f32.mrf.mxu3 }
 0x12b   : > { %v2770_v55 = vunpack.c.l.bf16 %v2797_v46  ;;  %v2771_v37 = vunpack.c.h.bf16 %v2797_v46 }
 0x12c   : > { %v1956_v10 = vadd.f32 %v2767_v39, %v1932_v58  ;;  %v1501_v24 = vadd.f32 %v1487_v35, %v1366_v16 }
 0x12e   : > { %v1964_v25 = vmax.f32 %v1956_v10, 0.0  ;;  %v1747_v32 = vadd.f32 %v1733_v29, %v1501_v24 }
 0x130   : > { %v2784_v7 = vpack.c.bf16 %v1964_v25, %v1963_v57  ;;  %v1921_v8 = vadd.f32 %v1907_v1, %v1747_v32 }
 0x131   : > { %v1354_v26 = vpop.f32.mrf.mxu1  ;;  %v1909_v31 = vpop.f32.mrf.mxu0 }
 0x132   : > { %2799 = vst [vmem:[%s3507_s26 + $0x8] sm:$0xff] %v2784_v7   ;;  %v1367_v23 = vadd.f32 %v1354_v26, %v1193_v30  ;;  %v1933_v34 = vadd.f32 %v3495_v20, %v1921_v8  ;;  %v1912_v51 = vpop.f32.mrf.mxu2 }
 0x134   : > { %v1502_v56 = vadd.f32 %v1489_v63, %v1367_v23  ;;  %v1957_v40 = vadd.f32 %v2770_v55, %v1933_v34  ;;  %v2798_v63 = vld [vmem:[%s3490_s21 + $0x18] sm:$0xff]  }
 0x135   : > { %v2774_v11 = vunpack.c.l.bf16 %v2798_v63  ;;  %v2775_v42 = vunpack.c.h.bf16 %v2798_v63 }
 0x136   : > { %v1748_v33 = vadd.f32 %v1735_v22, %v1502_v56  ;;  %v1965_v52 = vmax.f32 %v1957_v40, 0.0 }
 0x138   : > { %v1922_v35 = vadd.f32 %v1909_v31, %v1748_v33 }
 0x139   : > { %v1357_v38 = vpop.f32.mrf.mxu1 }
 0x13a   : > { %v1934_v4 = vadd.f32 %v3495_v20, %v1922_v35  ;;  %v1368_v41 = vadd.f32 %v1357_v38, %v3477_v14  ;;  %v1914_v44 = vpop.f32.mrf.mxu2 }
 0x13c   : > { %v1958_v48 = vadd.f32 %v2771_v37, %v1934_v4  ;;  %v1503_v50 = vadd.f32 %v1492_v5, %v1368_v41 }
 0x13e   : > { %v1966_v53 = vmax.f32 %v1958_v48, 0.0  ;;  %v1749_v54 = vadd.f32 %v1738_v27, %v1503_v50 }
 0x140   : > { %v2789_v59 = vpack.c.bf16 %v1966_v53, %v1965_v52  ;;  %v1923_v18 = vadd.f32 %v1912_v51, %v1749_v54 }
 0x141   : > { %v1359_v61 = vpop.f32.mrf.mxu1 }
 0x142   : > { %2800 = vst [vmem:[%s3507_s26 + $0x10] sm:$0xff] %v2789_v59   ;;  %v1369_v62 = vadd.f32 %v1359_v61, %v1195_v45  ;;  %v1935_v49 = vadd.f32 %v3495_v20, %v1923_v18 }
 0x144   : > { %v1504_v14 = vadd.f32 %v1494_v36, %v1369_v62  ;;  %v1959_v0 = vadd.f32 %v2774_v11, %v1935_v49 }
 0x146   : > { %v1750_v19 = vadd.f32 %v1740_v60, %v1504_v14  ;;  %v1967_v3 = vmax.f32 %v1959_v0, 0.0 }
 0x148   : > { %v1924_v12 = vadd.f32 %v1914_v44, %v1750_v19 }
 0x14a   : > { %v1936_v2 = vadd.f32 %v3495_v20, %v1924_v12 }
 0x14c   : > { %v1960_v17 = vadd.f32 %v2775_v42, %v1936_v2 }
 0x14e   : > { %v1968_v6 = vmax.f32 %v1960_v17, 0.0 }
 0x150   : > { %v2794_v9 = vpack.c.bf16 %v1968_v6, %v1967_v3 }
 0x152   : > { %2801 = vst [vmem:[%s3507_s26 + $0x18] sm:$0xff] %v2794_v9  }
 0x153 PF: > { %s14_s17 = sadd.s32 1, %s2866_s17   ;;  %s3549_s15 = smov %s2862_s16 }
 0x154   : > { %p11_p5 = scmp.ge.s32.totalorder %s14_s17, 4   ;;  %s3550_s16 = smov %s3552_s18 }
 0x156   :  { %13 = sbr.rel (!%p11_p5) target bundleno = 2 (0x2), region = 85 }

</bundles_post_ra>
